<compile_context>
chip_gen: v6e
topology: v6e:2x2x1
jax: 0.10.0
libtpu: 0.0.40
codegen_flags: <defaults>
</compile_context>

<pallas_src>
import functools

import jax
import jax.numpy as jnp
import numpy as np
from jax.experimental import pallas as pl
from jax.experimental.pallas import tpu as pltpu


def _g_lstm_kernel(x_ref, win_ref, bin_ref, whhf_ref, whhb_ref,
                   wgf_ref, wgb_ref, bg_ref,
                   out_ref, px_ref, hf_ref, hb_ref, *, S, B, H):
    """Whole-batch bidirectional LSTM + fused output linear.

    x_ref    : (S*B, in_dim)  time-major flattened input (row t*B + b)
    win_ref  : (in_dim, 8H)   [W_ih_fwd.T | W_ih_bwd.T]
    bin_ref  : (1, 8H)        [b_ih_f + b_hh_f | b_ih_b + b_hh_b]
    whh*_ref : (H, 4H)        recurrent weights, transposed
    wg*_ref  : (H, H)         halves of glinear.weight, transposed
    bg_ref   : (1, H)         glinear bias
    out_ref  : (S*B, H)       time-major glinear output
    px_ref   : (S*B, 8H)      VMEM scratch: fused input projections
    hf_ref/hb_ref : (S*B, H)  VMEM scratch: per-step hidden states
    """
    H4 = 4 * H
    hp = jax.lax.Precision.HIGHEST

    # Fused input projection for both directions (biases pre-folded on host).
    px_ref[...] = (jnp.dot(x_ref[...], win_ref[...],
                           preferred_element_type=jnp.float32, precision=hp)
                   + bin_ref[...])

    def lstm_cell(gates, c):
        # PyTorch gate order: i, f, g(cell), o
        i = jax.nn.sigmoid(gates[:, 0:H])
        f = jax.nn.sigmoid(gates[:, H:2 * H])
        g = jnp.tanh(gates[:, 2 * H:3 * H])
        o = jax.nn.sigmoid(gates[:, 3 * H:4 * H])
        c_new = f * c + i * g
        h_new = o * jnp.tanh(c_new)
        return h_new, c_new

    h_f = jnp.zeros((B, H), jnp.float32)
    c_f = jnp.zeros((B, H), jnp.float32)
    h_b = jnp.zeros((B, H), jnp.float32)
    c_b = jnp.zeros((B, H), jnp.float32)

    # Sequential recurrence, statically unrolled (S is small): static slice
    # offsets everywhere, lane slices 0:4H / 4H:8H are 128-lane aligned.
    for t in range(S):
        tb = S - 1 - t                                 # time index, bwd pass
        gx_f = px_ref[t * B:(t + 1) * B, 0:H4]
        gx_b = px_ref[tb * B:(tb + 1) * B, H4:2 * H4]
        gates_f = gx_f + jnp.dot(h_f, whhf_ref[...],
                                 preferred_element_type=jnp.float32,
                                 precision=hp)
        gates_b = gx_b + jnp.dot(h_b, whhb_ref[...],
                                 preferred_element_type=jnp.float32,
                                 precision=hp)
        h_f, c_f = lstm_cell(gates_f, c_f)
        h_b, c_b = lstm_cell(gates_b, c_b)
        hf_ref[t * B:(t + 1) * B, :] = h_f             # fwd hidden at time t
        hb_ref[tb * B:(tb + 1) * B, :] = h_b           # bwd hidden at time tb

    # Fused concat + glinear: [h_fwd | h_bwd] @ Wg.T + bg as two matmuls.
    out = (jnp.dot(hf_ref[...], wgf_ref[...],
                   preferred_element_type=jnp.float32, precision=hp)
           + jnp.dot(hb_ref[...], wgb_ref[...],
                     preferred_element_type=jnp.float32, precision=hp)
           + bg_ref[...])
    out_ref[...] = out


def g_lstm_fwd(x, params):
    """x: (B, S, in_dim). Returns (out (B, S, H), x) like G_LSTM.forward."""
    (Wih_f, Whh_f, bih_f, bhh_f,
     Wih_b, Whh_b, bih_b, bhh_b, Wg, bg) = params
    B, S, in_dim = x.shape
    H = Whh_f.shape[1]

    # Host-side weight prep: fuse the two directions' input projections,
    # fold b_ih + b_hh, split + transpose glinear for right-multiplication.
    win = jnp.concatenate([Wih_f.T, Wih_b.T], axis=1)            # (in_dim, 8H)
    bin_ = jnp.concatenate([bih_f + bhh_f, bih_b + bhh_b]).reshape(1, 8 * H)
    whhf = Whh_f.T                                               # (H, 4H)
    whhb = Whh_b.T                                               # (H, 4H)
    wgf = Wg[:, :H].T                                            # (H, H)
    wgb = Wg[:, H:].T                                            # (H, H)
    bg2 = bg.reshape(1, H)

    # Time-major flattened input: row t*B + b  <->  (batch b, time t).
    x_tm = jnp.transpose(x, (1, 0, 2)).reshape(S * B, in_dim)

    kernel = functools.partial(_g_lstm_kernel, S=S, B=B, H=H)
    vmem_spec = functools.partial(pl.BlockSpec,
                                  memory_space=pltpu.MemorySpace.VMEM)

    out_tm = pl.pallas_call(
        kernel,
        out_shape=jax.ShapeDtypeStruct((S * B, H), jnp.float32),
        in_specs=[vmem_spec() for _ in range(8)],
        out_specs=vmem_spec(),
        scratch_shapes=[pltpu.VMEM((S * B, 8 * H), jnp.float32),
                        pltpu.VMEM((S * B, H), jnp.float32),
                        pltpu.VMEM((S * B, H), jnp.float32)],
    )(x_tm, win, bin_, whhf, whhb, wgf, wgb, bg2)

    out = out_tm.reshape(S, B, H).transpose(1, 0, 2)             # (B, S, H)
    return out, x


# ------------------------- pure-JAX reference ------------------------------
def _lstm_direction_ref(x, Wih, Whh, bih, bhh):
    B, S, _ = x.shape
    H = Whh.shape[1]
    hp = jax.lax.Precision.HIGHEST

    def step(carry, xt):
        h, c = carry
        gates = (jnp.matmul(xt, Wih.T, precision=hp) + bih
                 + jnp.matmul(h, Whh.T, precision=hp) + bhh)
        i = jax.nn.sigmoid(gates[:, 0:H])
        f = jax.nn.sigmoid(gates[:, H:2 * H])
        g = jnp.tanh(gates[:, 2 * H:3 * H])
        o = jax.nn.sigmoid(gates[:, 3 * H:4 * H])
        c = f * c + i * g
        h = o * jnp.tanh(c)
        return (h, c), h

    xs = jnp.transpose(x, (1, 0, 2))
    init = (jnp.zeros((B, H), jnp.float32), jnp.zeros((B, H), jnp.float32))
    _, hs = jax.lax.scan(step, init, xs)
    return jnp.transpose(hs, (1, 0, 2))                          # (B, S, H)


def _reference_fwd(x, params):
    (Wih_f, Whh_f, bih_f, bhh_f,
     Wih_b, Whh_b, bih_b, bhh_b, Wg, bg) = params
    hp = jax.lax.Precision.HIGHEST
    hf = _lstm_direction_ref(x, Wih_f, Whh_f, bih_f, bhh_f)
    hb = _lstm_direction_ref(x[:, ::-1, :], Wih_b, Whh_b, bih_b, bhh_b)
    hb = hb[:, ::-1, :]
    out = jnp.matmul(jnp.concatenate([hf, hb], axis=-1), Wg.T,
                     precision=hp) + bg
    return out, x


if __name__ == "__main__":
    # Small shapes consistent with the module: (batch, seqlen, in_dim), hidden.
    B, S, in_dim, hidden = 2, 8, 16, 32

    key = jax.random.PRNGKey(0)
    ks = jax.random.split(key, 11)

    x = jax.random.normal(ks[0], (B, S, in_dim), jnp.float32)

    def w(k, shape, scale=0.1):
        return scale * jax.random.normal(k, shape, jnp.float32)

    params = (
        w(ks[1], (4 * hidden, in_dim)),     # weight_ih_l0
        w(ks[2], (4 * hidden, hidden)),     # weight_hh_l0
        w(ks[3], (4 * hidden,)),            # bias_ih_l0
        w(ks[4], (4 * hidden,)),            # bias_hh_l0
        w(ks[5], (4 * hidden, in_dim)),     # weight_ih_l0_reverse
        w(ks[6], (4 * hidden, hidden)),     # weight_hh_l0_reverse
        w(ks[7], (4 * hidden,)),            # bias_ih_l0_reverse
        w(ks[8], (4 * hidden,)),            # bias_hh_l0_reverse
        w(ks[9], (hidden, 2 * hidden)),     # glinear.weight
        w(ks[10], (hidden,)),               # glinear.bias
    )

    out, x_echo = g_lstm_fwd(x, params)
    out = jax.block_until_ready(out)
    x_echo = jax.block_until_ready(x_echo)

    out_ref, _ = _reference_fwd(x, params)
    np.testing.assert_allclose(np.asarray(out), np.asarray(out_ref),
                               rtol=5e-3, atol=5e-3)
    np.testing.assert_allclose(np.asarray(x_echo), np.asarray(x),
                               rtol=0, atol=0)

    print("KERNEL_OK")
</pallas_src>

<mosaic_0001>
module attributes {stable_mosaic.version = 11 : i64} {
  func.func @_g_lstm_kernel(%arg0: memref<16x16xf32, #tpu.memory_space<vmem>>, %arg1: memref<16x256xf32, #tpu.memory_space<vmem>>, %arg2: memref<1x256xf32, #tpu.memory_space<vmem>>, %arg3: memref<32x128xf32, #tpu.memory_space<vmem>>, %arg4: memref<32x128xf32, #tpu.memory_space<vmem>>, %arg5: memref<32x32xf32, #tpu.memory_space<vmem>>, %arg6: memref<32x32xf32, #tpu.memory_space<vmem>>, %arg7: memref<1x32xf32, #tpu.memory_space<vmem>>, %arg8: memref<16x32xf32, #tpu.memory_space<vmem>>, %arg9: memref<16x256xf32, #tpu.memory_space<vmem>>, %arg10: memref<16x32xf32, #tpu.memory_space<vmem>>, %arg11: memref<16x32xf32, #tpu.memory_space<vmem>>) attributes {dimension_semantics = [], scalar_prefetch = 0 : i64, scratch_operands = 3 : i64, tpu.core_type = #tpu.core_type<tc>} {
    %c0 = arith.constant 0 : index
    %c0_0 = arith.constant 0 : index
    %0 = vector.load %arg0[%c0, %c0_0] : memref<16x16xf32, #tpu.memory_space<vmem>>, vector<16x16xf32>
    %c0_1 = arith.constant 0 : index
    %c0_2 = arith.constant 0 : index
    %1 = vector.load %arg1[%c0_1, %c0_2] : memref<16x256xf32, #tpu.memory_space<vmem>>, vector<16x256xf32>
    %cst = arith.constant dense<0.000000e+00> : vector<16x256xf32>
    %2 = tpu.matmul %0, %1, %cst {dimension_numbers = #tpu.dot_dimension_numbers<[1], [0], [0], [1], [0, 0, 1, 1], [], []>, precision = #tpu.contract_precision<fp32>} : vector<16x16xf32>, vector<16x256xf32>, vector<16x256xf32> -> vector<16x256xf32>
    %c0_3 = arith.constant 0 : index
    %c0_4 = arith.constant 0 : index
    %3 = vector.load %arg2[%c0_3, %c0_4] : memref<1x256xf32, #tpu.memory_space<vmem>>, vector<1x256xf32>
    %4 = vector.broadcast %3 : vector<1x256xf32> to vector<16x256xf32>
    %5 = arith.addf %2, %4 : vector<16x256xf32>
    %c0_5 = arith.constant 0 : index
    %c0_6 = arith.constant 0 : index
    %6 = vector.load %arg9[%c0_5, %c0_6] : memref<16x256xf32, #tpu.memory_space<vmem>>, vector<16x256xf32>
    tpu.vector_store %arg9[%c0_5, %c0_6], %5 {strides = array<i32>} : memref<16x256xf32, #tpu.memory_space<vmem>>, vector<16x256xf32>,
    %cst_7 = arith.constant 0.000000e+00 : f32
    %7 = vector.broadcast %cst_7 : f32 to vector<2x32xf32>
    %cst_8 = arith.constant 0.000000e+00 : f32
    %8 = vector.broadcast %cst_8 : f32 to vector<2x32xf32>
    %cst_9 = arith.constant 0.000000e+00 : f32
    %9 = vector.broadcast %cst_9 : f32 to vector<2x32xf32>
    %cst_10 = arith.constant 0.000000e+00 : f32
    %10 = vector.broadcast %cst_10 : f32 to vector<2x32xf32>
    %c0_11 = arith.constant 0 : index
    %c0_12 = arith.constant 0 : index
    %11 = vector.load %arg9[%c0_11, %c0_12] : memref<16x256xf32, #tpu.memory_space<vmem>>, vector<2x128xf32>
    %c14 = arith.constant 14 : index
    %c128 = arith.constant 128 : index
    %12 = vector.load %arg9[%c14, %c128] : memref<16x256xf32, #tpu.memory_space<vmem>>, vector<2x128xf32>
    %c0_13 = arith.constant 0 : index
    %c0_14 = arith.constant 0 : index
    %13 = vector.load %arg3[%c0_13, %c0_14] : memref<32x128xf32, #tpu.memory_space<vmem>>, vector<32x128xf32>
    %cst_15 = arith.constant dense<0.000000e+00> : vector<2x128xf32>
    %14 = tpu.matmul %7, %13, %cst_15 {dimension_numbers = #tpu.dot_dimension_numbers<[1], [0], [0], [1], [0, 0, 1, 1], [], []>, precision = #tpu.contract_precision<fp32>} : vector<2x32xf32>, vector<32x128xf32>, vector<2x128xf32> -> vector<2x128xf32>
    %15 = arith.addf %11, %14 : vector<2x128xf32>
    %c0_16 = arith.constant 0 : index
    %c0_17 = arith.constant 0 : index
    %16 = vector.load %arg4[%c0_16, %c0_17] : memref<32x128xf32, #tpu.memory_space<vmem>>, vector<32x128xf32>
    %cst_18 = arith.constant dense<0.000000e+00> : vector<2x128xf32>
    %17 = tpu.matmul %9, %16, %cst_18 {dimension_numbers = #tpu.dot_dimension_numbers<[1], [0], [0], [1], [0, 0, 1, 1], [], []>, precision = #tpu.contract_precision<fp32>} : vector<2x32xf32>, vector<32x128xf32>, vector<2x128xf32> -> vector<2x128xf32>
    %18 = arith.addf %12, %17 : vector<2x128xf32>
    %19 = vector.extract_strided_slice %15 {offsets = [0, 0], sizes = [2, 32], strides = [1, 1]} : vector<2x128xf32> to vector<2x32xf32>
    %20 = arith.negf %19 : vector<2x32xf32>
    %21 = math.exp %20 : vector<2x32xf32>
    %cst_19 = arith.constant 1.000000e+00 : f32
    %22 = vector.broadcast %cst_19 : f32 to vector<2x32xf32>
    %23 = arith.addf %22, %21 : vector<2x32xf32>
    %24 = arith.divf %22, %23 : vector<2x32xf32>
    %25 = vector.extract_strided_slice %15 {offsets = [0, 32], sizes = [2, 32], strides = [1, 1]} : vector<2x128xf32> to vector<2x32xf32>
    %26 = arith.negf %25 : vector<2x32xf32>
    %27 = math.exp %26 : vector<2x32xf32>
    %cst_20 = arith.constant 1.000000e+00 : f32
    %28 = vector.broadcast %cst_20 : f32 to vector<2x32xf32>
    %29 = arith.addf %28, %27 : vector<2x32xf32>
    %30 = arith.divf %28, %29 : vector<2x32xf32>
    %31 = vector.extract_strided_slice %15 {offsets = [0, 64], sizes = [2, 32], strides = [1, 1]} : vector<2x128xf32> to vector<2x32xf32>
    %32 = math.tanh %31 : vector<2x32xf32>
    %33 = vector.extract_strided_slice %15 {offsets = [0, 96], sizes = [2, 32], strides = [1, 1]} : vector<2x128xf32> to vector<2x32xf32>
    %34 = arith.negf %33 : vector<2x32xf32>
    %35 = math.exp %34 : vector<2x32xf32>
    %cst_21 = arith.constant 1.000000e+00 : f32
    %36 = vector.broadcast %cst_21 : f32 to vector<2x32xf32>
    %37 = arith.addf %36, %35 : vector<2x32xf32>
    %38 = arith.divf %36, %37 : vector<2x32xf32>
    %39 = arith.mulf %30, %8 : vector<2x32xf32>
    %40 = arith.mulf %24, %32 : vector<2x32xf32>
    %41 = arith.addf %39, %40 : vector<2x32xf32>
    %42 = math.tanh %41 : vector<2x32xf32>
    %43 = arith.mulf %38, %42 : vector<2x32xf32>
    %44 = vector.extract_strided_slice %18 {offsets = [0, 0], sizes = [2, 32], strides = [1, 1]} : vector<2x128xf32> to vector<2x32xf32>
    %45 = arith.negf %44 : vector<2x32xf32>
    %46 = math.exp %45 : vector<2x32xf32>
    %cst_22 = arith.constant 1.000000e+00 : f32
    %47 = vector.broadcast %cst_22 : f32 to vector<2x32xf32>
    %48 = arith.addf %47, %46 : vector<2x32xf32>
    %49 = arith.divf %47, %48 : vector<2x32xf32>
    %50 = vector.extract_strided_slice %18 {offsets = [0, 32], sizes = [2, 32], strides = [1, 1]} : vector<2x128xf32> to vector<2x32xf32>
    %51 = arith.negf %50 : vector<2x32xf32>
    %52 = math.exp %51 : vector<2x32xf32>
    %cst_23 = arith.constant 1.000000e+00 : f32
    %53 = vector.broadcast %cst_23 : f32 to vector<2x32xf32>
    %54 = arith.addf %53, %52 : vector<2x32xf32>
    %55 = arith.divf %53, %54 : vector<2x32xf32>
    %56 = vector.extract_strided_slice %18 {offsets = [0, 64], sizes = [2, 32], strides = [1, 1]} : vector<2x128xf32> to vector<2x32xf32>
    %57 = math.tanh %56 : vector<2x32xf32>
    %58 = vector.extract_strided_slice %18 {offsets = [0, 96], sizes = [2, 32], strides = [1, 1]} : vector<2x128xf32> to vector<2x32xf32>
    %59 = arith.negf %58 : vector<2x32xf32>
    %60 = math.exp %59 : vector<2x32xf32>
    %cst_24 = arith.constant 1.000000e+00 : f32
    %61 = vector.broadcast %cst_24 : f32 to vector<2x32xf32>
    %62 = arith.addf %61, %60 : vector<2x32xf32>
    %63 = arith.divf %61, %62 : vector<2x32xf32>
    %64 = arith.mulf %55, %10 : vector<2x32xf32>
    %65 = arith.mulf %49, %57 : vector<2x32xf32>
    %66 = arith.addf %64, %65 : vector<2x32xf32>
    %67 = math.tanh %66 : vector<2x32xf32>
    %68 = arith.mulf %63, %67 : vector<2x32xf32>
    %c0_25 = arith.constant 0 : index
    %c0_26 = arith.constant 0 : index
    %69 = vector.load %arg10[%c0_25, %c0_26] : memref<16x32xf32, #tpu.memory_space<vmem>>, vector<2x32xf32>
    tpu.vector_store %arg10[%c0_25, %c0_26], %43 {strides = array<i32>} : memref<16x32xf32, #tpu.memory_space<vmem>>, vector<2x32xf32>,
    %c14_27 = arith.constant 14 : index
    %c0_28 = arith.constant 0 : index
    %70 = vector.load %arg11[%c14_27, %c0_28] : memref<16x32xf32, #tpu.memory_space<vmem>>, vector<2x32xf32>
    tpu.vector_store %arg11[%c14_27, %c0_28], %68 {strides = array<i32>} : memref<16x32xf32, #tpu.memory_space<vmem>>, vector<2x32xf32>,
    %c2 = arith.constant 2 : index
    %c0_29 = arith.constant 0 : index
    %71 = vector.load %arg9[%c2, %c0_29] : memref<16x256xf32, #tpu.memory_space<vmem>>, vector<2x128xf32>
    %c12 = arith.constant 12 : index
    %c128_30 = arith.constant 128 : index
    %72 = vector.load %arg9[%c12, %c128_30] : memref<16x256xf32, #tpu.memory_space<vmem>>, vector<2x128xf32>
    %c0_31 = arith.constant 0 : index
    %c0_32 = arith.constant 0 : index
    %73 = vector.load %arg3[%c0_31, %c0_32] : memref<32x128xf32, #tpu.memory_space<vmem>>, vector<32x128xf32>
    %cst_33 = arith.constant dense<0.000000e+00> : vector<2x128xf32>
    %74 = tpu.matmul %43, %73, %cst_33 {dimension_numbers = #tpu.dot_dimension_numbers<[1], [0], [0], [1], [0, 0, 1, 1], [], []>, precision = #tpu.contract_precision<fp32>} : vector<2x32xf32>, vector<32x128xf32>, vector<2x128xf32> -> vector<2x128xf32>
    %75 = arith.addf %71, %74 : vector<2x128xf32>
    %c0_34 = arith.constant 0 : index
    %c0_35 = arith.constant 0 : index
    %76 = vector.load %arg4[%c0_34, %c0_35] : memref<32x128xf32, #tpu.memory_space<vmem>>, vector<32x128xf32>
    %cst_36 = arith.constant dense<0.000000e+00> : vector<2x128xf32>
    %77 = tpu.matmul %68, %76, %cst_36 {dimension_numbers = #tpu.dot_dimension_numbers<[1], [0], [0], [1], [0, 0, 1, 1], [], []>, precision = #tpu.contract_precision<fp32>} : vector<2x32xf32>, vector<32x128xf32>, vector<2x128xf32> -> vector<2x128xf32>
    %78 = arith.addf %72, %77 : vector<2x128xf32>
    %79 = vector.extract_strided_slice %75 {offsets = [0, 0], sizes = [2, 32], strides = [1, 1]} : vector<2x128xf32> to vector<2x32xf32>
    %80 = arith.negf %79 : vector<2x32xf32>
    %81 = math.exp %80 : vector<2x32xf32>
    %cst_37 = arith.constant 1.000000e+00 : f32
    %82 = vector.broadcast %cst_37 : f32 to vector<2x32xf32>
    %83 = arith.addf %82, %81 : vector<2x32xf32>
    %84 = arith.divf %82, %83 : vector<2x32xf32>
    %85 = vector.extract_strided_slice %75 {offsets = [0, 32], sizes = [2, 32], strides = [1, 1]} : vector<2x128xf32> to vector<2x32xf32>
    %86 = arith.negf %85 : vector<2x32xf32>
    %87 = math.exp %86 : vector<2x32xf32>
    %cst_38 = arith.constant 1.000000e+00 : f32
    %88 = vector.broadcast %cst_38 : f32 to vector<2x32xf32>
    %89 = arith.addf %88, %87 : vector<2x32xf32>
    %90 = arith.divf %88, %89 : vector<2x32xf32>
    %91 = vector.extract_strided_slice %75 {offsets = [0, 64], sizes = [2, 32], strides = [1, 1]} : vector<2x128xf32> to vector<2x32xf32>
    %92 = math.tanh %91 : vector<2x32xf32>
    %93 = vector.extract_strided_slice %75 {offsets = [0, 96], sizes = [2, 32], strides = [1, 1]} : vector<2x128xf32> to vector<2x32xf32>
    %94 = arith.negf %93 : vector<2x32xf32>
    %95 = math.exp %94 : vector<2x32xf32>
    %cst_39 = arith.constant 1.000000e+00 : f32
    %96 = vector.broadcast %cst_39 : f32 to vector<2x32xf32>
    %97 = arith.addf %96, %95 : vector<2x32xf32>
    %98 = arith.divf %96, %97 : vector<2x32xf32>
    %99 = arith.mulf %90, %41 : vector<2x32xf32>
    %100 = arith.mulf %84, %92 : vector<2x32xf32>
    %101 = arith.addf %99, %100 : vector<2x32xf32>
    %102 = math.tanh %101 : vector<2x32xf32>
    %103 = arith.mulf %98, %102 : vector<2x32xf32>
    %104 = vector.extract_strided_slice %78 {offsets = [0, 0], sizes = [2, 32], strides = [1, 1]} : vector<2x128xf32> to vector<2x32xf32>
    %105 = arith.negf %104 : vector<2x32xf32>
    %106 = math.exp %105 : vector<2x32xf32>
    %cst_40 = arith.constant 1.000000e+00 : f32
    %107 = vector.broadcast %cst_40 : f32 to vector<2x32xf32>
    %108 = arith.addf %107, %106 : vector<2x32xf32>
    %109 = arith.divf %107, %108 : vector<2x32xf32>
    %110 = vector.extract_strided_slice %78 {offsets = [0, 32], sizes = [2, 32], strides = [1, 1]} : vector<2x128xf32> to vector<2x32xf32>
    %111 = arith.negf %110 : vector<2x32xf32>
    %112 = math.exp %111 : vector<2x32xf32>
    %cst_41 = arith.constant 1.000000e+00 : f32
    %113 = vector.broadcast %cst_41 : f32 to vector<2x32xf32>
    %114 = arith.addf %113, %112 : vector<2x32xf32>
    %115 = arith.divf %113, %114 : vector<2x32xf32>
    %116 = vector.extract_strided_slice %78 {offsets = [0, 64], sizes = [2, 32], strides = [1, 1]} : vector<2x128xf32> to vector<2x32xf32>
    %117 = math.tanh %116 : vector<2x32xf32>
    %118 = vector.extract_strided_slice %78 {offsets = [0, 96], sizes = [2, 32], strides = [1, 1]} : vector<2x128xf32> to vector<2x32xf32>
    %119 = arith.negf %118 : vector<2x32xf32>
    %120 = math.exp %119 : vector<2x32xf32>
    %cst_42 = arith.constant 1.000000e+00 : f32
    %121 = vector.broadcast %cst_42 : f32 to vector<2x32xf32>
    %122 = arith.addf %121, %120 : vector<2x32xf32>
    %123 = arith.divf %121, %122 : vector<2x32xf32>
    %124 = arith.mulf %115, %66 : vector<2x32xf32>
    %125 = arith.mulf %109, %117 : vector<2x32xf32>
    %126 = arith.addf %124, %125 : vector<2x32xf32>
    %127 = math.tanh %126 : vector<2x32xf32>
    %128 = arith.mulf %123, %127 : vector<2x32xf32>
    %c2_43 = arith.constant 2 : index
    %c0_44 = arith.constant 0 : index
    %129 = vector.load %arg10[%c2_43, %c0_44] : memref<16x32xf32, #tpu.memory_space<vmem>>, vector<2x32xf32>
    tpu.vector_store %arg10[%c2_43, %c0_44], %103 {strides = array<i32>} : memref<16x32xf32, #tpu.memory_space<vmem>>, vector<2x32xf32>,
    %c12_45 = arith.constant 12 : index
    %c0_46 = arith.constant 0 : index
    %130 = vector.load %arg11[%c12_45, %c0_46] : memref<16x32xf32, #tpu.memory_space<vmem>>, vector<2x32xf32>
    tpu.vector_store %arg11[%c12_45, %c0_46], %128 {strides = array<i32>} : memref<16x32xf32, #tpu.memory_space<vmem>>, vector<2x32xf32>,
    %c4 = arith.constant 4 : index
    %c0_47 = arith.constant 0 : index
    %131 = vector.load %arg9[%c4, %c0_47] : memref<16x256xf32, #tpu.memory_space<vmem>>, vector<2x128xf32>
    %c10 = arith.constant 10 : index
    %c128_48 = arith.constant 128 : index
    %132 = vector.load %arg9[%c10, %c128_48] : memref<16x256xf32, #tpu.memory_space<vmem>>, vector<2x128xf32>
    %c0_49 = arith.constant 0 : index
    %c0_50 = arith.constant 0 : index
    %133 = vector.load %arg3[%c0_49, %c0_50] : memref<32x128xf32, #tpu.memory_space<vmem>>, vector<32x128xf32>
    %cst_51 = arith.constant dense<0.000000e+00> : vector<2x128xf32>
    %134 = tpu.matmul %103, %133, %cst_51 {dimension_numbers = #tpu.dot_dimension_numbers<[1], [0], [0], [1], [0, 0, 1, 1], [], []>, precision = #tpu.contract_precision<fp32>} : vector<2x32xf32>, vector<32x128xf32>, vector<2x128xf32> -> vector<2x128xf32>
    %135 = arith.addf %131, %134 : vector<2x128xf32>
    %c0_52 = arith.constant 0 : index
    %c0_53 = arith.constant 0 : index
    %136 = vector.load %arg4[%c0_52, %c0_53] : memref<32x128xf32, #tpu.memory_space<vmem>>, vector<32x128xf32>
    %cst_54 = arith.constant dense<0.000000e+00> : vector<2x128xf32>
    %137 = tpu.matmul %128, %136, %cst_54 {dimension_numbers = #tpu.dot_dimension_numbers<[1], [0], [0], [1], [0, 0, 1, 1], [], []>, precision = #tpu.contract_precision<fp32>} : vector<2x32xf32>, vector<32x128xf32>, vector<2x128xf32> -> vector<2x128xf32>
    %138 = arith.addf %132, %137 : vector<2x128xf32>
    %139 = vector.extract_strided_slice %135 {offsets = [0, 0], sizes = [2, 32], strides = [1, 1]} : vector<2x128xf32> to vector<2x32xf32>
    %140 = arith.negf %139 : vector<2x32xf32>
    %141 = math.exp %140 : vector<2x32xf32>
    %cst_55 = arith.constant 1.000000e+00 : f32
    %142 = vector.broadcast %cst_55 : f32 to vector<2x32xf32>
    %143 = arith.addf %142, %141 : vector<2x32xf32>
    %144 = arith.divf %142, %143 : vector<2x32xf32>
    %145 = vector.extract_strided_slice %135 {offsets = [0, 32], sizes = [2, 32], strides = [1, 1]} : vector<2x128xf32> to vector<2x32xf32>
    %146 = arith.negf %145 : vector<2x32xf32>
    %147 = math.exp %146 : vector<2x32xf32>
    %cst_56 = arith.constant 1.000000e+00 : f32
    %148 = vector.broadcast %cst_56 : f32 to vector<2x32xf32>
    %149 = arith.addf %148, %147 : vector<2x32xf32>
    %150 = arith.divf %148, %149 : vector<2x32xf32>
    %151 = vector.extract_strided_slice %135 {offsets = [0, 64], sizes = [2, 32], strides = [1, 1]} : vector<2x128xf32> to vector<2x32xf32>
    %152 = math.tanh %151 : vector<2x32xf32>
    %153 = vector.extract_strided_slice %135 {offsets = [0, 96], sizes = [2, 32], strides = [1, 1]} : vector<2x128xf32> to vector<2x32xf32>
    %154 = arith.negf %153 : vector<2x32xf32>
    %155 = math.exp %154 : vector<2x32xf32>
    %cst_57 = arith.constant 1.000000e+00 : f32
    %156 = vector.broadcast %cst_57 : f32 to vector<2x32xf32>
    %157 = arith.addf %156, %155 : vector<2x32xf32>
    %158 = arith.divf %156, %157 : vector<2x32xf32>
    %159 = arith.mulf %150, %101 : vector<2x32xf32>
    %160 = arith.mulf %144, %152 : vector<2x32xf32>
    %161 = arith.addf %159, %160 : vector<2x32xf32>
    %162 = math.tanh %161 : vector<2x32xf32>
    %163 = arith.mulf %158, %162 : vector<2x32xf32>
    %164 = vector.extract_strided_slice %138 {offsets = [0, 0], sizes = [2, 32], strides = [1, 1]} : vector<2x128xf32> to vector<2x32xf32>
    %165 = arith.negf %164 : vector<2x32xf32>
    %166 = math.exp %165 : vector<2x32xf32>
    %cst_58 = arith.constant 1.000000e+00 : f32
    %167 = vector.broadcast %cst_58 : f32 to vector<2x32xf32>
    %168 = arith.addf %167, %166 : vector<2x32xf32>
    %169 = arith.divf %167, %168 : vector<2x32xf32>
    %170 = vector.extract_strided_slice %138 {offsets = [0, 32], sizes = [2, 32], strides = [1, 1]} : vector<2x128xf32> to vector<2x32xf32>
    %171 = arith.negf %170 : vector<2x32xf32>
    %172 = math.exp %171 : vector<2x32xf32>
    %cst_59 = arith.constant 1.000000e+00 : f32
    %173 = vector.broadcast %cst_59 : f32 to vector<2x32xf32>
    %174 = arith.addf %173, %172 : vector<2x32xf32>
    %175 = arith.divf %173, %174 : vector<2x32xf32>
    %176 = vector.extract_strided_slice %138 {offsets = [0, 64], sizes = [2, 32], strides = [1, 1]} : vector<2x128xf32> to vector<2x32xf32>
    %177 = math.tanh %176 : vector<2x32xf32>
    %178 = vector.extract_strided_slice %138 {offsets = [0, 96], sizes = [2, 32], strides = [1, 1]} : vector<2x128xf32> to vector<2x32xf32>
    %179 = arith.negf %178 : vector<2x32xf32>
    %180 = math.exp %179 : vector<2x32xf32>
    %cst_60 = arith.constant 1.000000e+00 : f32
    %181 = vector.broadcast %cst_60 : f32 to vector<2x32xf32>
    %182 = arith.addf %181, %180 : vector<2x32xf32>
    %183 = arith.divf %181, %182 : vector<2x32xf32>
    %184 = arith.mulf %175, %126 : vector<2x32xf32>
    %185 = arith.mulf %169, %177 : vector<2x32xf32>
    %186 = arith.addf %184, %185 : vector<2x32xf32>
    %187 = math.tanh %186 : vector<2x32xf32>
    %188 = arith.mulf %183, %187 : vector<2x32xf32>
    %c4_61 = arith.constant 4 : index
    %c0_62 = arith.constant 0 : index
    %189 = vector.load %arg10[%c4_61, %c0_62] : memref<16x32xf32, #tpu.memory_space<vmem>>, vector<2x32xf32>
    tpu.vector_store %arg10[%c4_61, %c0_62], %163 {strides = array<i32>} : memref<16x32xf32, #tpu.memory_space<vmem>>, vector<2x32xf32>,
    %c10_63 = arith.constant 10 : index
    %c0_64 = arith.constant 0 : index
    %190 = vector.load %arg11[%c10_63, %c0_64] : memref<16x32xf32, #tpu.memory_space<vmem>>, vector<2x32xf32>
    tpu.vector_store %arg11[%c10_63, %c0_64], %188 {strides = array<i32>} : memref<16x32xf32, #tpu.memory_space<vmem>>, vector<2x32xf32>,
    %c6 = arith.constant 6 : index
    %c0_65 = arith.constant 0 : index
    %191 = vector.load %arg9[%c6, %c0_65] : memref<16x256xf32, #tpu.memory_space<vmem>>, vector<2x128xf32>
    %c8 = arith.constant 8 : index
    %c128_66 = arith.constant 128 : index
    %192 = vector.load %arg9[%c8, %c128_66] : memref<16x256xf32, #tpu.memory_space<vmem>>, vector<2x128xf32>
    %c0_67 = arith.constant 0 : index
    %c0_68 = arith.constant 0 : index
    %193 = vector.load %arg3[%c0_67, %c0_68] : memref<32x128xf32, #tpu.memory_space<vmem>>, vector<32x128xf32>
    %cst_69 = arith.constant dense<0.000000e+00> : vector<2x128xf32>
    %194 = tpu.matmul %163, %193, %cst_69 {dimension_numbers = #tpu.dot_dimension_numbers<[1], [0], [0], [1], [0, 0, 1, 1], [], []>, precision = #tpu.contract_precision<fp32>} : vector<2x32xf32>, vector<32x128xf32>, vector<2x128xf32> -> vector<2x128xf32>
    %195 = arith.addf %191, %194 : vector<2x128xf32>
    %c0_70 = arith.constant 0 : index
    %c0_71 = arith.constant 0 : index
    %196 = vector.load %arg4[%c0_70, %c0_71] : memref<32x128xf32, #tpu.memory_space<vmem>>, vector<32x128xf32>
    %cst_72 = arith.constant dense<0.000000e+00> : vector<2x128xf32>
    %197 = tpu.matmul %188, %196, %cst_72 {dimension_numbers = #tpu.dot_dimension_numbers<[1], [0], [0], [1], [0, 0, 1, 1], [], []>, precision = #tpu.contract_precision<fp32>} : vector<2x32xf32>, vector<32x128xf32>, vector<2x128xf32> -> vector<2x128xf32>
    %198 = arith.addf %192, %197 : vector<2x128xf32>
    %199 = vector.extract_strided_slice %195 {offsets = [0, 0], sizes = [2, 32], strides = [1, 1]} : vector<2x128xf32> to vector<2x32xf32>
    %200 = arith.negf %199 : vector<2x32xf32>
    %201 = math.exp %200 : vector<2x32xf32>
    %cst_73 = arith.constant 1.000000e+00 : f32
    %202 = vector.broadcast %cst_73 : f32 to vector<2x32xf32>
    %203 = arith.addf %202, %201 : vector<2x32xf32>
    %204 = arith.divf %202, %203 : vector<2x32xf32>
    %205 = vector.extract_strided_slice %195 {offsets = [0, 32], sizes = [2, 32], strides = [1, 1]} : vector<2x128xf32> to vector<2x32xf32>
    %206 = arith.negf %205 : vector<2x32xf32>
    %207 = math.exp %206 : vector<2x32xf32>
    %cst_74 = arith.constant 1.000000e+00 : f32
    %208 = vector.broadcast %cst_74 : f32 to vector<2x32xf32>
    %209 = arith.addf %208, %207 : vector<2x32xf32>
    %210 = arith.divf %208, %209 : vector<2x32xf32>
    %211 = vector.extract_strided_slice %195 {offsets = [0, 64], sizes = [2, 32], strides = [1, 1]} : vector<2x128xf32> to vector<2x32xf32>
    %212 = math.tanh %211 : vector<2x32xf32>
    %213 = vector.extract_strided_slice %195 {offsets = [0, 96], sizes = [2, 32], strides = [1, 1]} : vector<2x128xf32> to vector<2x32xf32>
    %214 = arith.negf %213 : vector<2x32xf32>
    %215 = math.exp %214 : vector<2x32xf32>
    %cst_75 = arith.constant 1.000000e+00 : f32
    %216 = vector.broadcast %cst_75 : f32 to vector<2x32xf32>
    %217 = arith.addf %216, %215 : vector<2x32xf32>
    %218 = arith.divf %216, %217 : vector<2x32xf32>
    %219 = arith.mulf %210, %161 : vector<2x32xf32>
    %220 = arith.mulf %204, %212 : vector<2x32xf32>
    %221 = arith.addf %219, %220 : vector<2x32xf32>
    %222 = math.tanh %221 : vector<2x32xf32>
    %223 = arith.mulf %218, %222 : vector<2x32xf32>
    %224 = vector.extract_strided_slice %198 {offsets = [0, 0], sizes = [2, 32], strides = [1, 1]} : vector<2x128xf32> to vector<2x32xf32>
    %225 = arith.negf %224 : vector<2x32xf32>
    %226 = math.exp %225 : vector<2x32xf32>
    %cst_76 = arith.constant 1.000000e+00 : f32
    %227 = vector.broadcast %cst_76 : f32 to vector<2x32xf32>
    %228 = arith.addf %227, %226 : vector<2x32xf32>
    %229 = arith.divf %227, %228 : vector<2x32xf32>
    %230 = vector.extract_strided_slice %198 {offsets = [0, 32], sizes = [2, 32], strides = [1, 1]} : vector<2x128xf32> to vector<2x32xf32>
    %231 = arith.negf %230 : vector<2x32xf32>
    %232 = math.exp %231 : vector<2x32xf32>
    %cst_77 = arith.constant 1.000000e+00 : f32
    %233 = vector.broadcast %cst_77 : f32 to vector<2x32xf32>
    %234 = arith.addf %233, %232 : vector<2x32xf32>
    %235 = arith.divf %233, %234 : vector<2x32xf32>
    %236 = vector.extract_strided_slice %198 {offsets = [0, 64], sizes = [2, 32], strides = [1, 1]} : vector<2x128xf32> to vector<2x32xf32>
    %237 = math.tanh %236 : vector<2x32xf32>
    %238 = vector.extract_strided_slice %198 {offsets = [0, 96], sizes = [2, 32], strides = [1, 1]} : vector<2x128xf32> to vector<2x32xf32>
    %239 = arith.negf %238 : vector<2x32xf32>
    %240 = math.exp %239 : vector<2x32xf32>
    %cst_78 = arith.constant 1.000000e+00 : f32
    %241 = vector.broadcast %cst_78 : f32 to vector<2x32xf32>
    %242 = arith.addf %241, %240 : vector<2x32xf32>
    %243 = arith.divf %241, %242 : vector<2x32xf32>
    %244 = arith.mulf %235, %186 : vector<2x32xf32>
    %245 = arith.mulf %229, %237 : vector<2x32xf32>
    %246 = arith.addf %244, %245 : vector<2x32xf32>
    %247 = math.tanh %246 : vector<2x32xf32>
    %248 = arith.mulf %243, %247 : vector<2x32xf32>
    %c6_79 = arith.constant 6 : index
    %c0_80 = arith.constant 0 : index
    %249 = vector.load %arg10[%c6_79, %c0_80] : memref<16x32xf32, #tpu.memory_space<vmem>>, vector<2x32xf32>
    tpu.vector_store %arg10[%c6_79, %c0_80], %223 {strides = array<i32>} : memref<16x32xf32, #tpu.memory_space<vmem>>, vector<2x32xf32>,
    %c8_81 = arith.constant 8 : index
    %c0_82 = arith.constant 0 : index
    %250 = vector.load %arg11[%c8_81, %c0_82] : memref<16x32xf32, #tpu.memory_space<vmem>>, vector<2x32xf32>
    tpu.vector_store %arg11[%c8_81, %c0_82], %248 {strides = array<i32>} : memref<16x32xf32, #tpu.memory_space<vmem>>, vector<2x32xf32>,
    %c8_83 = arith.constant 8 : index
    %c0_84 = arith.constant 0 : index
    %251 = vector.load %arg9[%c8_83, %c0_84] : memref<16x256xf32, #tpu.memory_space<vmem>>, vector<2x128xf32>
    %c6_85 = arith.constant 6 : index
    %c128_86 = arith.constant 128 : index
    %252 = vector.load %arg9[%c6_85, %c128_86] : memref<16x256xf32, #tpu.memory_space<vmem>>, vector<2x128xf32>
    %c0_87 = arith.constant 0 : index
    %c0_88 = arith.constant 0 : index
    %253 = vector.load %arg3[%c0_87, %c0_88] : memref<32x128xf32, #tpu.memory_space<vmem>>, vector<32x128xf32>
    %cst_89 = arith.constant dense<0.000000e+00> : vector<2x128xf32>
    %254 = tpu.matmul %223, %253, %cst_89 {dimension_numbers = #tpu.dot_dimension_numbers<[1], [0], [0], [1], [0, 0, 1, 1], [], []>, precision = #tpu.contract_precision<fp32>} : vector<2x32xf32>, vector<32x128xf32>, vector<2x128xf32> -> vector<2x128xf32>
    %255 = arith.addf %251, %254 : vector<2x128xf32>
    %c0_90 = arith.constant 0 : index
    %c0_91 = arith.constant 0 : index
    %256 = vector.load %arg4[%c0_90, %c0_91] : memref<32x128xf32, #tpu.memory_space<vmem>>, vector<32x128xf32>
    %cst_92 = arith.constant dense<0.000000e+00> : vector<2x128xf32>
    %257 = tpu.matmul %248, %256, %cst_92 {dimension_numbers = #tpu.dot_dimension_numbers<[1], [0], [0], [1], [0, 0, 1, 1], [], []>, precision = #tpu.contract_precision<fp32>} : vector<2x32xf32>, vector<32x128xf32>, vector<2x128xf32> -> vector<2x128xf32>
    %258 = arith.addf %252, %257 : vector<2x128xf32>
    %259 = vector.extract_strided_slice %255 {offsets = [0, 0], sizes = [2, 32], strides = [1, 1]} : vector<2x128xf32> to vector<2x32xf32>
    %260 = arith.negf %259 : vector<2x32xf32>
    %261 = math.exp %260 : vector<2x32xf32>
    %cst_93 = arith.constant 1.000000e+00 : f32
    %262 = vector.broadcast %cst_93 : f32 to vector<2x32xf32>
    %263 = arith.addf %262, %261 : vector<2x32xf32>
    %264 = arith.divf %262, %263 : vector<2x32xf32>
    %265 = vector.extract_strided_slice %255 {offsets = [0, 32], sizes = [2, 32], strides = [1, 1]} : vector<2x128xf32> to vector<2x32xf32>
    %266 = arith.negf %265 : vector<2x32xf32>
    %267 = math.exp %266 : vector<2x32xf32>
    %cst_94 = arith.constant 1.000000e+00 : f32
    %268 = vector.broadcast %cst_94 : f32 to vector<2x32xf32>
    %269 = arith.addf %268, %267 : vector<2x32xf32>
    %270 = arith.divf %268, %269 : vector<2x32xf32>
    %271 = vector.extract_strided_slice %255 {offsets = [0, 64], sizes = [2, 32], strides = [1, 1]} : vector<2x128xf32> to vector<2x32xf32>
    %272 = math.tanh %271 : vector<2x32xf32>
    %273 = vector.extract_strided_slice %255 {offsets = [0, 96], sizes = [2, 32], strides = [1, 1]} : vector<2x128xf32> to vector<2x32xf32>
    %274 = arith.negf %273 : vector<2x32xf32>
    %275 = math.exp %274 : vector<2x32xf32>
    %cst_95 = arith.constant 1.000000e+00 : f32
    %276 = vector.broadcast %cst_95 : f32 to vector<2x32xf32>
    %277 = arith.addf %276, %275 : vector<2x32xf32>
    %278 = arith.divf %276, %277 : vector<2x32xf32>
    %279 = arith.mulf %270, %221 : vector<2x32xf32>
    %280 = arith.mulf %264, %272 : vector<2x32xf32>
    %281 = arith.addf %279, %280 : vector<2x32xf32>
    %282 = math.tanh %281 : vector<2x32xf32>
    %283 = arith.mulf %278, %282 : vector<2x32xf32>
    %284 = vector.extract_strided_slice %258 {offsets = [0, 0], sizes = [2, 32], strides = [1, 1]} : vector<2x128xf32> to vector<2x32xf32>
    %285 = arith.negf %284 : vector<2x32xf32>
    %286 = math.exp %285 : vector<2x32xf32>
    %cst_96 = arith.constant 1.000000e+00 : f32
    %287 = vector.broadcast %cst_96 : f32 to vector<2x32xf32>
    %288 = arith.addf %287, %286 : vector<2x32xf32>
    %289 = arith.divf %287, %288 : vector<2x32xf32>
    %290 = vector.extract_strided_slice %258 {offsets = [0, 32], sizes = [2, 32], strides = [1, 1]} : vector<2x128xf32> to vector<2x32xf32>
    %291 = arith.negf %290 : vector<2x32xf32>
    %292 = math.exp %291 : vector<2x32xf32>
    %cst_97 = arith.constant 1.000000e+00 : f32
    %293 = vector.broadcast %cst_97 : f32 to vector<2x32xf32>
    %294 = arith.addf %293, %292 : vector<2x32xf32>
    %295 = arith.divf %293, %294 : vector<2x32xf32>
    %296 = vector.extract_strided_slice %258 {offsets = [0, 64], sizes = [2, 32], strides = [1, 1]} : vector<2x128xf32> to vector<2x32xf32>
    %297 = math.tanh %296 : vector<2x32xf32>
    %298 = vector.extract_strided_slice %258 {offsets = [0, 96], sizes = [2, 32], strides = [1, 1]} : vector<2x128xf32> to vector<2x32xf32>
    %299 = arith.negf %298 : vector<2x32xf32>
    %300 = math.exp %299 : vector<2x32xf32>
    %cst_98 = arith.constant 1.000000e+00 : f32
    %301 = vector.broadcast %cst_98 : f32 to vector<2x32xf32>
    %302 = arith.addf %301, %300 : vector<2x32xf32>
    %303 = arith.divf %301, %302 : vector<2x32xf32>
    %304 = arith.mulf %295, %246 : vector<2x32xf32>
    %305 = arith.mulf %289, %297 : vector<2x32xf32>
    %306 = arith.addf %304, %305 : vector<2x32xf32>
    %307 = math.tanh %306 : vector<2x32xf32>
    %308 = arith.mulf %303, %307 : vector<2x32xf32>
    %c8_99 = arith.constant 8 : index
    %c0_100 = arith.constant 0 : index
    %309 = vector.load %arg10[%c8_99, %c0_100] : memref<16x32xf32, #tpu.memory_space<vmem>>, vector<2x32xf32>
    tpu.vector_store %arg10[%c8_99, %c0_100], %283 {strides = array<i32>} : memref<16x32xf32, #tpu.memory_space<vmem>>, vector<2x32xf32>,
    %c6_101 = arith.constant 6 : index
    %c0_102 = arith.constant 0 : index
    %310 = vector.load %arg11[%c6_101, %c0_102] : memref<16x32xf32, #tpu.memory_space<vmem>>, vector<2x32xf32>
    tpu.vector_store %arg11[%c6_101, %c0_102], %308 {strides = array<i32>} : memref<16x32xf32, #tpu.memory_space<vmem>>, vector<2x32xf32>,
    %c10_103 = arith.constant 10 : index
    %c0_104 = arith.constant 0 : index
    %311 = vector.load %arg9[%c10_103, %c0_104] : memref<16x256xf32, #tpu.memory_space<vmem>>, vector<2x128xf32>
    %c4_105 = arith.constant 4 : index
    %c128_106 = arith.constant 128 : index
    %312 = vector.load %arg9[%c4_105, %c128_106] : memref<16x256xf32, #tpu.memory_space<vmem>>, vector<2x128xf32>
    %c0_107 = arith.constant 0 : index
    %c0_108 = arith.constant 0 : index
    %313 = vector.load %arg3[%c0_107, %c0_108] : memref<32x128xf32, #tpu.memory_space<vmem>>, vector<32x128xf32>
    %cst_109 = arith.constant dense<0.000000e+00> : vector<2x128xf32>
    %314 = tpu.matmul %283, %313, %cst_109 {dimension_numbers = #tpu.dot_dimension_numbers<[1], [0], [0], [1], [0, 0, 1, 1], [], []>, precision = #tpu.contract_precision<fp32>} : vector<2x32xf32>, vector<32x128xf32>, vector<2x128xf32> -> vector<2x128xf32>
    %315 = arith.addf %311, %314 : vector<2x128xf32>
    %c0_110 = arith.constant 0 : index
    %c0_111 = arith.constant 0 : index
    %316 = vector.load %arg4[%c0_110, %c0_111] : memref<32x128xf32, #tpu.memory_space<vmem>>, vector<32x128xf32>
    %cst_112 = arith.constant dense<0.000000e+00> : vector<2x128xf32>
    %317 = tpu.matmul %308, %316, %cst_112 {dimension_numbers = #tpu.dot_dimension_numbers<[1], [0], [0], [1], [0, 0, 1, 1], [], []>, precision = #tpu.contract_precision<fp32>} : vector<2x32xf32>, vector<32x128xf32>, vector<2x128xf32> -> vector<2x128xf32>
    %318 = arith.addf %312, %317 : vector<2x128xf32>
    %319 = vector.extract_strided_slice %315 {offsets = [0, 0], sizes = [2, 32], strides = [1, 1]} : vector<2x128xf32> to vector<2x32xf32>
    %320 = arith.negf %319 : vector<2x32xf32>
    %321 = math.exp %320 : vector<2x32xf32>
    %cst_113 = arith.constant 1.000000e+00 : f32
    %322 = vector.broadcast %cst_113 : f32 to vector<2x32xf32>
    %323 = arith.addf %322, %321 : vector<2x32xf32>
    %324 = arith.divf %322, %323 : vector<2x32xf32>
    %325 = vector.extract_strided_slice %315 {offsets = [0, 32], sizes = [2, 32], strides = [1, 1]} : vector<2x128xf32> to vector<2x32xf32>
    %326 = arith.negf %325 : vector<2x32xf32>
    %327 = math.exp %326 : vector<2x32xf32>
    %cst_114 = arith.constant 1.000000e+00 : f32
    %328 = vector.broadcast %cst_114 : f32 to vector<2x32xf32>
    %329 = arith.addf %328, %327 : vector<2x32xf32>
    %330 = arith.divf %328, %329 : vector<2x32xf32>
    %331 = vector.extract_strided_slice %315 {offsets = [0, 64], sizes = [2, 32], strides = [1, 1]} : vector<2x128xf32> to vector<2x32xf32>
    %332 = math.tanh %331 : vector<2x32xf32>
    %333 = vector.extract_strided_slice %315 {offsets = [0, 96], sizes = [2, 32], strides = [1, 1]} : vector<2x128xf32> to vector<2x32xf32>
    %334 = arith.negf %333 : vector<2x32xf32>
    %335 = math.exp %334 : vector<2x32xf32>
    %cst_115 = arith.constant 1.000000e+00 : f32
    %336 = vector.broadcast %cst_115 : f32 to vector<2x32xf32>
    %337 = arith.addf %336, %335 : vector<2x32xf32>
    %338 = arith.divf %336, %337 : vector<2x32xf32>
    %339 = arith.mulf %330, %281 : vector<2x32xf32>
    %340 = arith.mulf %324, %332 : vector<2x32xf32>
    %341 = arith.addf %339, %340 : vector<2x32xf32>
    %342 = math.tanh %341 : vector<2x32xf32>
    %343 = arith.mulf %338, %342 : vector<2x32xf32>
    %344 = vector.extract_strided_slice %318 {offsets = [0, 0], sizes = [2, 32], strides = [1, 1]} : vector<2x128xf32> to vector<2x32xf32>
    %345 = arith.negf %344 : vector<2x32xf32>
    %346 = math.exp %345 : vector<2x32xf32>
    %cst_116 = arith.constant 1.000000e+00 : f32
    %347 = vector.broadcast %cst_116 : f32 to vector<2x32xf32>
    %348 = arith.addf %347, %346 : vector<2x32xf32>
    %349 = arith.divf %347, %348 : vector<2x32xf32>
    %350 = vector.extract_strided_slice %318 {offsets = [0, 32], sizes = [2, 32], strides = [1, 1]} : vector<2x128xf32> to vector<2x32xf32>
    %351 = arith.negf %350 : vector<2x32xf32>
    %352 = math.exp %351 : vector<2x32xf32>
    %cst_117 = arith.constant 1.000000e+00 : f32
    %353 = vector.broadcast %cst_117 : f32 to vector<2x32xf32>
    %354 = arith.addf %353, %352 : vector<2x32xf32>
    %355 = arith.divf %353, %354 : vector<2x32xf32>
    %356 = vector.extract_strided_slice %318 {offsets = [0, 64], sizes = [2, 32], strides = [1, 1]} : vector<2x128xf32> to vector<2x32xf32>
    %357 = math.tanh %356 : vector<2x32xf32>
    %358 = vector.extract_strided_slice %318 {offsets = [0, 96], sizes = [2, 32], strides = [1, 1]} : vector<2x128xf32> to vector<2x32xf32>
    %359 = arith.negf %358 : vector<2x32xf32>
    %360 = math.exp %359 : vector<2x32xf32>
    %cst_118 = arith.constant 1.000000e+00 : f32
    %361 = vector.broadcast %cst_118 : f32 to vector<2x32xf32>
    %362 = arith.addf %361, %360 : vector<2x32xf32>
    %363 = arith.divf %361, %362 : vector<2x32xf32>
    %364 = arith.mulf %355, %306 : vector<2x32xf32>
    %365 = arith.mulf %349, %357 : vector<2x32xf32>
    %366 = arith.addf %364, %365 : vector<2x32xf32>
    %367 = math.tanh %366 : vector<2x32xf32>
    %368 = arith.mulf %363, %367 : vector<2x32xf32>
    %c10_119 = arith.constant 10 : index
    %c0_120 = arith.constant 0 : index
    %369 = vector.load %arg10[%c10_119, %c0_120] : memref<16x32xf32, #tpu.memory_space<vmem>>, vector<2x32xf32>
    tpu.vector_store %arg10[%c10_119, %c0_120], %343 {strides = array<i32>} : memref<16x32xf32, #tpu.memory_space<vmem>>, vector<2x32xf32>,
    %c4_121 = arith.constant 4 : index
    %c0_122 = arith.constant 0 : index
    %370 = vector.load %arg11[%c4_121, %c0_122] : memref<16x32xf32, #tpu.memory_space<vmem>>, vector<2x32xf32>
    tpu.vector_store %arg11[%c4_121, %c0_122], %368 {strides = array<i32>} : memref<16x32xf32, #tpu.memory_space<vmem>>, vector<2x32xf32>,
    %c12_123 = arith.constant 12 : index
    %c0_124 = arith.constant 0 : index
    %371 = vector.load %arg9[%c12_123, %c0_124] : memref<16x256xf32, #tpu.memory_space<vmem>>, vector<2x128xf32>
    %c2_125 = arith.constant 2 : index
    %c128_126 = arith.constant 128 : index
    %372 = vector.load %arg9[%c2_125, %c128_126] : memref<16x256xf32, #tpu.memory_space<vmem>>, vector<2x128xf32>
    %c0_127 = arith.constant 0 : index
    %c0_128 = arith.constant 0 : index
    %373 = vector.load %arg3[%c0_127, %c0_128] : memref<32x128xf32, #tpu.memory_space<vmem>>, vector<32x128xf32>
    %cst_129 = arith.constant dense<0.000000e+00> : vector<2x128xf32>
    %374 = tpu.matmul %343, %373, %cst_129 {dimension_numbers = #tpu.dot_dimension_numbers<[1], [0], [0], [1], [0, 0, 1, 1], [], []>, precision = #tpu.contract_precision<fp32>} : vector<2x32xf32>, vector<32x128xf32>, vector<2x128xf32> -> vector<2x128xf32>
    %375 = arith.addf %371, %374 : vector<2x128xf32>
    %c0_130 = arith.constant 0 : index
    %c0_131 = arith.constant 0 : index
    %376 = vector.load %arg4[%c0_130, %c0_131] : memref<32x128xf32, #tpu.memory_space<vmem>>, vector<32x128xf32>
    %cst_132 = arith.constant dense<0.000000e+00> : vector<2x128xf32>
    %377 = tpu.matmul %368, %376, %cst_132 {dimension_numbers = #tpu.dot_dimension_numbers<[1], [0], [0], [1], [0, 0, 1, 1], [], []>, precision = #tpu.contract_precision<fp32>} : vector<2x32xf32>, vector<32x128xf32>, vector<2x128xf32> -> vector<2x128xf32>
    %378 = arith.addf %372, %377 : vector<2x128xf32>
    %379 = vector.extract_strided_slice %375 {offsets = [0, 0], sizes = [2, 32], strides = [1, 1]} : vector<2x128xf32> to vector<2x32xf32>
    %380 = arith.negf %379 : vector<2x32xf32>
    %381 = math.exp %380 : vector<2x32xf32>
    %cst_133 = arith.constant 1.000000e+00 : f32
    %382 = vector.broadcast %cst_133 : f32 to vector<2x32xf32>
    %383 = arith.addf %382, %381 : vector<2x32xf32>
    %384 = arith.divf %382, %383 : vector<2x32xf32>
    %385 = vector.extract_strided_slice %375 {offsets = [0, 32], sizes = [2, 32], strides = [1, 1]} : vector<2x128xf32> to vector<2x32xf32>
    %386 = arith.negf %385 : vector<2x32xf32>
    %387 = math.exp %386 : vector<2x32xf32>
    %cst_134 = arith.constant 1.000000e+00 : f32
    %388 = vector.broadcast %cst_134 : f32 to vector<2x32xf32>
    %389 = arith.addf %388, %387 : vector<2x32xf32>
    %390 = arith.divf %388, %389 : vector<2x32xf32>
    %391 = vector.extract_strided_slice %375 {offsets = [0, 64], sizes = [2, 32], strides = [1, 1]} : vector<2x128xf32> to vector<2x32xf32>
    %392 = math.tanh %391 : vector<2x32xf32>
    %393 = vector.extract_strided_slice %375 {offsets = [0, 96], sizes = [2, 32], strides = [1, 1]} : vector<2x128xf32> to vector<2x32xf32>
    %394 = arith.negf %393 : vector<2x32xf32>
    %395 = math.exp %394 : vector<2x32xf32>
    %cst_135 = arith.constant 1.000000e+00 : f32
    %396 = vector.broadcast %cst_135 : f32 to vector<2x32xf32>
    %397 = arith.addf %396, %395 : vector<2x32xf32>
    %398 = arith.divf %396, %397 : vector<2x32xf32>
    %399 = arith.mulf %390, %341 : vector<2x32xf32>
    %400 = arith.mulf %384, %392 : vector<2x32xf32>
    %401 = arith.addf %399, %400 : vector<2x32xf32>
    %402 = math.tanh %401 : vector<2x32xf32>
    %403 = arith.mulf %398, %402 : vector<2x32xf32>
    %404 = vector.extract_strided_slice %378 {offsets = [0, 0], sizes = [2, 32], strides = [1, 1]} : vector<2x128xf32> to vector<2x32xf32>
    %405 = arith.negf %404 : vector<2x32xf32>
    %406 = math.exp %405 : vector<2x32xf32>
    %cst_136 = arith.constant 1.000000e+00 : f32
    %407 = vector.broadcast %cst_136 : f32 to vector<2x32xf32>
    %408 = arith.addf %407, %406 : vector<2x32xf32>
    %409 = arith.divf %407, %408 : vector<2x32xf32>
    %410 = vector.extract_strided_slice %378 {offsets = [0, 32], sizes = [2, 32], strides = [1, 1]} : vector<2x128xf32> to vector<2x32xf32>
    %411 = arith.negf %410 : vector<2x32xf32>
    %412 = math.exp %411 : vector<2x32xf32>
    %cst_137 = arith.constant 1.000000e+00 : f32
    %413 = vector.broadcast %cst_137 : f32 to vector<2x32xf32>
    %414 = arith.addf %413, %412 : vector<2x32xf32>
    %415 = arith.divf %413, %414 : vector<2x32xf32>
    %416 = vector.extract_strided_slice %378 {offsets = [0, 64], sizes = [2, 32], strides = [1, 1]} : vector<2x128xf32> to vector<2x32xf32>
    %417 = math.tanh %416 : vector<2x32xf32>
    %418 = vector.extract_strided_slice %378 {offsets = [0, 96], sizes = [2, 32], strides = [1, 1]} : vector<2x128xf32> to vector<2x32xf32>
    %419 = arith.negf %418 : vector<2x32xf32>
    %420 = math.exp %419 : vector<2x32xf32>
    %cst_138 = arith.constant 1.000000e+00 : f32
    %421 = vector.broadcast %cst_138 : f32 to vector<2x32xf32>
    %422 = arith.addf %421, %420 : vector<2x32xf32>
    %423 = arith.divf %421, %422 : vector<2x32xf32>
    %424 = arith.mulf %415, %366 : vector<2x32xf32>
    %425 = arith.mulf %409, %417 : vector<2x32xf32>
    %426 = arith.addf %424, %425 : vector<2x32xf32>
    %427 = math.tanh %426 : vector<2x32xf32>
    %428 = arith.mulf %423, %427 : vector<2x32xf32>
    %c12_139 = arith.constant 12 : index
    %c0_140 = arith.constant 0 : index
    %429 = vector.load %arg10[%c12_139, %c0_140] : memref<16x32xf32, #tpu.memory_space<vmem>>, vector<2x32xf32>
    tpu.vector_store %arg10[%c12_139, %c0_140], %403 {strides = array<i32>} : memref<16x32xf32, #tpu.memory_space<vmem>>, vector<2x32xf32>,
    %c2_141 = arith.constant 2 : index
    %c0_142 = arith.constant 0 : index
    %430 = vector.load %arg11[%c2_141, %c0_142] : memref<16x32xf32, #tpu.memory_space<vmem>>, vector<2x32xf32>
    tpu.vector_store %arg11[%c2_141, %c0_142], %428 {strides = array<i32>} : memref<16x32xf32, #tpu.memory_space<vmem>>, vector<2x32xf32>,
    %c14_143 = arith.constant 14 : index
    %c0_144 = arith.constant 0 : index
    %431 = vector.load %arg9[%c14_143, %c0_144] : memref<16x256xf32, #tpu.memory_space<vmem>>, vector<2x128xf32>
    %c0_145 = arith.constant 0 : index
    %c128_146 = arith.constant 128 : index
    %432 = vector.load %arg9[%c0_145, %c128_146] : memref<16x256xf32, #tpu.memory_space<vmem>>, vector<2x128xf32>
    %c0_147 = arith.constant 0 : index
    %c0_148 = arith.constant 0 : index
    %433 = vector.load %arg3[%c0_147, %c0_148] : memref<32x128xf32, #tpu.memory_space<vmem>>, vector<32x128xf32>
    %cst_149 = arith.constant dense<0.000000e+00> : vector<2x128xf32>
    %434 = tpu.matmul %403, %433, %cst_149 {dimension_numbers = #tpu.dot_dimension_numbers<[1], [0], [0], [1], [0, 0, 1, 1], [], []>, precision = #tpu.contract_precision<fp32>} : vector<2x32xf32>, vector<32x128xf32>, vector<2x128xf32> -> vector<2x128xf32>
    %435 = arith.addf %431, %434 : vector<2x128xf32>
    %c0_150 = arith.constant 0 : index
    %c0_151 = arith.constant 0 : index
    %436 = vector.load %arg4[%c0_150, %c0_151] : memref<32x128xf32, #tpu.memory_space<vmem>>, vector<32x128xf32>
    %cst_152 = arith.constant dense<0.000000e+00> : vector<2x128xf32>
    %437 = tpu.matmul %428, %436, %cst_152 {dimension_numbers = #tpu.dot_dimension_numbers<[1], [0], [0], [1], [0, 0, 1, 1], [], []>, precision = #tpu.contract_precision<fp32>} : vector<2x32xf32>, vector<32x128xf32>, vector<2x128xf32> -> vector<2x128xf32>
    %438 = arith.addf %432, %437 : vector<2x128xf32>
    %439 = vector.extract_strided_slice %435 {offsets = [0, 0], sizes = [2, 32], strides = [1, 1]} : vector<2x128xf32> to vector<2x32xf32>
    %440 = arith.negf %439 : vector<2x32xf32>
    %441 = math.exp %440 : vector<2x32xf32>
    %cst_153 = arith.constant 1.000000e+00 : f32
    %442 = vector.broadcast %cst_153 : f32 to vector<2x32xf32>
    %443 = arith.addf %442, %441 : vector<2x32xf32>
    %444 = arith.divf %442, %443 : vector<2x32xf32>
    %445 = vector.extract_strided_slice %435 {offsets = [0, 32], sizes = [2, 32], strides = [1, 1]} : vector<2x128xf32> to vector<2x32xf32>
    %446 = arith.negf %445 : vector<2x32xf32>
    %447 = math.exp %446 : vector<2x32xf32>
    %cst_154 = arith.constant 1.000000e+00 : f32
    %448 = vector.broadcast %cst_154 : f32 to vector<2x32xf32>
    %449 = arith.addf %448, %447 : vector<2x32xf32>
    %450 = arith.divf %448, %449 : vector<2x32xf32>
    %451 = vector.extract_strided_slice %435 {offsets = [0, 64], sizes = [2, 32], strides = [1, 1]} : vector<2x128xf32> to vector<2x32xf32>
    %452 = math.tanh %451 : vector<2x32xf32>
    %453 = vector.extract_strided_slice %435 {offsets = [0, 96], sizes = [2, 32], strides = [1, 1]} : vector<2x128xf32> to vector<2x32xf32>
    %454 = arith.negf %453 : vector<2x32xf32>
    %455 = math.exp %454 : vector<2x32xf32>
    %cst_155 = arith.constant 1.000000e+00 : f32
    %456 = vector.broadcast %cst_155 : f32 to vector<2x32xf32>
    %457 = arith.addf %456, %455 : vector<2x32xf32>
    %458 = arith.divf %456, %457 : vector<2x32xf32>
    %459 = arith.mulf %450, %401 : vector<2x32xf32>
    %460 = arith.mulf %444, %452 : vector<2x32xf32>
    %461 = arith.addf %459, %460 : vector<2x32xf32>
    %462 = math.tanh %461 : vector<2x32xf32>
    %463 = arith.mulf %458, %462 : vector<2x32xf32>
    %464 = vector.extract_strided_slice %438 {offsets = [0, 0], sizes = [2, 32], strides = [1, 1]} : vector<2x128xf32> to vector<2x32xf32>
    %465 = arith.negf %464 : vector<2x32xf32>
    %466 = math.exp %465 : vector<2x32xf32>
    %cst_156 = arith.constant 1.000000e+00 : f32
    %467 = vector.broadcast %cst_156 : f32 to vector<2x32xf32>
    %468 = arith.addf %467, %466 : vector<2x32xf32>
    %469 = arith.divf %467, %468 : vector<2x32xf32>
    %470 = vector.extract_strided_slice %438 {offsets = [0, 32], sizes = [2, 32], strides = [1, 1]} : vector<2x128xf32> to vector<2x32xf32>
    %471 = arith.negf %470 : vector<2x32xf32>
    %472 = math.exp %471 : vector<2x32xf32>
    %cst_157 = arith.constant 1.000000e+00 : f32
    %473 = vector.broadcast %cst_157 : f32 to vector<2x32xf32>
    %474 = arith.addf %473, %472 : vector<2x32xf32>
    %475 = arith.divf %473, %474 : vector<2x32xf32>
    %476 = vector.extract_strided_slice %438 {offsets = [0, 64], sizes = [2, 32], strides = [1, 1]} : vector<2x128xf32> to vector<2x32xf32>
    %477 = math.tanh %476 : vector<2x32xf32>
    %478 = vector.extract_strided_slice %438 {offsets = [0, 96], sizes = [2, 32], strides = [1, 1]} : vector<2x128xf32> to vector<2x32xf32>
    %479 = arith.negf %478 : vector<2x32xf32>
    %480 = math.exp %479 : vector<2x32xf32>
    %cst_158 = arith.constant 1.000000e+00 : f32
    %481 = vector.broadcast %cst_158 : f32 to vector<2x32xf32>
    %482 = arith.addf %481, %480 : vector<2x32xf32>
    %483 = arith.divf %481, %482 : vector<2x32xf32>
    %484 = arith.mulf %475, %426 : vector<2x32xf32>
    %485 = arith.mulf %469, %477 : vector<2x32xf32>
    %486 = arith.addf %484, %485 : vector<2x32xf32>
    %487 = math.tanh %486 : vector<2x32xf32>
    %488 = arith.mulf %483, %487 : vector<2x32xf32>
    %c14_159 = arith.constant 14 : index
    %c0_160 = arith.constant 0 : index
    %489 = vector.load %arg10[%c14_159, %c0_160] : memref<16x32xf32, #tpu.memory_space<vmem>>, vector<2x32xf32>
    tpu.vector_store %arg10[%c14_159, %c0_160], %463 {strides = array<i32>} : memref<16x32xf32, #tpu.memory_space<vmem>>, vector<2x32xf32>,
    %c0_161 = arith.constant 0 : index
    %c0_162 = arith.constant 0 : index
    %490 = vector.load %arg11[%c0_161, %c0_162] : memref<16x32xf32, #tpu.memory_space<vmem>>, vector<2x32xf32>
    tpu.vector_store %arg11[%c0_161, %c0_162], %488 {strides = array<i32>} : memref<16x32xf32, #tpu.memory_space<vmem>>, vector<2x32xf32>,
    %c0_163 = arith.constant 0 : index
    %c0_164 = arith.constant 0 : index
    %491 = vector.load %arg10[%c0_163, %c0_164] : memref<16x32xf32, #tpu.memory_space<vmem>>, vector<16x32xf32>
    %c0_165 = arith.constant 0 : index
    %c0_166 = arith.constant 0 : index
    %492 = vector.load %arg5[%c0_165, %c0_166] : memref<32x32xf32, #tpu.memory_space<vmem>>, vector<32x32xf32>
    %cst_167 = arith.constant dense<0.000000e+00> : vector<16x32xf32>
    %493 = tpu.matmul %491, %492, %cst_167 {dimension_numbers = #tpu.dot_dimension_numbers<[1], [0], [0], [1], [0, 0, 1, 1], [], []>, precision = #tpu.contract_precision<fp32>} : vector<16x32xf32>, vector<32x32xf32>, vector<16x32xf32> -> vector<16x32xf32>
    %c0_168 = arith.constant 0 : index
    %c0_169 = arith.constant 0 : index
    %494 = vector.load %arg11[%c0_168, %c0_169] : memref<16x32xf32, #tpu.memory_space<vmem>>, vector<16x32xf32>
    %c0_170 = arith.constant 0 : index
    %c0_171 = arith.constant 0 : index
    %495 = vector.load %arg6[%c0_170, %c0_171] : memref<32x32xf32, #tpu.memory_space<vmem>>, vector<32x32xf32>
    %cst_172 = arith.constant dense<0.000000e+00> : vector<16x32xf32>
    %496 = tpu.matmul %494, %495, %cst_172 {dimension_numbers = #tpu.dot_dimension_numbers<[1], [0], [0], [1], [0, 0, 1, 1], [], []>, precision = #tpu.contract_precision<fp32>} : vector<16x32xf32>, vector<32x32xf32>, vector<16x32xf32> -> vector<16x32xf32>
    %497 = arith.addf %493, %496 : vector<16x32xf32>
    %c0_173 = arith.constant 0 : index
    %c0_174 = arith.constant 0 : index
    %498 = vector.load %arg7[%c0_173, %c0_174] : memref<1x32xf32, #tpu.memory_space<vmem>>, vector<1x32xf32>
    %499 = vector.broadcast %498 : vector<1x32xf32> to vector<16x32xf32>
    %500 = arith.addf %497, %499 : vector<16x32xf32>
    %c0_175 = arith.constant 0 : index
    %c0_176 = arith.constant 0 : index
    %501 = vector.load %arg8[%c0_175, %c0_176] : memref<16x32xf32, #tpu.memory_space<vmem>>, vector<16x32xf32>
    tpu.vector_store %arg8[%c0_175, %c0_176], %500 {strides = array<i32>} : memref<16x32xf32, #tpu.memory_space<vmem>>, vector<16x32xf32>,
    return
  }
}

</mosaic_0001>

<bundles_post_ra>
// kernel: tpu_custom_call.1
= control target key start
LH: loop header
LB: loop body
LE: loop exit
PB: predicated region body
PF: predicated region fallthrough
CT: control target
= control target key end

     0   :  { %13 = vsyncpa [#allocation6], 0  ;;  %s14276_s0 = inlined_call_operand.hbm [shape: f32[16,16], index: 0, kind: input, shape index: {}]   ;;  %s14277_s1 = inlined_call_operand.hbm [shape: f32[16,256], index: 1, kind: input, shape index: {}]   ;;  %s14278_s2 = inlined_call_operand.vmem [shape: f32[1,256], index: 2, kind: input, shape index: {}]   ;;  %s14279_s3 = inlined_call_operand.hbm [shape: f32[32,128], index: 3, kind: input, shape index: {}]   ;;  %s14280_s4 = inlined_call_operand.hbm [shape: f32[32,128], index: 4, kind: input, shape index: {}]   ;;  %s14281_s5 = inlined_call_operand.hbm [shape: f32[32,32], index: 5, kind: input, shape index: {}]   ;;  %s14282_s6 = inlined_call_operand.hbm [shape: f32[32,32], index: 6, kind: input, shape index: {}]   ;;  %s14283_s7 = inlined_call_operand.vmem [shape: f32[1,32], index: 7, kind: input, shape index: {}]   ;;  %s14284_s8 = inlined_call_operand.hbm [shape: f32[16,32], index: 8, kind: output, shape index: {}]  }
   0x1   :  { %14 = vsyncpa [#allocation9], 0 }
   0x2   :  { %15 = vsyncpa [#allocation12], 0 }
   0x3   :  { %16 = vsyncpa [#allocation15], 0 }
   0x4   :  { %17 = vsyncpa [#allocation7], 0  ;;  %s12309_s27 = smov [#allocation8]  }
   0x5   :  { %s35_s28 = sshll.u32 %s12309_s27, 4  ;;  %s36_s28 = int_to_ptr.vmem [resolvable:$true] %s35_s28 }
   0x6   :  { %s12167_s29 = scalar_lea.vmem %s36_s28, 512  ;;  %p12172_p1 = scmp.lt.s32.totalorder %s36_s28, %s36_s28 }
   0x7   :  { %p12168_p0 = scmp.ne.s32.totalorder %s36_s28, %s12167_s29  ;;  %p12173_p2 = scmp.lt.s32.totalorder %s12167_s29, %s12167_s29 }
   0x9   :  { %p12174_p3 = por %p12173_p2, %p12172_p1 }
   0xb   :  { %p12175_p4 = pnand %p12174_p3, %p12168_p0 }
   0xd   :  { %12178 = shalt.err (!%p12175_p4)
}
   0xe   :  { %s12310_s30 = smov 256   ;;  %s12311_s9 = smov 16  }
   0xf   :  { %41 = dma.hbm_to_vmem [thread:$0]  %s14277_s1, 512, %s36_s28, [#allocation9], %s12310_s30, %s12310_s30, %s12311_s9  }
  0x10   :  { %s12312_s12 = smov [#allocation11]   ;;  %s12313_s14 = smov [#allocation5]  }
  0x11   :  { %s61_s13 = sshll.u32 %s12312_s12, 4  ;;  %s23_s15 = sshll.u32 %s12313_s14, 4  ;;  %s62_s13 = int_to_ptr.vmem [resolvable:$true] %s61_s13  ;;  %s24_s15 = int_to_ptr.vmem [resolvable:$true] %s23_s15 }
  0x12   :  { %s12187_s16 = scalar_lea.vmem %s62_s13, 512  ;;  %p12192_p6 = scmp.lt.s32.totalorder %s62_s13, %s62_s13 }
  0x13   :  { %p12188_p5 = scmp.ne.s32.totalorder %s62_s13, %s12187_s16  ;;  %p12193_p7 = scmp.lt.s32.totalorder %s12187_s16, %s12187_s16 }
  0x15   :  { %p12194_p8 = por %p12193_p7, %p12192_p6 }
  0x17   :  { %p12195_p9 = pnand %p12194_p8, %p12188_p5 }
  0x19   :  { %12198 = shalt.err (!%p12195_p9)
}
  0x1a   :  { %s12314_s17 = smov 128   ;;  %s12315_s18 = smov 8  }
  0x1b   :  { %67 = dma.hbm_to_vmem [thread:$0]  %s14280_s4, 512, %s62_s13, [#allocation12], %s12314_s17, %s12314_s17, %s12315_s18  }
  0x1c   :  { %s12207_s1 = scalar_lea.vmem %s24_s15, 256  ;;  %p12212_p11 = scmp.lt.s32.totalorder %s24_s15, %s24_s15 }
  0x1d   :  { %p12208_p10 = scmp.ne.s32.totalorder %s24_s15, %s12207_s1  ;;  %p12213_p12 = scmp.lt.s32.totalorder %s12207_s1, %s12207_s1 }
  0x1f   :  { %p12214_p13 = por %p12213_p12, %p12212_p11 }
  0x21   :  { %p12215_p0 = pnand %p12214_p13, %p12208_p10 }
  0x23   :  { %12218 = shalt.err (!%p12215_p0)
}
  0x24   :  { %29 = dma.hbm_to_vmem [thread:$0]  %s14276_s0, 256, %s24_s15, [#allocation6], %s12314_s17, %s12314_s17, %s12315_s18  }
  0x25   :  { %s12316_s23 = smov [#allocation10]   ;;  %s12317_s25 = smov [#allocation13]  }
  0x26   :  { %s49_s24 = sshll.u32 %s12316_s23, 4  ;;  %s73_s4 = sshll.u32 %s12317_s25, 4  ;;  %s50_s24 = int_to_ptr.vmem [resolvable:$true] %s49_s24  ;;  %s74_s4 = int_to_ptr.vmem [resolvable:$true] %s73_s4 }
  0x27   :  { %s12227_s26 = scalar_lea.vmem %s50_s24, 512  ;;  %p12232_p2 = scmp.lt.s32.totalorder %s50_s24, %s50_s24 }
  0x28   :  { %p12228_p1 = scmp.ne.s32.totalorder %s50_s24, %s12227_s26  ;;  %p12233_p3 = scmp.lt.s32.totalorder %s12227_s26, %s12227_s26 }
  0x2a   :  { %p12234_p4 = por %p12233_p3, %p12232_p2 }
  0x2c   :  { %p12235_p5 = pnand %p12234_p4, %p12228_p1 }
  0x2e   :  { %12238 = shalt.err (!%p12235_p5)
}
  0x2f   :  { %55 = dma.hbm_to_vmem [thread:$0]  %s14279_s3, 512, %s50_s24, [#allocation9], %s12314_s17, %s12314_s17, %s12315_s18  }
  0x30   :  { %s12247_s0 = scalar_lea.vmem %s74_s4, 512  ;;  %p12252_p7 = scmp.lt.s32.totalorder %s74_s4, %s74_s4 }
  0x31   :  { %p12248_p6 = scmp.ne.s32.totalorder %s74_s4, %s12247_s0  ;;  %p12253_p8 = scmp.lt.s32.totalorder %s12247_s0, %s12247_s0 }
  0x33   :  { %p12254_p9 = por %p12253_p8, %p12252_p7 }
  0x35   :  { %p12255_p10 = pnand %p12254_p9, %p12248_p6 }
  0x37   :  { %12258 = shalt.err (!%p12255_p10)
}
  0x38   :  { %79 = dma.hbm_to_vmem [thread:$0]  %s14281_s5, 512, %s74_s4, [#allocation12], %s12314_s17, %s12314_s17, %s12315_s18  }
  0x39   :  { %s12318_s9 = smov [#allocation14]  }
  0x3a   :  { %s85_s10 = sshll.u32 %s12318_s9, 4  ;;  %s86_s10 = int_to_ptr.vmem [resolvable:$true] %s85_s10 }
  0x3b   :  { %s12267_s11 = scalar_lea.vmem %s86_s10, 512  ;;  %p12272_p12 = scmp.lt.s32.totalorder %s86_s10, %s86_s10 }
  0x3c   :  { %p12268_p11 = scmp.ne.s32.totalorder %s86_s10, %s12267_s11  ;;  %p12273_p13 = scmp.lt.s32.totalorder %s12267_s11, %s12267_s11 }
  0x3e   :  { %p12274_p0 = por %p12273_p13, %p12272_p12 }
  0x40   :  { %p12275_p1 = pnand %p12274_p0, %p12268_p11 }
  0x42   :  { %12278 = shalt.err (!%p12275_p1)
}
  0x43   :  { %91 = dma.hbm_to_vmem [thread:$0]  %s14282_s6, 512, %s86_s10, [#allocation15], %s12314_s17, %s12314_s17, %s12315_s18  }
  0x44   :  { %12299 = dma.done.wait [#allocation6], 256  }
  0x45   :  { %12300 = vsyncadd [#allocation6], 4294967040 }
  0x46   :  { %12301 = dma.done.wait [#allocation9], 1024  }
  0x47   :  { %12302 = vsyncadd [#allocation9], 4294966272 }
  0x48   :  { %12303 = dma.done.wait [#allocation12], 1024  }
  0x49   :  { %12304 = vsyncadd [#allocation12], 4294966272 }
  0x4a   :  { %12305 = dma.done.wait [#allocation15], 512  }
  0x4b   :  { %12306 = vsyncadd [#allocation15], 4294966784  ;;  %v12319_v0 = vmov 0.0   ;;  %vm130_vm0 = vcmask 130048   ;;  %v117_v1 = vld [vmem:[#allocation8 + $0x18] sm:$0xff]  ;;  %v116_v2 = vld [vmem:[#allocation8 + $0x10] sm:$0xff] }
  0x4c   :  { %205 = vmatprep.mubr.f32.mxu0 %v12319_v0  ;;  %312 = vmatprep.mubr.f32.mxu1 %v12319_v0  ;;  %v115_v3 = vld [vmem:[#allocation8 + $0x8] sm:$0xff]  ;;  %v12404_v4 = vand.u32 4294901760, %v117_v1  ;;  %v12406_v5 = vand.u32 4294901760, %v116_v2  ;;  %v114_v7 = vld [vmem:[#allocation8] sm:$0xff]  ;;  %v112_v8 = vld [vmem:[#allocation5] sm:$0xff]  ;;  %vm12320_vm1 = vmmov 0  }
  0x4d   :  { %v12408_v6 = vand.u32 4294901760, %v115_v3  ;;  %v113_v9 = vld [vmem:[#allocation5 + $0x8] sm:$0xff]  ;;  %v12410_v10 = vand.u32 4294901760, %v114_v7  ;;  %v132_v11 = vsel %vm130_vm0, %v112_v8, 0  ;;  %v685_v40 = vld [vmem:[#allocation10 + $0x10] sm:$0xff]  ;;  %v684_v43 = vld [vmem:[#allocation10 + $0x8] sm:$0xff] }
  0x4e   :  { %v135_v12 = vsel %vm130_vm0, %v113_v9, 0  ;;  %166 = vmatprep.subr.mxu0 %v12404_v4  ;;  %v257_v13 = vsub.f32 %v117_v1, %v12404_v4  ;;  %v12414_v14 = vand.u32 4294901760, %v132_v11  ;;  %v263_v15 = vsub.f32 %v116_v2, %v12406_v5  ;;  %v686_v38 = vld [vmem:[#allocation10 + $0x18] sm:$0xff]  ;;  %v683_v46 = vld [vmem:[#allocation10] sm:$0xff]  ;;  %v1179_v1 = vld [vmem:[#allocation11 + $0x10] sm:$0xff]  ;;  %s12322_s13 = smov 32  }
  0x4f   :  { %v12418_v16 = vsub.f32 %v115_v3, %v12408_v6  ;;  %168 = vmatpush1.msra.mxu0 %v12406_v5  ;;  %v12422_v17 = vsub.f32 %v114_v7, %v12410_v10  ;;  %v12424_v18 = vand.u32 4294901760, %v135_v12  ;;  %v12434_v41 = vand.u32 4294901760, %v686_v38  ;;  %v1180_v63 = vld [vmem:[#allocation11 + $0x18] sm:$0xff]  ;;  %v1178_v3 = vld [vmem:[#allocation11 + $0x8] sm:$0xff]  ;;  %v1177_v7 = vld [vmem:[#allocation11] sm:$0xff]  ;;  %s12323_s16 = smov [#allocation16]  }
  0x50   :  { %170 = vmatprep.subr.mxu0 %v12408_v6  ;;  %v258_v19 = vand.u32 4294901760, %v257_v13  ;;  %v207_v20 = vsub.f32 %v132_v11, %v12414_v14  ;;  %v264_v21 = vand.u32 4294901760, %v263_v15  ;;  %v12440_v42 = vand.u32 4294901760, %v685_v40  ;;  %s10244_s19 = sshll.u32 %s12323_s16, 4  ;;  %s10245_s19 = int_to_ptr.vmem [resolvable:$true] %s10244_s19 }
  0x51   :  { %v270_v22 = vand.u32 4294901760, %v12418_v16  ;;  %172 = vmatpush1.msra.mxu0 %v12410_v10  ;;  %v276_v23 = vand.u32 4294901760, %v12422_v17  ;;  %v218_v24 = vsub.f32 %v135_v12, %v12424_v18  ;;  %v12446_v44 = vsub.f32 %v686_v38, %v12434_v41  ;;  %s12279_s20 = scalar_lea.vmem %s10245_s19, 256  ;;  %p12284_p3 = scmp.lt.s32.totalorder %s10245_s19, %s10245_s19 }
  0x52   :  { %v259_v25 = vsub.f32 %v257_v13, %v258_v19  ;;  %v208_v26 = vand.u32 4294901760, %v207_v20  ;;  %v265_v27 = vsub.f32 %v263_v15, %v264_v21  ;;  %357 = vmatprep.subr.mxu0 %v257_v13  ;;  %v12450_v45 = vand.u32 4294901760, %v684_v43  ;;  %p12280_p2 = scmp.ne.s32.totalorder %s10245_s19, %s12279_s20  ;;  %p12285_p4 = scmp.lt.s32.totalorder %s12279_s20, %s12279_s20 }
  0x53   :  { %v271_v28 = vsub.f32 %v12418_v16, %v270_v22  ;;  %v277_v29 = vsub.f32 %v12422_v17, %v276_v23  ;;  %v219_v30 = vand.u32 4294901760, %v218_v24  ;;  %v12454_v47 = vsub.f32 %v685_v40, %v12440_v42 }
  0x54   :  { %v260_v31 = vand.u32 4294901760, %v259_v25  ;;  %v209_v32 = vsub.f32 %v207_v20, %v208_v26  ;;  %v266_v33 = vand.u32 4294901760, %v265_v27  ;;  %v12459_v48 = vand.u32 4294901760, %v12446_v44  ;;  %v118_v27 = vld [vmem:[%s14278_s2] sm:$0x3]  ;;  %s12321_s2 = smov 64   ;;  %p12286_p5 = por %p12285_p4, %p12284_p3 }
  0x55   :  { %v272_v34 = vand.u32 4294901760, %v271_v28  ;;  %v278_v35 = vand.u32 4294901760, %v277_v29  ;;  %v220_v36 = vsub.f32 %v218_v24, %v219_v30  ;;  %v12461_v49 = vand.u32 4294901760, %v683_v46 }
  0x56   :  { %261 = vmatprep.subr.mxu1 %v260_v31  ;;  %v210_v37 = vand.u32 4294901760, %v209_v32  ;;  %v12465_v50 = vsub.f32 %v684_v43, %v12450_v45  ;;  %v12469_v51 = vand.u32 4294901760, %v12454_v47  ;;  %v798_v52 = vsub.f32 %v12446_v44, %v12459_v48  ;;  %p12287_p6 = pnand %p12286_p5, %p12280_p2 }
  0x57   :  { %267 = vmatpush1.msra.mxu1 %v266_v33  ;;  %v221_v39 = vand.u32 4294901760, %v220_v36  ;;  %v12476_v53 = vsub.f32 %v683_v46, %v12461_v49  ;;  %v12537_v2 = vand.u32 4294901760, %v1180_v63  ;;  %v12565_v9 = vand.u32 4294901760, %v1177_v7 }
  0x58   :  { %211 = vmatmul.mubr.f32.vlgmr.msra.gmra.mxu0 %v210_v37  ;;  %273 = vmatprep.subr.mxu1 %v272_v34  ;;  %v12480_v54 = vand.u32 4294901760, %v12465_v50  ;;  %v805_v55 = vsub.f32 %v12454_v47, %v12469_v51  ;;  %v12490_v56 = vand.u32 4294901760, %v798_v52  ;;  %vm687_vm2 = vcmask 261120  }
  0x59   :  { %279 = vmatpush1.msra.mxu1 %v278_v35  ;;  %360 = vmatpush1.msra.mxu0 %v263_v15  ;;  %v12493_v57 = vand.u32 4294901760, %v12476_v53  ;;  %v12585_v13 = vsub.f32 %v1177_v7, %v12565_v9  ;;  %vm1722_vm3 = vcmask 254976   ;;  %vm2789_vm4 = vcmask 259076  }
  0x5a   :  { %216 = vmatprep.mubr.f32.mxu0 %v12319_v0  ;;  %314 = vmatmul.mubr.f32.vlgmr.msra.gmra.mxu1 %v12414_v14  ;;  %v812_v58 = vsub.f32 %v12465_v50, %v12480_v54  ;;  %v12501_v59 = vand.u32 4294901760, %v805_v55  ;;  %vm1728_vm5 = vcmask 261126   ;;  %vm2783_vm6 = vcmask 257026  }
  0x5b   :  { %445 = vmatprep.subr.mxu1 %v12404_v4  ;;  %363 = vmatprep.subr.mxu0 %v12418_v16  ;;  %v819_v60 = vsub.f32 %v12476_v53, %v12493_v57 }
  0x5c   :  { %222 = vmatmul.mubr.f32.gmra.mxu0 %v221_v39  ;;  %447 = vmatpush1.msra.mxu1 %v12406_v5  ;;  %v12511_v61 = vand.u32 4294901760, %v812_v58 }
  0x5d   :  { %319 = vmatprep.mubr.f32.mxu1 %v12319_v0  ;;  %366 = vmatpush1.msra.mxu0 %v12422_v17  ;;  %v12519_v62 = vand.u32 4294901760, %v819_v60  ;;  %v12604_v17 = vand.u32 4294901760, %v12585_v13 }
  0x5e   :  { %321 = vmatmul.mubr.f32.gmra.mxu1 %v12424_v18  ;;  %399 = vmatprep.mubr.f32.mxu0 %v12319_v0 }
  0x5f   :  { %449 = vmatprep.subr.mxu1 %v12408_v6  ;;  %534 = vmatprep.subr.mxu0 %v258_v19 }
  0x60   :  { %402 = vmatmul.mubr.f32.vlgmr.msra.gmra.mxu0 %v207_v20  ;;  %451 = vmatpush1.msra.mxu1 %v12410_v10 }
  0x61   :  { %484 = vmatprep.mubr.f32.mxu1 %v12319_v0  ;;  %538 = vmatpush1.msra.mxu0 %v264_v21  ;;  %v1309_v21 = vsub.f32 %v12585_v13, %v12604_v17 }
  0x62   :  { %407 = vmatprep.mubr.f32.mxu0 %v12319_v0  ;;  %488 = vmatmul.mubr.f32.vlgmr.msra.gmra.mxu1 %v208_v26 }
  0x63   :  { %623 = vmatprep.subr.mxu1 %v12404_v4  ;;  %542 = vmatprep.subr.mxu0 %v270_v22  ;;  %v12543_v4 = vand.u32 4294901760, %v1179_v1 }
  0x64   :  { %410 = vmatmul.mubr.f32.gmra.mxu0 %v218_v24  ;;  %625 = vmatpush1.msra.mxu1 %v12406_v5  ;;  %v12551_v5 = vsub.f32 %v1180_v63, %v12537_v2  ;;  %v120_v24 = vlaneseq }
  0x65   :  { %493 = vmatprep.mubr.f32.mxu1 %v12319_v0  ;;  %546 = vmatpush1.msra.mxu0 %v276_v23  ;;  %v12560_v8 = vsub.f32 %v1179_v1, %v12543_v4  ;;  %v12633_v23 = vand.u32 4294901760, %v1309_v21 }
  0x66   :  { %497 = vmatmul.mubr.f32.gmra.mxu1 %v219_v30  ;;  %579 = vmatprep.mubr.f32.mxu0 %v12319_v0  ;;  %v121_v25 = vshrl.u32 %v120_v24, 7 }
  0x67   :  { %627 = vmatprep.subr.mxu1 %v12408_v6  ;;  %10828 = vmatprep.subr.mxu0 %v12319_v0  ;;  %v12553_v6 = vand.u32 4294901760, %v1178_v3  ;;  %v12580_v12 = vand.u32 4294901760, %v12560_v8 }
  0x68   :  { %581 = vmatmul.mubr.f32.vlgmr.msra.gmra.mxu0 %v12414_v14  ;;  %629 = vmatpush1.msra.mxu1 %v12410_v10  ;;  %v12570_v10 = vand.u32 4294901760, %v12551_v5  ;;  %v122_v26 = vsub.s32 0, %v121_v25  ;;  %v126_v28 = vsub.s32 1, %v121_v25 }
  0x69   :  { %10829 = vmatpush3.msra.mxu0 %v12434_v41  ;;  %662 = vmatprep.mubr.f32.mxu1 %v12319_v0  ;;  %v12573_v11 = vsub.f32 %v1178_v3, %v12553_v6  ;;  %v1295_v16 = vsub.f32 %v12560_v8, %v12580_v12 }
  0x6a   :  { %10830 = vmatprep.subr.mxu0 %v12319_v0  ;;  %10839 = vmatprep.subr.mxu1 %v12319_v0  ;;  %v123_v30 = vrot.slane %v118_v27, %v122_v26  ;;  %v127_v33 = vrot.slane %v118_v27, %v126_v28 }
  0x6b   :  { %10831 = vmatpush3.msra.mxu0 %v12440_v42  ;;  %586 = vmatprep.mubr.f32.mxu0 %v12319_v0  ;;  %v12592_v15 = vand.u32 4294901760, %v12573_v11  ;;  %v12617_v20 = vand.u32 4294901760, %v1295_v16 }
  0x6c   :  { %664 = vmatmul.mubr.f32.vlgmr.msra.gmra.mxu1 %v12414_v14  ;;  %10832 = vmatprep.subr.mxu0 %v12319_v0  ;;  %v1288_v14 = vsub.f32 %v12551_v5, %v12570_v10 }
  0x6d   :  { %10840 = vmatpush3.msra.mxu1 %v12490_v56  ;;  %588 = vmatmul.mubr.f32.gmra.mxu0 %v12424_v18  ;;  %v1302_v19 = vsub.f32 %v12573_v11, %v12592_v15 }
  0x6e   :  { %10833 = vmatpush3.msra.mxu0 %v12450_v45  ;;  %10841 = vmatprep.subr.mxu1 %v12319_v0 }
  0x6f   :  { %10834 = vmatprep.subr.mxu0 %v12319_v0  ;;  %10842 = vmatpush3.msra.mxu1 %v12501_v59  ;;  %v12625_v22 = vand.u32 4294901760, %v1302_v19 }
  0x70   :  { %669 = vmatprep.mubr.f32.mxu1 %v12319_v0  ;;  %10835 = vmatpush3.msra.mxu0 %v12461_v49 }
  0x71   :  { %10843 = vmatprep.subr.mxu1 %v12319_v0  ;;  %671 = vmatmul.mubr.f32.gmra.mxu1 %v12424_v18  ;;  %v12608_v18 = vand.u32 4294901760, %v1288_v14 }
  0x72   :  { %10836 = vmatprep.mubr.msk.f32.mxu0 %vm12320_vm1, %v12319_v0  ;;  %10844 = vmatpush3.msra.mxu1 %v12511_v61 }
  0x73   :  { %10850 = vmatprep.subr.mxu0 %v12319_v0  ;;  %10837 = vmatmul.mubr.f32.vlgmr.msra.gmra.mxu0 %v12319_v0 }
  0x74   :  { %10845 = vmatprep.subr.mxu1 %v12319_v0  ;;  %10851 = vmatpush3.msra.mxu0 %v12446_v44 }
  0x75   :  { %10846 = vmatpush3.msra.mxu1 %v12519_v62  ;;  %10852 = vmatprep.subr.mxu0 %v12319_v0 }
  0x76   :  { %10847 = vmatprep.mubr.msk.f32.mxu1 %vm12320_vm1, %v12319_v0  ;;  %10853 = vmatpush3.msra.mxu0 %v12454_v47 }
  0x77   :  { %10861 = vmatprep.subr.mxu1 %v12319_v0  ;;  %10848 = vmatmul.mubr.f32.vlgmr.msra.gmra.mxu1 %v12319_v0 }
  0x78   :  { %10854 = vmatprep.subr.mxu0 %v12319_v0  ;;  %10862 = vmatpush3.msra.mxu1 %v12434_v41 }
  0x79   :  { %10855 = vmatpush3.msra.mxu0 %v12465_v50  ;;  %10863 = vmatprep.subr.mxu1 %v12319_v0 }
  0x7a   :  { %10856 = vmatprep.subr.mxu0 %v12319_v0  ;;  %10864 = vmatpush3.msra.mxu1 %v12440_v42 }
  0x7b   :  { %10857 = vmatpush3.msra.mxu0 %v12476_v53  ;;  %10858 = vmatprep.mubr.msk.f32.mxu0 %vm12320_vm1, %v12319_v0 }
  0x7c   :  { %10865 = vmatprep.subr.mxu1 %v12319_v0  ;;  %10859 = vmatmul.mubr.f32.vlgmr.msra.gmra.mxu0 %v12319_v0 }
  0x7d   :  { %10866 = vmatpush3.msra.mxu1 %v12450_v45  ;;  %10872 = vmatprep.subr.mxu0 %v12319_v0 }
  0x7e   :  { %10867 = vmatprep.subr.mxu1 %v12319_v0  ;;  %10873 = vmatpush3.msra.mxu0 %v12459_v48 }
  0x7f   :  { %10868 = vmatpush3.msra.mxu1 %v12461_v49  ;;  %10869 = vmatprep.mubr.msk.f32.mxu1 %vm12320_vm1, %v12319_v0 }
  0x80   :  { %10874 = vmatprep.subr.mxu0 %v12319_v0  ;;  %10870 = vmatmul.mubr.f32.vlgmr.msra.gmra.mxu1 %v12319_v0 }
  0x81   :  { %10875 = vmatpush3.msra.mxu0 %v12469_v51  ;;  %10883 = vmatprep.subr.mxu1 %v12319_v0 }
  0x82   :  { %10876 = vmatprep.subr.mxu0 %v12319_v0  ;;  %10884 = vmatpush3.msra.mxu1 %v12434_v41 }
  0x83   :  { %10877 = vmatpush3.msra.mxu0 %v12480_v54  ;;  %10885 = vmatprep.subr.mxu1 %v12319_v0 }
  0x84   :  { %10878 = vmatprep.subr.mxu0 %v12319_v0  ;;  %10886 = vmatpush3.msra.mxu1 %v12440_v42 }
  0x85   :  { %10879 = vmatpush3.msra.mxu0 %v12493_v57  ;;  %10880 = vmatprep.mubr.msk.f32.mxu0 %vm12320_vm1, %v12319_v0 }
  0x86   :  { %10887 = vmatprep.subr.mxu1 %v12319_v0  ;;  %10881 = vmatmul.mubr.f32.vlgmr.msra.gmra.mxu0 %v12319_v0 }
  0x87   :  { %10888 = vmatpush3.msra.mxu1 %v12450_v45  ;;  %10894 = vmatprep.subr.mxu0 %v12319_v0 }
  0x88   :  { %10889 = vmatprep.subr.mxu1 %v12319_v0  ;;  %10895 = vmatpush3.msra.mxu0 %v12537_v2 }
  0x89   :  { %10890 = vmatpush3.msra.mxu1 %v12461_v49  ;;  %10891 = vmatprep.mubr.msk.f32.mxu1 %vm12320_vm1, %v12319_v0 }
  0x8a   :  { %10896 = vmatprep.subr.mxu0 %v12319_v0  ;;  %10892 = vmatmul.mubr.f32.vlgmr.msra.gmra.mxu1 %v12319_v0 }
  0x8b   :  { %10897 = vmatpush3.msra.mxu0 %v12543_v4  ;;  %10905 = vmatprep.subr.mxu1 %v12319_v0 }
  0x8c   :  { %10898 = vmatprep.subr.mxu0 %v12319_v0  ;;  %10906 = vmatpush3.msra.mxu1 %v12608_v18 }
  0x8d   :  { %10899 = vmatpush3.msra.mxu0 %v12553_v6  ;;  %10907 = vmatprep.subr.mxu1 %v12319_v0 }
  0x8e   :  { %10900 = vmatprep.subr.mxu0 %v12319_v0  ;;  %10908 = vmatpush3.msra.mxu1 %v12617_v20 }
  0x8f   :  { %10901 = vmatpush3.msra.mxu0 %v12565_v9  ;;  %10909 = vmatprep.subr.mxu1 %v12319_v0 }
  0x90   :  { %10902 = vmatprep.mubr.msk.f32.mxu0 %vm12320_vm1, %v12319_v0  ;;  %10910 = vmatpush3.msra.mxu1 %v12625_v22 }
  0x91   :  { %10916 = vmatprep.subr.mxu0 %v12319_v0  ;;  %10903 = vmatmul.mubr.f32.vlgmr.msra.gmra.mxu0 %v12319_v0 }
  0x92   :  { %10911 = vmatprep.subr.mxu1 %v12319_v0  ;;  %10917 = vmatpush3.msra.mxu0 %v12551_v5 }
  0x93   :  { %10912 = vmatpush3.msra.mxu1 %v12633_v23  ;;  %10913 = vmatprep.mubr.msk.f32.mxu1 %vm12320_vm1, %v12319_v0 }
  0x94   :  { %10918 = vmatprep.subr.mxu0 %v12319_v0  ;;  %10914 = vmatmul.mubr.f32.vlgmr.msra.gmra.mxu1 %v12319_v0 }
  0x95   :  { %10919 = vmatpush3.msra.mxu0 %v12560_v8  ;;  %10927 = vmatprep.subr.mxu1 %v12319_v0 }
  0x96   :  { %10920 = vmatprep.subr.mxu0 %v12319_v0  ;;  %10928 = vmatpush3.msra.mxu1 %v12537_v2 }
  0x97   :  { %10921 = vmatpush3.msra.mxu0 %v12573_v11  ;;  %10929 = vmatprep.subr.mxu1 %v12319_v0 }
  0x98   :  { %10922 = vmatprep.subr.mxu0 %v12319_v0  ;;  %10930 = vmatpush3.msra.mxu1 %v12543_v4 }
  0x99   :  { %10923 = vmatpush3.msra.mxu0 %v12585_v13  ;;  %10924 = vmatprep.mubr.msk.f32.mxu0 %vm12320_vm1, %v12319_v0 }
  0x9a   :  { %10931 = vmatprep.subr.mxu1 %v12319_v0  ;;  %10925 = vmatmul.mubr.f32.vlgmr.msra.gmra.mxu0 %v12319_v0 }
  0x9b   :  { %10932 = vmatpush3.msra.mxu1 %v12553_v6  ;;  %10938 = vmatprep.subr.mxu0 %v12319_v0 }
  0x9c   :  { %10933 = vmatprep.subr.mxu1 %v12319_v0  ;;  %10939 = vmatpush3.msra.mxu0 %v12570_v10 }
  0x9d   :  { %10934 = vmatpush3.msra.mxu1 %v12565_v9  ;;  %10935 = vmatprep.mubr.msk.f32.mxu1 %vm12320_vm1, %v12319_v0 }
  0x9e   :  { %10940 = vmatprep.subr.mxu0 %v12319_v0  ;;  %10936 = vmatmul.mubr.f32.vlgmr.msra.gmra.mxu1 %v12319_v0 }
  0x9f   :  { %10941 = vmatpush3.msra.mxu0 %v12580_v12  ;;  %10949 = vmatprep.subr.mxu1 %v12319_v0 }
  0xa0   :  { %10942 = vmatprep.subr.mxu0 %v12319_v0  ;;  %10950 = vmatpush3.msra.mxu1 %v12537_v2 }
  0xa1   :  { %10943 = vmatpush3.msra.mxu0 %v12592_v15  ;;  %10951 = vmatprep.subr.mxu1 %v12319_v0 }
  0xa2   :  { %10944 = vmatprep.subr.mxu0 %v12319_v0  ;;  %10952 = vmatpush3.msra.mxu1 %v12543_v4 }
  0xa3   :  { %10945 = vmatpush3.msra.mxu0 %v12604_v17  ;;  %10946 = vmatprep.mubr.msk.f32.mxu0 %vm12320_vm1, %v12319_v0 }
  0xa4   :  { %10953 = vmatprep.subr.mxu1 %v12319_v0  ;;  %10947 = vmatmul.mubr.f32.vlgmr.msra.gmra.mxu0 %v12319_v0 }
  0xa5   :  { %10954 = vmatpush3.msra.mxu1 %v12553_v6  ;;  %10957 = vmatprep.mubr.msk.f32.mxu1 %vm12320_vm1, %v12319_v0 }
  0xa6   :  { %10955 = vmatprep.subr.mxu1 %v12319_v0  ;;  %10960 = vmatprep.subr.mxu0 %v12319_v0 }
  0xa7   :  { %10956 = vmatpush3.msra.mxu1 %v12565_v9  ;;  %10961 = vmatpush3.msra.mxu0 %v12434_v41 }
  0xa8   :  { %10958 = vmatmul.mubr.f32.vlgmr.msra.gmra.mxu1 %v12319_v0  ;;  %10971 = vmatprep.subr.mxu1 %v12319_v0 }
  0xa9   :  { %10972 = vmatpush3.msra.mxu1 %v12490_v56  ;;  %10979 = vmatprep.mubr.msk.f32.mxu1 %vm12320_vm1, %v12319_v0 }
  0xaa   :  { %10973 = vmatprep.subr.mxu1 %v12319_v0  ;;  %10962 = vmatprep.subr.mxu0 %v12319_v0 }
  0xab   :  { %10974 = vmatpush3.msra.mxu1 %v12501_v59  ;;  %10963 = vmatpush3.msra.mxu0 %v12440_v42 }
  0xac   :  { %10975 = vmatprep.subr.mxu1 %v12319_v0  ;;  %10964 = vmatprep.subr.mxu0 %v12319_v0 }
  0xad   :  { %10976 = vmatpush3.msra.mxu1 %v12511_v61  ;;  %10965 = vmatpush3.msra.mxu0 %v12450_v45 }
  0xae   :  { %10977 = vmatprep.subr.mxu1 %v12319_v0  ;;  %10966 = vmatprep.subr.mxu0 %v12319_v0 }
  0xaf   :  { %10978 = vmatpush3.msra.mxu1 %v12519_v62  ;;  %10967 = vmatpush3.msra.mxu0 %v12461_v49 }
  0xb0   :  { %10993 = vmatprep.subr.mxu1 %v12319_v0  ;;  %10968 = vmatprep.mubr.msk.f32.mxu0 %vm12320_vm1, %v12319_v0 }
  0xb1   :  { %10982 = vmatprep.subr.mxu0 %v12319_v0 }
 0x118   :  { %v212_v29 = vpop.f32.mrf.mxu0 }
 0x119   :  { %v213_v36 = vadd.f32 %v212_v29, %v123_v30 }
 0x11a   :  { %v214_v31 = vpop.f32.mrf.mxu0  ;;  %v315_v32 = vpop.f32.mrf.mxu1 }
 0x11b   :  { %v215_v39 = vadd.f32 %v214_v31, %v127_v33  ;;  %v316_v46 = vadd.f32 %v315_v32, %v213_v36 }
 0x11c   :  { %v223_v34 = vpop.f32.mrf.mxu0  ;;  %v317_v35 = vpop.f32.mrf.mxu1 }
 0x11d   :  { %v224_v52 = vadd.f32 %v223_v34, %v123_v30  ;;  %v318_v58 = vadd.f32 %v317_v35, %v215_v39 }
 0x11e   :  { %v225_v37 = vpop.f32.mrf.mxu0  ;;  %v322_v38 = vpop.f32.mrf.mxu1 }
 0x11f   :  { %v226_v60 = vadd.f32 %v225_v37, %v127_v33  ;;  %v323_v1 = vadd.f32 %v322_v38, %v224_v52 }
 0x120   :  { %v403_v40 = vpop.f32.mrf.mxu0  ;;  %v324_v43 = vpop.f32.mrf.mxu1 }
 0x121   :  { %v404_v59 = vadd.f32 %v403_v40, %v316_v46  ;;  %v325_v16 = vadd.f32 %v324_v43, %v226_v60 }
 0x122   :  { %v405_v55 = vpop.f32.mrf.mxu0  ;;  %v489_v56 = vpop.f32.mrf.mxu1 }
 0x123   :  { %v406_v63 = vadd.f32 %v405_v55, %v318_v58  ;;  %v490_v14 = vadd.f32 %v489_v56, %v404_v59 }
 0x124   :  { %v411_v61 = vpop.f32.mrf.mxu0  ;;  %v491_v62 = vpop.f32.mrf.mxu1 }
 0x125   :  { %v412_v19 = vadd.f32 %v411_v61, %v323_v1  ;;  %v492_v25 = vadd.f32 %v491_v62, %v406_v63 }
 0x126   :  { %v413_v3 = vpop.f32.mrf.mxu0  ;;  %v498_v7 = vpop.f32.mrf.mxu1 }
 0x127   :  { %v414_v27 = vadd.f32 %v413_v3, %v325_v16  ;;  %v499_v30 = vadd.f32 %v498_v7, %v412_v19 }
 0x128   :  { %v582_v21 = vpop.f32.mrf.mxu0  ;;  %v500_v24 = vpop.f32.mrf.mxu1 }
 0x129   :  { %v583_v26 = vadd.f32 %v582_v21, %v490_v14  ;;  %v501_v34 = vadd.f32 %v500_v24, %v414_v27 }
 0x12a   :  { %v584_v28 = vpop.f32.mrf.mxu0 }
 0x12b   :  { %v585_v29 = vadd.f32 %v584_v28, %v492_v25 }
 0x12c   :  { %v665_v31 = vpop.f32.mrf.mxu1 }
 0x12d   :  { %v666_v32 = vadd.f32 %v665_v31, %v583_v26  ;;  %v589_v33 = vpop.f32.mrf.mxu0 }
 0x12e   :  { %v590_v35 = vadd.f32 %v589_v33, %v499_v30  ;;  %v667_v36 = vpop.f32.mrf.mxu1 }
 0x12f   :  { %677 = vst [vmem:[#allocation2 + $0x10] sm:$0xff] %v666_v32  ;;  %v668_v37 = vadd.f32 %v667_v36, %v585_v29  ;;  %v591_v38 = vpop.f32.mrf.mxu0 }
 0x130   :  { %v592_v39 = vadd.f32 %v591_v38, %v501_v34 }
 0x131   :  { %678 = vst [vmem:[#allocation2] sm:$0xff] %v668_v37  ;;  %v672_v40 = vpop.f32.mrf.mxu1 }
 0x132   :  { %v673_v43 = vadd.f32 %v672_v40, %v590_v35 }
 0x133   :  { %v766_v46 = vpop.f32.mrf.mxu0  ;;  %v674_v52 = vpop.f32.mrf.mxu1 }
 0x134   :  { %679 = vst [vmem:[#allocation2 + $0x18] sm:$0xff] %v673_v43  ;;  %v675_v55 = vadd.f32 %v674_v52, %v592_v39 }
 0x135   :  { %v10838_v56 = vpop.f32.mrf.mxu0 }
 0x136   :  { %680 = vst [vmem:[#allocation2 + $0x8] sm:$0xff] %v675_v55  ;;  %v681_v25 = vld [vmem:[#allocation2 + $0x10] sm:$0x3] }
 0x137   :  { %v857_v58 = vpop.f32.mrf.mxu1 }
 0x138   :  { %v858_v62 = vadd.f32 %v857_v58, %v766_v46 }
 0x139   :  { %v10849_v59 = vpop.f32.mrf.mxu1 }
 0x13c   :  { %v937_v60 = vpop.f32.mrf.mxu0 }
 0x13d   :  { %v938_v1 = vadd.f32 %v937_v60, %v858_v62  ;;  %v682_v59 = vld [vmem:[#allocation2 + $0x8] sm:$0xc0] }
 0x13e   :  { %v10860_v61 = vpop.f32.mrf.mxu0 }
 0x140   :  { %v1014_v63 = vpop.f32.mrf.mxu1 }
 0x141   :  { %v1015_v7 = vadd.f32 %v1014_v63, %v938_v1 }
 0x142   :  { %v10871_v3 = vpop.f32.mrf.mxu1 }
 0x146   :  { %v1097_v14 = vpop.f32.mrf.mxu0 }
 0x147   :  { %v1098_v16 = vadd.f32 %v1097_v14, %v1015_v7 }
 0x148   :  { %v10882_v19 = vpop.f32.mrf.mxu0 }
 0x14a   :  { %v1172_v21 = vpop.f32.mrf.mxu1 }
 0x14b   :  { %v1173_v24 = vadd.f32 %v1172_v21, %v1098_v16 }
 0x14c   :  { %v10893_v26 = vpop.f32.mrf.mxu1 }
 0x14d   :  { %v1176_v27 = vadd.f32 %v1173_v24, %v681_v25 }
 0x14f   :  { %12031 = vtanh.f32 %v1176_v27  ;;  %v10259_v62 = vmul.f32 -1.442695, %v1176_v27 }
 0x151   :  { %v1256_v28 = vpop.f32.mrf.mxu0 }
 0x153   :  { %v10904_v29 = vpop.f32.mrf.mxu0 }
 0x154   :  { %v1347_v30 = vpop.f32.mrf.mxu1 }
 0x155   :  { %v1348_v35 = vadd.f32 %v1347_v30, %v1256_v28 }
 0x156   :  { %v10915_v31 = vpop.f32.mrf.mxu1 }
 0x15a   :  { %v1427_v32 = vpop.f32.mrf.mxu0 }
 0x15b   :  { %v1428_v37 = vadd.f32 %v1427_v32, %v1348_v35 }
 0x15c   :  { %v12032_v33 = vpop.eup %12031  ;;  %v10926_v34 = vpop.f32.mrf.mxu0 }
 0x15d   :  { %1679 = vrot.lane.b32.xlu0 %v12032_v33, %s12321_s2 }
 0x15e   :  { %v1504_v36 = vpop.f32.mrf.mxu1 }
 0x15f   :  { %v1505_v39 = vadd.f32 %v1504_v36, %v1428_v37 }
 0x160   :  { %v10937_v38 = vpop.f32.mrf.mxu1 }
 0x164   :  { %v1587_v40 = vpop.f32.mrf.mxu0 }
 0x165   :  { %v1588_v43 = vadd.f32 %v1587_v40, %v1505_v39 }
 0x166   :  { %v10948_v46 = vpop.f32.mrf.mxu0 }
 0x168   :  { %v1662_v52 = vpop.f32.mrf.mxu1 }
 0x169   :  { %v1663_v55 = vadd.f32 %v1662_v52, %v1588_v43 }
 0x16a   :  { %v10959_v56 = vpop.f32.mrf.mxu1 }
 0x16b   :  { %v1667_v58 = vrot.slane %v1663_v55, 2 }
 0x16d   :  { %v1669_v60 = vadd.f32 %v1667_v58, %v682_v59 }
 0x16f   :  { %12033 = vtanh.f32 %v1669_v60  ;;  %v10260_v3 = vmul.f32 -1.442695, %v1669_v60 }
 0x170   :  { %12035 = vpow2.f32 %v10259_v62 }
 0x17c   :  { %v12034_v61 = vpop.eup %12033 }
 0x17d   :  { %1703 = vrot.lane.b32.xlu0 %v12034_v61, %s12321_s2  ;;  %v12036_v63 = vpop.eup %12035 }
 0x17e   :  { %v1673_v1 = vadd.f32 1.0, %v12036_v63 }
 0x180   :  { %12037 = vrcp.f32 %v1673_v1 }
 0x181   :  { %12039 = vpow2.f32 %v10260_v3 }
 0x18d   :  { %v12038_v7 = vpop.eup %12037 }
 0x18e   :  { %v12040_v19 = vpop.eup %12039  ;;  %v1677_v27 = vmul.f32 0.0, %v12038_v7 }
 0x18f   :  { %v1697_v21 = vadd.f32 1.0, %v12040_v19 }
 0x191   :  { %12041 = vrcp.f32 %v1697_v21 }
 0x19e   :  { %v12042_v24 = vpop.eup %12041 }
 0x19f   :  { %v1701_v31 = vmul.f32 0.0, %v12042_v24 }
 0x1cf   :  { %v1680_v14 = vpop.permute.xlu0 %1679 }
 0x1d0   :  { %v1682_v16 = vmul.f32 %v12038_v7, %v1680_v14 }
 0x1d2   :  { %1684 = vrot.lane.b32.xlu1 %v1682_v16, %s12322_s13 }
 0x1ef   :  { %v1704_v25 = vpop.permute.xlu0 %1703 }
 0x1f0   :  { %v1706_v26 = vmul.f32 %v12042_v24, %v1704_v25 }
 0x1f2   :  { %1708 = vrot.lane.b32.xlu1 %v1706_v26, %s12322_s13 }
 0x244   :  { %v1685_v28 = vpop.permute.xlu1 %1684 }
 0x245   :  { %v12717_v29 = vadd.f32 %v1685_v28, %v1677_v27 }
 0x247   :  { %12043 = vtanh.f32 %v12717_v29 }
 0x254   :  { %v12044_v30 = vpop.eup %12043 }
 0x255   :  { %1690 = vrot.lane.b32.xlu0 %v12044_v30, %s12321_s2 }
 0x264   :  { %v1709_v32 = vpop.permute.xlu1 %1708 }
 0x265   :  { %v12721_v33 = vadd.f32 %v1709_v32, %v1701_v31  ;;  %v1731_v31 = vld [vmem:[#allocation2 + $0x8] sm:$0x30] }
 0x267   :  { %12045 = vtanh.f32 %v12721_v33 }
 0x274   :  { %v12046_v34 = vpop.eup %12045 }
 0x275   :  { %1714 = vrot.lane.b32.xlu1 %v12046_v34, %s12321_s2 }
 0x2c7   :  { %v1691_v35 = vpop.permute.xlu0 %1690 }
 0x2c8   :  { %v1693_v36 = vmul.f32 %v12038_v7, %v1691_v35 }
 0x2ca   :  { %1719 = vrot.lane.b32.xlu0 %v1693_v36, %s12322_s13 }
 0x2e7   :  { %v1715_v37 = vpop.permute.xlu1 %1714 }
 0x2e8   :  { %v12726_v38 = vmul.f32 %v12042_v24, %v1715_v37 }
 0x2ea   :  { %v2231_v39 = vrot.slane %v12726_v38, 6 }
 0x2ec   :  { %2232 = vrot.lane.b32.xlu1 %v2231_v39, %s12322_s13 }
 0x33c   :  { %v1720_v40 = vpop.permute.xlu0 %1719 }
 0x33d   :  { %1723 = vst.msk [vmem:[#allocation3] sm:$0x3] %vm1722_vm3, %v1720_v40  ;;  %v1736_v43 = vsel %vm687_vm2, %v1720_v40, 0 }
 0x33e   :  { %v1807_v46 = vand.u32 4294901760, %v1736_v43 }
 0x340   :  { %v1808_v52 = vsub.f32 %v1736_v43, %v1807_v46  ;;  %10980 = vmatmul.mubr.f32.vlgmr.msra.gmra.mxu1 %v1807_v46 }
 0x341   :  { %10994 = vmatpush3.msra.mxu1 %v12434_v41  ;;  %11001 = vmatprep.mubr.msk.f32.mxu1 %vm12320_vm1, %v12319_v0 }
 0x342   :  { %v1809_v55 = vand.u32 4294901760, %v1808_v52  ;;  %10995 = vmatprep.subr.mxu1 %v12319_v0 }
 0x343   :  { %10996 = vmatpush3.msra.mxu1 %v12440_v42 }
 0x344   :  { %v1810_v56 = vsub.f32 %v1808_v52, %v1809_v55  ;;  %10997 = vmatprep.subr.mxu1 %v12319_v0 }
 0x345   :  { %10998 = vmatpush3.msra.mxu1 %v12450_v45 }
 0x346   :  { %10999 = vmatprep.subr.mxu1 %v12319_v0  ;;  %v1811_v58 = vand.u32 4294901760, %v1810_v56 }
 0x347   :  { %11000 = vmatpush3.msra.mxu1 %v12461_v49 }
 0x348   :  { %11002 = vmatmul.mubr.f32.vlgmr.msra.gmra.mxu1 %v1809_v55  ;;  %11015 = vmatprep.subr.mxu1 %v12319_v0 }
 0x349   :  { %10969 = vmatmul.mubr.f32.vlgmr.msra.gmra.mxu0 %v1811_v58  ;;  %11016 = vmatpush3.msra.mxu1 %v12434_v41 }
 0x34a   :  { %10983 = vmatpush3.msra.mxu0 %v12446_v44  ;;  %11017 = vmatprep.subr.mxu1 %v12319_v0 }
 0x34b   :  { %10984 = vmatprep.subr.mxu0 %v12319_v0  ;;  %11018 = vmatpush3.msra.mxu1 %v12440_v42 }
 0x34c   :  { %10985 = vmatpush3.msra.mxu0 %v12454_v47  ;;  %11019 = vmatprep.subr.mxu1 %v12319_v0 }
 0x34d   :  { %10986 = vmatprep.subr.mxu0 %v12319_v0  ;;  %11020 = vmatpush3.msra.mxu1 %v12450_v45 }
 0x34e   :  { %10987 = vmatpush3.msra.mxu0 %v12465_v50  ;;  %11021 = vmatprep.subr.mxu1 %v12319_v0 }
 0x34f   :  { %10988 = vmatprep.subr.mxu0 %v12319_v0  ;;  %10990 = vmatprep.mubr.msk.f32.mxu0 %vm12320_vm1, %v12319_v0 }
 0x350   :  { %10989 = vmatpush3.msra.mxu0 %v12476_v53  ;;  %11022 = vmatpush3.msra.mxu1 %v12461_v49 }
 0x351   :  { %11023 = vmatprep.mubr.msk.f32.mxu1 %vm12320_vm1, %v12319_v0  ;;  %10991 = vmatmul.mubr.f32.vlgmr.msra.gmra.mxu0 %v1808_v52 }
 0x352   :  { %11004 = vmatprep.subr.mxu0 %v12319_v0  ;;  %11024 = vmatmul.mubr.f32.vlgmr.msra.gmra.mxu1 %v1807_v46 }
 0x353   :  { %11005 = vmatpush3.msra.mxu0 %v12459_v48  ;;  %11037 = vmatprep.subr.mxu1 %v12319_v0 }
 0x354   :  { %11006 = vmatprep.subr.mxu0 %v12319_v0  ;;  %11038 = vmatpush3.msra.mxu1 %v12608_v18 }
 0x355   :  { %11007 = vmatpush3.msra.mxu0 %v12469_v51  ;;  %11039 = vmatprep.subr.mxu1 %v12319_v0 }
 0x356   :  { %11008 = vmatprep.subr.mxu0 %v12319_v0  ;;  %11012 = vmatprep.mubr.msk.f32.mxu0 %vm12320_vm1, %v12319_v0 }
 0x357   :  { %11009 = vmatpush3.msra.mxu0 %v12480_v54  ;;  %11040 = vmatpush3.msra.mxu1 %v12617_v20  ;;  %v1730_v20 = vld [vmem:[#allocation2 + $0x10] sm:$0xc] }
 0x358   :  { %11010 = vmatprep.subr.mxu0 %v12319_v0  ;;  %11041 = vmatprep.subr.mxu1 %v12319_v0 }
 0x359   :  { %11011 = vmatpush3.msra.mxu0 %v12493_v57  ;;  %11042 = vmatpush3.msra.mxu1 %v12625_v22 }
 0x35a   :  { %11013 = vmatmul.mubr.f32.vlgmr.msra.gmra.mxu0 %v1807_v46  ;;  %11043 = vmatprep.subr.mxu1 %v12319_v0 }
 0x35b   :  { %11044 = vmatpush3.msra.mxu1 %v12633_v23  ;;  %11026 = vmatprep.subr.mxu0 %v12319_v0 }
 0x35c   :  { %11045 = vmatprep.mubr.msk.f32.mxu1 %vm12320_vm1, %v12319_v0  ;;  %11059 = vmatprep.subr.mxu1 %v12319_v0 }
 0x35d   :  { %11027 = vmatpush3.msra.mxu0 %v12537_v2  ;;  %11034 = vmatprep.mubr.msk.f32.mxu0 %vm12320_vm1, %v12319_v0 }
 0x35e   :  { %v2233_v41 = vpop.permute.xlu1 %2232  ;;  %11028 = vmatprep.subr.mxu0 %v12319_v0 }
 0x35f   :  { %v2234_v42 = vsel %vm687_vm2, %v2233_v41, 0  ;;  %11029 = vmatpush3.msra.mxu0 %v12543_v4 }
 0x360   :  { %v2305_v44 = vand.u32 4294901760, %v2234_v42  ;;  %11030 = vmatprep.subr.mxu0 %v12319_v0 }
 0x361   :  { %11031 = vmatpush3.msra.mxu0 %v12553_v6 }
 0x362   :  { %v2306_v45 = vsub.f32 %v2234_v42, %v2305_v44  ;;  %11046 = vmatmul.mubr.f32.vlgmr.msra.gmra.mxu1 %v2305_v44  ;;  %11032 = vmatprep.subr.mxu0 %v12319_v0  ;;  %v2733_v42 = vrot.slane %v12717_v29, 6  ;;  %v2796_v29 = vld [vmem:[#allocation10 + $0x18] sm:$0xff] }
 0x363   :  { %11060 = vmatpush3.msra.mxu1 %v12537_v2  ;;  %11033 = vmatpush3.msra.mxu0 %v12565_v9 }
 0x364   :  { %v2307_v47 = vand.u32 4294901760, %v2306_v45  ;;  %11061 = vmatprep.subr.mxu1 %v12319_v0  ;;  %11067 = vmatprep.mubr.msk.f32.mxu1 %vm12320_vm1, %v12319_v0 }
 0x365   :  { %11062 = vmatpush3.msra.mxu1 %v12543_v4  ;;  %11048 = vmatprep.subr.mxu0 %v12319_v0 }
 0x366   :  { %v2308_v48 = vsub.f32 %v2306_v45, %v2307_v47  ;;  %11063 = vmatprep.subr.mxu1 %v12319_v0 }
 0x367   :  { %11064 = vmatpush3.msra.mxu1 %v12553_v6 }
 0x368   :  { %v2309_v49 = vand.u32 4294901760, %v2308_v48  ;;  %11065 = vmatprep.subr.mxu1 %v12319_v0 }
 0x369   :  { %11066 = vmatpush3.msra.mxu1 %v12565_v9 }
 0x36a   :  { %11068 = vmatmul.mubr.f32.vlgmr.msra.gmra.mxu1 %v2307_v47  ;;  %11081 = vmatprep.subr.mxu1 %v12319_v0 }
 0x36b   :  { %11035 = vmatmul.mubr.f32.vlgmr.msra.gmra.mxu0 %v2309_v49  ;;  %11082 = vmatpush3.msra.mxu1 %v12537_v2  ;;  %v2760_v49 = vrot.slane %v12721_v33, 2 }
 0x36c   :  { %11049 = vmatpush3.msra.mxu0 %v12551_v5  ;;  %11083 = vmatprep.subr.mxu1 %v12319_v0 }
 0x36d   :  { %11050 = vmatprep.subr.mxu0 %v12319_v0  ;;  %11084 = vmatpush3.msra.mxu1 %v12543_v4 }
 0x36e   :  { %11051 = vmatpush3.msra.mxu0 %v12560_v8  ;;  %11085 = vmatprep.subr.mxu1 %v12319_v0 }
 0x36f   :  { %11052 = vmatprep.subr.mxu0 %v12319_v0  ;;  %11086 = vmatpush3.msra.mxu1 %v12553_v6 }
 0x370   :  { %11053 = vmatpush3.msra.mxu0 %v12573_v11  ;;  %11087 = vmatprep.subr.mxu1 %v12319_v0 }
 0x371   :  { %11054 = vmatprep.subr.mxu0 %v12319_v0  ;;  %11056 = vmatprep.mubr.msk.f32.mxu0 %vm12320_vm1, %v12319_v0 }
 0x372   :  { %11055 = vmatpush3.msra.mxu0 %v12585_v13  ;;  %11088 = vmatpush3.msra.mxu1 %v12565_v9 }
 0x373   :  { %11089 = vmatprep.mubr.msk.f32.mxu1 %vm12320_vm1, %v12319_v0  ;;  %11057 = vmatmul.mubr.f32.vlgmr.msra.gmra.mxu0 %v2306_v45 }
 0x374   :  { %11070 = vmatprep.subr.mxu0 %v12319_v0  ;;  %11090 = vmatmul.mubr.f32.vlgmr.msra.gmra.mxu1 %v2305_v44 }
 0x375   :  { %11071 = vmatpush3.msra.mxu0 %v12570_v10  ;;  %11078 = vmatprep.mubr.msk.f32.mxu0 %vm12320_vm1, %v12319_v0 }
 0x376   :  { %11072 = vmatprep.subr.mxu0 %v12319_v0  ;;  %11103 = vmatprep.subr.mxu1 %v12319_v0 }
 0x377   :  { %11073 = vmatpush3.msra.mxu0 %v12580_v12  ;;  %11111 = vmatprep.mubr.msk.f32.mxu1 %vm12320_vm1, %v12319_v0 }
 0x378   :  { %11074 = vmatprep.subr.mxu0 %v12319_v0 }
 0x379   :  { %11075 = vmatpush3.msra.mxu0 %v12592_v15 }
 0x37a   :  { %11076 = vmatprep.subr.mxu0 %v12319_v0 }
 0x37b   :  { %11077 = vmatpush3.msra.mxu0 %v12604_v17 }
 0x37c   :  { %11079 = vmatmul.mubr.f32.vlgmr.msra.gmra.mxu0 %v2305_v44  ;;  %11092 = vmatprep.subr.mxu0 %v12319_v0 }
 0x37d   :  { %11100 = vmatprep.mubr.msk.f32.mxu0 %vm12320_vm1, %v12319_v0 }
 0x400   :  { %v1904_v50 = vpop.f32.mrf.mxu1 }
 0x402   :  { %v10981_v51 = vpop.f32.mrf.mxu1 }
 0x408   :  { %v2061_v53 = vpop.f32.mrf.mxu1 }
 0x409   :  { %v1813_v54 = vpop.f32.mrf.mxu0 }
 0x40a   :  { %v11003_v57 = vpop.f32.mrf.mxu1  ;;  %v1905_v6 = vadd.f32 %v1904_v50, %v1813_v54  ;;  %v2795_v54 = vld [vmem:[#allocation10 + $0x10] sm:$0xff] }
 0x40b   :  { %v10970_v2 = vpop.f32.mrf.mxu0  ;;  %v2794_v57 = vld [vmem:[#allocation10 + $0x8] sm:$0xff] }
 0x40c   :  { %v12858_v2 = vand.u32 4294901760, %v2796_v29 }
 0x40e   :  { %11093 = vmatpush3.msra.mxu0 %v12858_v2 }
 0x40f   :  { %11094 = vmatprep.subr.mxu0 %v12319_v0 }
 0x411   :  { %v1984_v4 = vpop.f32.mrf.mxu0 }
 0x412   :  { %v2219_v5 = vpop.f32.mrf.mxu1  ;;  %v1985_v10 = vadd.f32 %v1984_v4, %v1905_v6  ;;  %v12860_v4 = vand.u32 4294901760, %v2795_v54  ;;  %v12865_v6 = vsub.f32 %v2796_v29, %v12858_v2 }
 0x413   :  { %v10992_v8 = vpop.f32.mrf.mxu0 }
 0x414   :  { %v11025_v9 = vpop.f32.mrf.mxu1  ;;  %v2062_v11 = vadd.f32 %v2061_v53, %v1985_v10  ;;  %v12868_v33 = vsub.f32 %v2795_v54, %v12860_v4  ;;  %11095 = vmatpush3.msra.mxu0 %v12860_v4 }
 0x415   :  { %v12876_v9 = vand.u32 4294901760, %v12865_v6  ;;  %11096 = vmatprep.subr.mxu0 %v12319_v0 }
 0x416   :  { %v12879_v10 = vand.u32 4294901760, %v12868_v33 }
 0x41a   :  { %v2144_v12 = vpop.f32.mrf.mxu0 }
 0x41b   :  { %v2145_v13 = vadd.f32 %v2144_v12, %v2062_v11  ;;  %v2909_v12 = vsub.f32 %v12865_v6, %v12876_v9 }
 0x41c   :  { %v11014_v15 = vpop.f32.mrf.mxu0 }
 0x41d   :  { %v2220_v17 = vadd.f32 %v2219_v5, %v2145_v13  ;;  %v12862_v5 = vand.u32 4294901760, %v2794_v57  ;;  %v2916_v13 = vsub.f32 %v12868_v33, %v12879_v10 }
 0x41f   :  { %v2224_v18 = vrot.slane %v2220_v17, 6  ;;  %v12871_v8 = vsub.f32 %v2794_v57, %v12862_v5  ;;  %11097 = vmatpush3.msra.mxu0 %v12862_v5 }
 0x420   :  { %11098 = vmatprep.subr.mxu0 %v12319_v0 }
 0x421   :  { %v2226_v22 = vadd.f32 %v2224_v18, %v1730_v20  ;;  %v12882_v11 = vand.u32 4294901760, %v12871_v8  ;;  %v12895_v18 = vand.u32 4294901760, %v2909_v12  ;;  %v12897_v20 = vand.u32 4294901760, %v2916_v13 }
 0x422   :  { %v2402_v23 = vpop.f32.mrf.mxu1 }
 0x423   :  { %12047 = vtanh.f32 %v2226_v22  ;;  %v10261_v35 = vmul.f32 -1.442695, %v2226_v22  ;;  %v2923_v15 = vsub.f32 %v12871_v8, %v12882_v11  ;;  %11104 = vmatpush3.msra.mxu1 %v12895_v18 }
 0x424   :  { %v11047_v59 = vpop.f32.mrf.mxu1  ;;  %11105 = vmatprep.subr.mxu1 %v12319_v0 }
 0x425   :  { %v12900_v22 = vand.u32 4294901760, %v2923_v15  ;;  %11106 = vmatpush3.msra.mxu1 %v12897_v20 }
 0x426   :  { %11107 = vmatprep.subr.mxu1 %v12319_v0 }
 0x427   :  { %11108 = vmatpush3.msra.mxu1 %v12900_v22 }
 0x428   :  { %11109 = vmatprep.subr.mxu1 %v12319_v0 }
 0x42a   :  { %v2559_v60 = vpop.f32.mrf.mxu1 }
 0x42b   :  { %v2311_v61 = vpop.f32.mrf.mxu0 }
 0x42c   :  { %v11069_v62 = vpop.f32.mrf.mxu1  ;;  %v2403_v14 = vadd.f32 %v2402_v23, %v2311_v61  ;;  %v2793_v23 = vld [vmem:[#allocation10] sm:$0xff] }
 0x42d   :  { %v11036_v63 = vpop.f32.mrf.mxu0  ;;  %v12907_v59 = vand.u32 4294901760, %v2793_v23 }
 0x42f   :  { %11099 = vmatpush3.msra.mxu0 %v12907_v59 }
 0x430   :  { %v12048_v1 = vpop.eup %12047  ;;  %11114 = vmatprep.subr.mxu0 %v12319_v0 }
 0x431   :  { %2737 = vrot.lane.b32.xlu0 %v12048_v1, %s12321_s2 }
 0x433   :  { %v2482_v3 = vpop.f32.mrf.mxu0 }
 0x434   :  { %v2717_v7 = vpop.f32.mrf.mxu1  ;;  %v2483_v21 = vadd.f32 %v2482_v3, %v2403_v14 }
 0x435   :  { %v11058_v16 = vpop.f32.mrf.mxu0 }
 0x436   :  { %v11091_v19 = vpop.f32.mrf.mxu1  ;;  %v2560_v24 = vadd.f32 %v2559_v60, %v2483_v21  ;;  %v12910_v60 = vsub.f32 %v2793_v23, %v12907_v59 }
 0x438   :  { %v12915_v61 = vand.u32 4294901760, %v12910_v60 }
 0x43a   :  { %v2930_v62 = vsub.f32 %v12910_v60, %v12915_v61 }
 0x43c   :  { %v2642_v25 = vpop.f32.mrf.mxu0  ;;  %v12919_v63 = vand.u32 4294901760, %v2930_v62 }
 0x43d   :  { %v2643_v26 = vadd.f32 %v2642_v25, %v2560_v24  ;;  %v3294_v25 = vld [vmem:[#allocation11 + $0x18] sm:$0xff] }
 0x43e   :  { %v11080_v27 = vpop.f32.mrf.mxu0  ;;  %11110 = vmatpush3.msra.mxu1 %v12919_v63 }
 0x43f   :  { %v2718_v28 = vadd.f32 %v2717_v7, %v2643_v26  ;;  %11125 = vmatprep.subr.mxu1 %v12319_v0 }
 0x441   :  { %v2722_v30 = vrot.slane %v2718_v28, 4  ;;  %v12938_v28 = vand.u32 4294901760, %v3294_v25 }
 0x443   :  { %v2724_v32 = vadd.f32 %v2722_v30, %v1731_v31  ;;  %v3293_v30 = vld [vmem:[#allocation11 + $0x10] sm:$0xff] }
 0x445   :  { %12049 = vtanh.f32 %v2724_v32  ;;  %v10262_v39 = vmul.f32 -1.442695, %v2724_v32  ;;  %v3292_v32 = vld [vmem:[#allocation11 + $0x8] sm:$0xff] }
 0x446   :  { %12051 = vpow2.f32 %v10261_v35 }
 0x452   :  { %v12050_v34 = vpop.eup %12049 }
 0x453   :  { %2764 = vrot.lane.b32.xlu1 %v12050_v34, %s12321_s2  ;;  %v12052_v36 = vpop.eup %12051  ;;  %v12945_v34 = vand.u32 4294901760, %v3293_v30 }
 0x454   :  { %v2728_v37 = vadd.f32 1.0, %v12052_v36  ;;  %v12949_v36 = vsub.f32 %v3294_v25, %v12938_v28 }
 0x456   :  { %12053 = vrcp.f32 %v2728_v37  ;;  %v3291_v37 = vld [vmem:[#allocation11] sm:$0xff] }
 0x457   :  { %12055 = vpow2.f32 %v10262_v39  ;;  %v12952_v39 = vand.u32 4294901760, %v3292_v32 }
 0x463   :  { %v12839_v40 = vpop.eup %12053 }
 0x464   :  { %v12056_v52 = vpop.eup %12055  ;;  %v2735_v44 = vmul.f32 %v12839_v40, %v2733_v42 }
 0x465   :  { %v2755_v55 = vadd.f32 1.0, %v12056_v52  ;;  %v12963_v52 = vand.u32 4294901760, %v12949_v36 }
 0x467   :  { %12057 = vrcp.f32 %v2755_v55  ;;  %v12967_v55 = vsub.f32 %v3292_v32, %v12952_v39 }
 0x469   :  { %v12986_v42 = vand.u32 4294901760, %v12967_v55 }
 0x474   :  { %v12843_v56 = vpop.eup %12057 }
 0x475   :  { %v2762_v50 = vmul.f32 %v12843_v56, %v2760_v49  ;;  %v3421_v49 = vsub.f32 %v12967_v55, %v12986_v42 }
 0x477   :  { %v13018_v29 = vand.u32 4294901760, %v3421_v49 }
 0x4a3   :  { %v2738_v43 = vpop.permute.xlu0 %2737 }
 0x4a4   :  { %v2740_v46 = vmul.f32 %v12839_v40, %v2738_v43  ;;  %v12957_v43 = vsub.f32 %v3293_v30, %v12945_v34 }
 0x4a6   :  { %2742 = vrot.lane.b32.xlu0 %v2740_v46, %s12322_s13  ;;  %v12959_v46 = vand.u32 4294901760, %v3291_v37 }
 0x4c5   :  { %v2765_v58 = vpop.permute.xlu1 %2764 }
 0x4c6   :  { %v2767_v41 = vmul.f32 %v12843_v56, %v2765_v58  ;;  %v12977_v58 = vsub.f32 %v3291_v37, %v12959_v46 }
 0x4c8   :  { %2769 = vrot.lane.b32.xlu1 %v2767_v41, %s12322_s13  ;;  %v3407_v41 = vsub.f32 %v12949_v36, %v12963_v52 }
 0x518   :  { %v2743_v45 = vpop.permute.xlu0 %2742 }
 0x519   :  { %v12849_v47 = vadd.f32 %v2743_v45, %v2735_v44  ;;  %v12996_v45 = vand.u32 4294901760, %v12977_v58 }
 0x51b   :  { %12059 = vtanh.f32 %v12849_v47 }
 0x528   :  { %v12060_v48 = vpop.eup %12059 }
 0x529   :  { %2748 = vrot.lane.b32.xlu0 %v12060_v48, %s12321_s2  ;;  %v13000_v48 = vand.u32 4294901760, %v3407_v41 }
 0x53a   :  { %v2770_v51 = vpop.permute.xlu1 %2769 }
 0x53b   :  { %v12855_v53 = vadd.f32 %v2770_v51, %v2762_v50  ;;  %v3428_v51 = vsub.f32 %v12977_v58, %v12996_v45 }
 0x53d   :  { %12061 = vtanh.f32 %v12855_v53  ;;  %v13025_v54 = vand.u32 4294901760, %v3428_v51 }
 0x54a   :  { %v12062_v17 = vpop.eup %12061 }
 0x54b   :  { %2775 = vrot.lane.b32.xlu1 %v12062_v17, %s12321_s2 }
 0x59b   :  { %v2749_v1 = vpop.permute.xlu0 %2748 }
 0x59c   :  { %v12924_v3 = vmul.f32 %v12839_v40, %v2749_v1 }
 0x59e   :  { %v2797_v7 = vrot.slane %v12924_v3, 2 }
 0x5a0   :  { %2798 = vrot.lane.b32.xlu0 %v2797_v7, %s12322_s13 }
 0x5bd   :  { %v2776_v14 = vpop.permute.xlu1 %2775 }
 0x5be   :  { %v12929_v16 = vmul.f32 %v12843_v56, %v2776_v14  ;;  %v12974_v56 = vand.u32 4294901760, %v12957_v43 }
 0x5c0   :  { %v3295_v19 = vrot.slane %v12929_v16, 4  ;;  %v3414_v44 = vsub.f32 %v12957_v43, %v12974_v56 }
 0x5c2   :  { %3296 = vrot.lane.b32.xlu1 %v3295_v19, %s12322_s13  ;;  %v13010_v50 = vand.u32 4294901760, %v3414_v44 }
 0x612   :  { %v2799_v21 = vpop.permute.xlu0 %2798 }
 0x613   :  { %v2800_v24 = vsel %vm687_vm2, %v2799_v21, 0 }
 0x614   :  { %v12934_v26 = vand.u32 4294901760, %v2800_v24 }
 0x616   :  { %v2872_v27 = vsub.f32 %v2800_v24, %v12934_v26  ;;  %11112 = vmatmul.mubr.f32.vlgmr.msra.gmra.mxu1 %v12934_v26 }
 0x617   :  { %11126 = vmatpush3.msra.mxu1 %v12858_v2  ;;  %11133 = vmatprep.mubr.msk.f32.mxu1 %vm12320_vm1, %v12319_v0 }
 0x618   :  { %v2873_v31 = vand.u32 4294901760, %v2872_v27  ;;  %11127 = vmatprep.subr.mxu1 %v12319_v0 }
 0x619   :  { %11128 = vmatpush3.msra.mxu1 %v12860_v4 }
 0x61a   :  { %v2874_v35 = vsub.f32 %v2872_v27, %v2873_v31  ;;  %11129 = vmatprep.subr.mxu1 %v12319_v0 }
 0x61b   :  { %11130 = vmatpush3.msra.mxu1 %v12862_v5 }
 0x61c   :  { %v2875_v40 = vand.u32 4294901760, %v2874_v35  ;;  %11131 = vmatprep.subr.mxu1 %v12319_v0 }
 0x61d   :  { %11132 = vmatpush3.msra.mxu1 %v12907_v59 }
 0x61e   :  { %11134 = vmatmul.mubr.f32.vlgmr.msra.gmra.mxu1 %v2873_v31  ;;  %11147 = vmatprep.subr.mxu1 %v12319_v0 }
 0x61f   :  { %11101 = vmatmul.mubr.f32.vlgmr.msra.gmra.mxu0 %v2875_v40  ;;  %11148 = vmatpush3.msra.mxu1 %v12858_v2  ;;  %v2791_v40 = vld [vmem:[#allocation2 + $0x10] sm:$0x30] }
 0x620   :  { %11115 = vmatpush3.msra.mxu0 %v12865_v6  ;;  %11149 = vmatprep.subr.mxu1 %v12319_v0 }
 0x621   :  { %11116 = vmatprep.subr.mxu0 %v12319_v0  ;;  %11150 = vmatpush3.msra.mxu1 %v12860_v4 }
 0x622   :  { %11117 = vmatpush3.msra.mxu0 %v12868_v33  ;;  %11151 = vmatprep.subr.mxu1 %v12319_v0 }
 0x623   :  { %11118 = vmatprep.subr.mxu0 %v12319_v0  ;;  %11152 = vmatpush3.msra.mxu1 %v12862_v5 }
 0x624   :  { %11119 = vmatpush3.msra.mxu0 %v12871_v8  ;;  %11153 = vmatprep.subr.mxu1 %v12319_v0 }
 0x625   :  { %11120 = vmatprep.subr.mxu0 %v12319_v0  ;;  %11122 = vmatprep.mubr.msk.f32.mxu0 %vm12320_vm1, %v12319_v0 }
 0x626   :  { %11121 = vmatpush3.msra.mxu0 %v12910_v60  ;;  %11154 = vmatpush3.msra.mxu1 %v12907_v59 }
 0x627   :  { %11155 = vmatprep.mubr.msk.f32.mxu1 %vm12320_vm1, %v12319_v0  ;;  %11123 = vmatmul.mubr.f32.vlgmr.msra.gmra.mxu0 %v2872_v27 }
 0x628   :  { %11136 = vmatprep.subr.mxu0 %v12319_v0  ;;  %11156 = vmatmul.mubr.f32.vlgmr.msra.gmra.mxu1 %v12934_v26 }
 0x629   :  { %11137 = vmatpush3.msra.mxu0 %v12876_v9  ;;  %11169 = vmatprep.subr.mxu1 %v12319_v0 }
 0x62a   :  { %11138 = vmatprep.subr.mxu0 %v12319_v0  ;;  %11170 = vmatpush3.msra.mxu1 %v13000_v48 }
 0x62b   :  { %11139 = vmatpush3.msra.mxu0 %v12879_v10  ;;  %11171 = vmatprep.subr.mxu1 %v12319_v0 }
 0x62c   :  { %11140 = vmatprep.subr.mxu0 %v12319_v0  ;;  %11144 = vmatprep.mubr.msk.f32.mxu0 %vm12320_vm1, %v12319_v0 }
 0x62d   :  { %11141 = vmatpush3.msra.mxu0 %v12882_v11  ;;  %11172 = vmatpush3.msra.mxu1 %v13010_v50 }
 0x62e   :  { %11142 = vmatprep.subr.mxu0 %v12319_v0  ;;  %11173 = vmatprep.subr.mxu1 %v12319_v0 }
 0x62f   :  { %11143 = vmatpush3.msra.mxu0 %v12915_v61  ;;  %11174 = vmatpush3.msra.mxu1 %v13018_v29 }
 0x630   :  { %11145 = vmatmul.mubr.f32.vlgmr.msra.gmra.mxu0 %v12934_v26  ;;  %11175 = vmatprep.subr.mxu1 %v12319_v0 }
 0x631   :  { %11176 = vmatpush3.msra.mxu1 %v13025_v54  ;;  %11158 = vmatprep.subr.mxu0 %v12319_v0 }
 0x632   :  { %11177 = vmatprep.mubr.msk.f32.mxu1 %vm12320_vm1, %v12319_v0  ;;  %11191 = vmatprep.subr.mxu1 %v12319_v0 }
 0x633   :  { %11159 = vmatpush3.msra.mxu0 %v12938_v28  ;;  %11166 = vmatprep.mubr.msk.f32.mxu0 %vm12320_vm1, %v12319_v0 }
 0x634   :  { %v3297_v57 = vpop.permute.xlu1 %3296  ;;  %11160 = vmatprep.subr.mxu0 %v12319_v0 }
 0x635   :  { %v3298_v12 = vsel %vm687_vm2, %v3297_v57, 0  ;;  %11161 = vmatpush3.msra.mxu0 %v12945_v34 }
 0x636   :  { %v3369_v13 = vand.u32 4294901760, %v3298_v12  ;;  %11162 = vmatprep.subr.mxu0 %v12319_v0 }
 0x637   :  { %11163 = vmatpush3.msra.mxu0 %v12952_v39 }
 0x638   :  { %v3370_v15 = vsub.f32 %v3298_v12, %v3369_v13  ;;  %11178 = vmatmul.mubr.f32.vlgmr.msra.gmra.mxu1 %v3369_v13  ;;  %11164 = vmatprep.subr.mxu0 %v12319_v0 }
 0x639   :  { %11192 = vmatpush3.msra.mxu1 %v12938_v28  ;;  %11165 = vmatpush3.msra.mxu0 %v12959_v46 }
 0x63a   :  { %v3371_v17 = vand.u32 4294901760, %v3370_v15  ;;  %11193 = vmatprep.subr.mxu1 %v12319_v0  ;;  %11199 = vmatprep.mubr.msk.f32.mxu1 %vm12320_vm1, %v12319_v0 }
 0x63b   :  { %11194 = vmatpush3.msra.mxu1 %v12945_v34  ;;  %11180 = vmatprep.subr.mxu0 %v12319_v0 }
 0x63c   :  { %v3372_v23 = vsub.f32 %v3370_v15, %v3371_v17  ;;  %11195 = vmatprep.subr.mxu1 %v12319_v0 }
 0x63d   :  { %11196 = vmatpush3.msra.mxu1 %v12952_v39 }
 0x63e   :  { %v3373_v62 = vand.u32 4294901760, %v3372_v23  ;;  %11197 = vmatprep.subr.mxu1 %v12319_v0 }
 0x63f   :  { %11198 = vmatpush3.msra.mxu1 %v12959_v46 }
 0x640   :  { %11200 = vmatmul.mubr.f32.vlgmr.msra.gmra.mxu1 %v3371_v17  ;;  %11213 = vmatprep.subr.mxu1 %v12319_v0 }
 0x641   :  { %11167 = vmatmul.mubr.f32.vlgmr.msra.gmra.mxu0 %v3373_v62  ;;  %11214 = vmatpush3.msra.mxu1 %v12938_v28 }
 0x642   :  { %11181 = vmatpush3.msra.mxu0 %v12949_v36  ;;  %11215 = vmatprep.subr.mxu1 %v12319_v0 }
 0x643   :  { %11182 = vmatprep.subr.mxu0 %v12319_v0  ;;  %11216 = vmatpush3.msra.mxu1 %v12945_v34 }
 0x644   :  { %11183 = vmatpush3.msra.mxu0 %v12957_v43  ;;  %11217 = vmatprep.subr.mxu1 %v12319_v0 }
 0x645   :  { %11184 = vmatprep.subr.mxu0 %v12319_v0  ;;  %11218 = vmatpush3.msra.mxu1 %v12952_v39 }
 0x646   :  { %11185 = vmatpush3.msra.mxu0 %v12967_v55  ;;  %11219 = vmatprep.subr.mxu1 %v12319_v0 }
 0x647   :  { %11186 = vmatprep.subr.mxu0 %v12319_v0  ;;  %11188 = vmatprep.mubr.msk.f32.mxu0 %vm12320_vm1, %v12319_v0 }
 0x648   :  { %11187 = vmatpush3.msra.mxu0 %v12977_v58  ;;  %11220 = vmatpush3.msra.mxu1 %v12959_v46 }
 0x649   :  { %11221 = vmatprep.mubr.msk.f32.mxu1 %vm12320_vm1, %v12319_v0  ;;  %11189 = vmatmul.mubr.f32.vlgmr.msra.gmra.mxu0 %v3370_v15 }
 0x64a   :  { %11202 = vmatprep.subr.mxu0 %v12319_v0  ;;  %11222 = vmatmul.mubr.f32.vlgmr.msra.gmra.mxu1 %v3369_v13 }
 0x64b   :  { %11203 = vmatpush3.msra.mxu0 %v12963_v52  ;;  %11210 = vmatprep.mubr.msk.f32.mxu0 %vm12320_vm1, %v12319_v0 }
 0x64c   :  { %11204 = vmatprep.subr.mxu0 %v12319_v0  ;;  %11235 = vmatprep.subr.mxu1 %v12319_v0 }
 0x64d   :  { %11205 = vmatpush3.msra.mxu0 %v12974_v56  ;;  %11236 = vmatpush3.msra.mxu1 %v12895_v18 }
 0x64e   :  { %11206 = vmatprep.subr.mxu0 %v12319_v0  ;;  %11237 = vmatprep.subr.mxu1 %v12319_v0 }
 0x64f   :  { %11207 = vmatpush3.msra.mxu0 %v12986_v42  ;;  %11238 = vmatpush3.msra.mxu1 %v12897_v20 }
 0x650   :  { %11208 = vmatprep.subr.mxu0 %v12319_v0  ;;  %11239 = vmatprep.subr.mxu1 %v12319_v0 }
 0x651   :  { %11209 = vmatpush3.msra.mxu0 %v12996_v45  ;;  %11240 = vmatpush3.msra.mxu1 %v12900_v22 }
 0x652   :  { %11211 = vmatmul.mubr.f32.vlgmr.msra.gmra.mxu0 %v3369_v13  ;;  %11241 = vmatprep.subr.mxu1 %v12319_v0 }
 0x653   :  { %11242 = vmatpush3.msra.mxu1 %v12919_v63  ;;  %11224 = vmatprep.subr.mxu0 %v12319_v0 }
 0x654   :  { %11243 = vmatprep.mubr.msk.f32.mxu1 %vm12320_vm1, %v12319_v0  ;;  %11257 = vmatprep.subr.mxu1 %v12319_v0 }
 0x655   :  { %11225 = vmatpush3.msra.mxu0 %v12858_v2  ;;  %11232 = vmatprep.mubr.msk.f32.mxu0 %vm12320_vm1, %v12319_v0 }
 0x656   :  { %11226 = vmatprep.subr.mxu0 %v12319_v0 }
 0x657   :  { %11227 = vmatpush3.msra.mxu0 %v12860_v4 }
 0x658   :  { %11228 = vmatprep.subr.mxu0 %v12319_v0 }
 0x659   :  { %11229 = vmatpush3.msra.mxu0 %v12862_v5 }
 0x65a   :  { %11230 = vmatprep.subr.mxu0 %v12319_v0 }
 0x65b   :  { %11231 = vmatpush3.msra.mxu0 %v12907_v59 }
 0x65c   :  { %11246 = vmatprep.subr.mxu0 %v12319_v0 }
 0x6d6   :  { %v2968_v18 = vpop.f32.mrf.mxu1 }
 0x6d8   :  { %v11113_v20 = vpop.f32.mrf.mxu1 }
 0x6de   :  { %v3125_v22 = vpop.f32.mrf.mxu1 }
 0x6df   :  { %v2877_v63 = vpop.f32.mrf.mxu0 }
 0x6e0   :  { %v11135_v1 = vpop.f32.mrf.mxu1  ;;  %v2969_v21 = vadd.f32 %v2968_v18, %v2877_v63 }
 0x6e1   :  { %v11102_v7 = vpop.f32.mrf.mxu0 }
 0x6e7   :  { %v3048_v14 = vpop.f32.mrf.mxu0 }
 0x6e8   :  { %v3283_v19 = vpop.f32.mrf.mxu1  ;;  %v3049_v26 = vadd.f32 %v3048_v14, %v2969_v21 }
 0x6e9   :  { %v11124_v24 = vpop.f32.mrf.mxu0 }
 0x6ea   :  { %v11157_v25 = vpop.f32.mrf.mxu1  ;;  %v3126_v27 = vadd.f32 %v3125_v22, %v3049_v26  ;;  %v2792_v24 = vld [vmem:[#allocation2 + $0x8] sm:$0xc] }
 0x6f0   :  { %v3208_v30 = vpop.f32.mrf.mxu0 }
 0x6f1   :  { %v3209_v31 = vadd.f32 %v3208_v30, %v3126_v27 }
 0x6f2   :  { %v11146_v32 = vpop.f32.mrf.mxu0 }
 0x6f3   :  { %v3284_v35 = vadd.f32 %v3283_v19, %v3209_v31 }
 0x6f5   :  { %v3288_v37 = vrot.slane %v3284_v35, 4 }
 0x6f7   :  { %v3290_v41 = vadd.f32 %v3288_v37, %v2791_v40 }
 0x6f8   :  { %v3466_v44 = vpop.f32.mrf.mxu1 }
 0x6f9   :  { %12063 = vtanh.f32 %v3290_v41  ;;  %v10263_v27 = vmul.f32 -1.442695, %v3290_v41  ;;  %v3797_v41 = vrot.slane %v12849_v47, 6 }
 0x6fa   :  { %v11179_v49 = vpop.f32.mrf.mxu1 }
 0x700   :  { %v3623_v51 = vpop.f32.mrf.mxu1 }
 0x701   :  { %v3375_v57 = vpop.f32.mrf.mxu0 }
 0x702   :  { %v11201_v12 = vpop.f32.mrf.mxu1  ;;  %v3467_v62 = vadd.f32 %v3466_v44, %v3375_v57 }
 0x703   :  { %v11168_v13 = vpop.f32.mrf.mxu0 }
 0x706   :  { %v12064_v15 = vpop.eup %12063 }
 0x707   :  { %3801 = vrot.lane.b32.xlu0 %v12064_v15, %s12321_s2 }
 0x709   :  { %v3546_v17 = vpop.f32.mrf.mxu0 }
 0x70a   :  { %v3781_v23 = vpop.f32.mrf.mxu1  ;;  %v3547_v22 = vadd.f32 %v3546_v17, %v3467_v62  ;;  %v3824_v62 = vrot.slane %v12855_v53, 2 }
 0x70b   :  { %v11190_v18 = vpop.f32.mrf.mxu0 }
 0x70c   :  { %v11223_v20 = vpop.f32.mrf.mxu1  ;;  %v3624_v63 = vadd.f32 %v3623_v51, %v3547_v22 }
 0x712   :  { %v3706_v1 = vpop.f32.mrf.mxu0 }
 0x713   :  { %v3707_v7 = vadd.f32 %v3706_v1, %v3624_v63 }
 0x714   :  { %v11212_v14 = vpop.f32.mrf.mxu0 }
 0x715   :  { %v3782_v19 = vadd.f32 %v3781_v23, %v3707_v7 }
 0x717   :  { %v3786_v21 = vrot.slane %v3782_v19, 6 }
 0x719   :  { %v3788_v25 = vadd.f32 %v3786_v21, %v2792_v24 }
 0x71b   :  { %12065 = vtanh.f32 %v3788_v25  ;;  %v10264_v32 = vmul.f32 -1.442695, %v3788_v25 }
 0x71c   :  { %12067 = vpow2.f32 %v10263_v27 }
 0x728   :  { %v12066_v26 = vpop.eup %12065 }
 0x729   :  { %3828 = vrot.lane.b32.xlu1 %v12066_v26, %s12321_s2  ;;  %v12068_v30 = vpop.eup %12067 }
 0x72a   :  { %v3792_v31 = vadd.f32 1.0, %v12068_v30 }
 0x72c   :  { %12069 = vrcp.f32 %v3792_v31 }
 0x72d   :  { %12071 = vpow2.f32 %v10264_v32 }
 0x739   :  { %v12070_v35 = vpop.eup %12069 }
 0x73a   :  { %v12072_v44 = vpop.eup %12071  ;;  %v3799_v13 = vmul.f32 %v12070_v35, %v3797_v41 }
 0x73b   :  { %v3819_v49 = vadd.f32 1.0, %v12072_v44 }
 0x73d   :  { %12073 = vrcp.f32 %v3819_v49 }
 0x74a   :  { %v12074_v51 = vpop.eup %12073 }
 0x74b   :  { %v3826_v18 = vmul.f32 %v12074_v51, %v3824_v62 }
 0x779   :  { %v3802_v37 = vpop.permute.xlu0 %3801 }
 0x77a   :  { %v3804_v40 = vmul.f32 %v12070_v35, %v3802_v37 }
 0x77c   :  { %3806 = vrot.lane.b32.xlu0 %v3804_v40, %s12322_s13 }
 0x79b   :  { %v3829_v57 = vpop.permute.xlu1 %3828 }
 0x79c   :  { %v3831_v12 = vmul.f32 %v12074_v51, %v3829_v57 }
 0x79e   :  { %3833 = vrot.lane.b32.xlu1 %v3831_v12, %s12322_s13 }
 0x7ee   :  { %v3807_v15 = vpop.permute.xlu0 %3806 }
 0x7ef   :  { %v13114_v17 = vadd.f32 %v3807_v15, %v3799_v13 }
 0x7f1   :  { %12075 = vtanh.f32 %v13114_v17 }
 0x7fe   :  { %v12076_v23 = vpop.eup %12075 }
 0x7ff   :  { %3812 = vrot.lane.b32.xlu0 %v12076_v23, %s12321_s2 }
 0x810   :  { %v3834_v20 = vpop.permute.xlu1 %3833 }
 0x811   :  { %v13119_v22 = vadd.f32 %v3834_v20, %v3826_v18 }
 0x813   :  { %12077 = vtanh.f32 %v13119_v22 }
 0x820   :  { %v12078_v63 = vpop.eup %12077 }
 0x821   :  { %3839 = vrot.lane.b32.xlu1 %v12078_v63, %s12321_s2 }
 0x871   :  { %v3813_v47 = vpop.permute.xlu0 %3812 }
 0x872   :  { %v13123_v1 = vmul.f32 %v12070_v35, %v3813_v47  ;;  %v3854_v47 = vld [vmem:[#allocation2 + $0x8] sm:$0x3] }
 0x874   :  { %v3859_v7 = vrot.slane %v13123_v1, 4 }
 0x876   :  { %3860 = vrot.lane.b32.xlu0 %v3859_v7, %s12322_s13 }
 0x893   :  { %v3840_v14 = vpop.permute.xlu1 %3839 }
 0x894   :  { %v13127_v19 = vmul.f32 %v12074_v51, %v3840_v14 }
 0x896   :  { %v4357_v53 = vrot.slane %v13127_v19, 2 }
 0x898   :  { %4358 = vrot.lane.b32.xlu1 %v4357_v53, %s12322_s13 }
 0x8e8   :  { %v3861_v21 = vpop.permute.xlu0 %3860 }
 0x8e9   :  { %v3862_v24 = vsel %vm687_vm2, %v3861_v21, 0 }
 0x8ea   :  { %v3933_v25 = vand.u32 4294901760, %v3862_v24 }
 0x8ec   :  { %v3934_v26 = vsub.f32 %v3862_v24, %v3933_v25  ;;  %11244 = vmatmul.mubr.f32.vlgmr.msra.gmra.mxu1 %v3933_v25 }
 0x8ed   :  { %11258 = vmatpush3.msra.mxu1 %v12858_v2  ;;  %11265 = vmatprep.mubr.msk.f32.mxu1 %vm12320_vm1, %v12319_v0 }
 0x8ee   :  { %v3935_v27 = vand.u32 4294901760, %v3934_v26  ;;  %11259 = vmatprep.subr.mxu1 %v12319_v0 }
 0x8ef   :  { %11260 = vmatpush3.msra.mxu1 %v12860_v4 }
 0x8f0   :  { %v3936_v30 = vsub.f32 %v3934_v26, %v3935_v27  ;;  %11261 = vmatprep.subr.mxu1 %v12319_v0 }
 0x8f1   :  { %11262 = vmatpush3.msra.mxu1 %v12862_v5 }
 0x8f2   :  { %v3937_v31 = vand.u32 4294901760, %v3936_v30  ;;  %11263 = vmatprep.subr.mxu1 %v12319_v0 }
 0x8f3   :  { %11264 = vmatpush3.msra.mxu1 %v12907_v59 }
 0x8f4   :  { %11266 = vmatmul.mubr.f32.vlgmr.msra.gmra.mxu1 %v3935_v27  ;;  %11279 = vmatprep.subr.mxu1 %v12319_v0 }
 0x8f5   :  { %11233 = vmatmul.mubr.f32.vlgmr.msra.gmra.mxu0 %v3937_v31  ;;  %11280 = vmatpush3.msra.mxu1 %v12858_v2 }
 0x8f6   :  { %11247 = vmatpush3.msra.mxu0 %v12865_v6  ;;  %11281 = vmatprep.subr.mxu1 %v12319_v0 }
 0x8f7   :  { %11248 = vmatprep.subr.mxu0 %v12319_v0  ;;  %11282 = vmatpush3.msra.mxu1 %v12860_v4 }
 0x8f8   :  { %11249 = vmatpush3.msra.mxu0 %v12868_v33  ;;  %11283 = vmatprep.subr.mxu1 %v12319_v0 }
 0x8f9   :  { %11250 = vmatprep.subr.mxu0 %v12319_v0  ;;  %11284 = vmatpush3.msra.mxu1 %v12862_v5 }
 0x8fa   :  { %11251 = vmatpush3.msra.mxu0 %v12871_v8  ;;  %11285 = vmatprep.subr.mxu1 %v12319_v0 }
 0x8fb   :  { %11252 = vmatprep.subr.mxu0 %v12319_v0  ;;  %11254 = vmatprep.mubr.msk.f32.mxu0 %vm12320_vm1, %v12319_v0 }
 0x8fc   :  { %11253 = vmatpush3.msra.mxu0 %v12910_v60  ;;  %11286 = vmatpush3.msra.mxu1 %v12907_v59 }
 0x8fd   :  { %11287 = vmatprep.mubr.msk.f32.mxu1 %vm12320_vm1, %v12319_v0  ;;  %11255 = vmatmul.mubr.f32.vlgmr.msra.gmra.mxu0 %v3934_v26 }
 0x8fe   :  { %11268 = vmatprep.subr.mxu0 %v12319_v0  ;;  %11288 = vmatmul.mubr.f32.vlgmr.msra.gmra.mxu1 %v3933_v25 }
 0x8ff   :  { %11269 = vmatpush3.msra.mxu0 %v12876_v9  ;;  %11301 = vmatprep.subr.mxu1 %v12319_v0 }
 0x900   :  { %11270 = vmatprep.subr.mxu0 %v12319_v0  ;;  %11302 = vmatpush3.msra.mxu1 %v13000_v48 }
 0x901   :  { %11271 = vmatpush3.msra.mxu0 %v12879_v10  ;;  %11303 = vmatprep.subr.mxu1 %v12319_v0 }
 0x902   :  { %11272 = vmatprep.subr.mxu0 %v12319_v0  ;;  %11276 = vmatprep.mubr.msk.f32.mxu0 %vm12320_vm1, %v12319_v0 }
 0x903   :  { %11273 = vmatpush3.msra.mxu0 %v12882_v11  ;;  %11304 = vmatpush3.msra.mxu1 %v13010_v50  ;;  %v3853_v50 = vld [vmem:[#allocation2 + $0x10] sm:$0xc0] }
 0x904   :  { %11274 = vmatprep.subr.mxu0 %v12319_v0  ;;  %11305 = vmatprep.subr.mxu1 %v12319_v0 }
 0x905   :  { %11275 = vmatpush3.msra.mxu0 %v12915_v61  ;;  %11306 = vmatpush3.msra.mxu1 %v13018_v29 }
 0x906   :  { %11277 = vmatmul.mubr.f32.vlgmr.msra.gmra.mxu0 %v3933_v25  ;;  %11307 = vmatprep.subr.mxu1 %v12319_v0 }
 0x907   :  { %11308 = vmatpush3.msra.mxu1 %v13025_v54  ;;  %11290 = vmatprep.subr.mxu0 %v12319_v0 }
 0x908   :  { %11309 = vmatprep.mubr.msk.f32.mxu1 %vm12320_vm1, %v12319_v0  ;;  %11323 = vmatprep.subr.mxu1 %v12319_v0 }
 0x909   :  { %11291 = vmatpush3.msra.mxu0 %v12938_v28  ;;  %11298 = vmatprep.mubr.msk.f32.mxu0 %vm12320_vm1, %v12319_v0 }
 0x90a   :  { %v4359_v2 = vpop.permute.xlu1 %4358  ;;  %11292 = vmatprep.subr.mxu0 %v12319_v0 }
 0x90b   :  { %v4360_v4 = vsel %vm687_vm2, %v4359_v2, 0  ;;  %11293 = vmatpush3.msra.mxu0 %v12945_v34 }
 0x90c   :  { %v4431_v5 = vand.u32 4294901760, %v4360_v4  ;;  %11294 = vmatprep.subr.mxu0 %v12319_v0 }
 0x90d   :  { %11295 = vmatpush3.msra.mxu0 %v12952_v39 }
 0x90e   :  { %v4432_v6 = vsub.f32 %v4360_v4, %v4431_v5  ;;  %11310 = vmatmul.mubr.f32.vlgmr.msra.gmra.mxu1 %v4431_v5  ;;  %11296 = vmatprep.subr.mxu0 %v12319_v0 }
 0x90f   :  { %11324 = vmatpush3.msra.mxu1 %v12938_v28  ;;  %11297 = vmatpush3.msra.mxu0 %v12959_v46 }
 0x910   :  { %v4433_v33 = vand.u32 4294901760, %v4432_v6  ;;  %11325 = vmatprep.subr.mxu1 %v12319_v0  ;;  %11331 = vmatprep.mubr.msk.f32.mxu1 %vm12320_vm1, %v12319_v0 }
 0x911   :  { %11326 = vmatpush3.msra.mxu1 %v12945_v34  ;;  %11312 = vmatprep.subr.mxu0 %v12319_v0 }
 0x912   :  { %v4434_v8 = vsub.f32 %v4432_v6, %v4433_v33  ;;  %11327 = vmatprep.subr.mxu1 %v12319_v0 }
 0x913   :  { %11328 = vmatpush3.msra.mxu1 %v12952_v39 }
 0x914   :  { %v4435_v9 = vand.u32 4294901760, %v4434_v8  ;;  %11329 = vmatprep.subr.mxu1 %v12319_v0 }
 0x915   :  { %11330 = vmatpush3.msra.mxu1 %v12959_v46 }
 0x916   :  { %11332 = vmatmul.mubr.f32.vlgmr.msra.gmra.mxu1 %v4433_v33  ;;  %11345 = vmatprep.subr.mxu1 %v12319_v0  ;;  %v4856_v33 = vrot.slane %v13114_v17, 6  ;;  %v4917_v17 = vld [vmem:[#allocation10 + $0x18] sm:$0xff] }
 0x917   :  { %11299 = vmatmul.mubr.f32.vlgmr.msra.gmra.mxu0 %v4435_v9  ;;  %11346 = vmatpush3.msra.mxu1 %v12938_v28 }
 0x918   :  { %11313 = vmatpush3.msra.mxu0 %v12949_v36  ;;  %11347 = vmatprep.subr.mxu1 %v12319_v0 }
 0x919   :  { %11314 = vmatprep.subr.mxu0 %v12319_v0  ;;  %11348 = vmatpush3.msra.mxu1 %v12945_v34 }
 0x91a   :  { %11315 = vmatpush3.msra.mxu0 %v12957_v43  ;;  %11349 = vmatprep.subr.mxu1 %v12319_v0 }
 0x91b   :  { %11316 = vmatprep.subr.mxu0 %v12319_v0  ;;  %11350 = vmatpush3.msra.mxu1 %v12952_v39 }
 0x91c   :  { %11317 = vmatpush3.msra.mxu0 %v12967_v55  ;;  %11351 = vmatprep.subr.mxu1 %v12319_v0 }
 0x91d   :  { %11318 = vmatprep.subr.mxu0 %v12319_v0  ;;  %11320 = vmatprep.mubr.msk.f32.mxu0 %vm12320_vm1, %v12319_v0 }
 0x91e   :  { %11319 = vmatpush3.msra.mxu0 %v12977_v58  ;;  %11352 = vmatpush3.msra.mxu1 %v12959_v46 }
 0x91f   :  { %11353 = vmatprep.mubr.msk.f32.mxu1 %vm12320_vm1, %v12319_v0  ;;  %11321 = vmatmul.mubr.f32.vlgmr.msra.gmra.mxu0 %v4432_v6 }
 0x920   :  { %11334 = vmatprep.subr.mxu0 %v12319_v0  ;;  %11354 = vmatmul.mubr.f32.vlgmr.msra.gmra.mxu1 %v4431_v5 }
 0x921   :  { %11335 = vmatpush3.msra.mxu0 %v12963_v52  ;;  %11342 = vmatprep.mubr.msk.f32.mxu0 %vm12320_vm1, %v12319_v0 }
 0x922   :  { %11336 = vmatprep.subr.mxu0 %v12319_v0  ;;  %11367 = vmatprep.subr.mxu1 %v12319_v0 }
 0x923   :  { %11337 = vmatpush3.msra.mxu0 %v12974_v56  ;;  %11375 = vmatprep.mubr.msk.f32.mxu1 %vm12320_vm1, %v12319_v0 }
 0x924   :  { %11338 = vmatprep.subr.mxu0 %v12319_v0 }
 0x925   :  { %11339 = vmatpush3.msra.mxu0 %v12986_v42 }
 0x926   :  { %11340 = vmatprep.subr.mxu0 %v12319_v0 }
 0x927   :  { %11341 = vmatpush3.msra.mxu0 %v12996_v45 }
 0x928   :  { %11343 = vmatmul.mubr.f32.vlgmr.msra.gmra.mxu0 %v4431_v5  ;;  %11356 = vmatprep.subr.mxu0 %v12319_v0 }
 0x929   :  { %11364 = vmatprep.mubr.msk.f32.mxu0 %vm12320_vm1, %v12319_v0 }
 0x9ac   :  { %v4030_v10 = vpop.f32.mrf.mxu1 }
 0x9ae   :  { %v11245_v11 = vpop.f32.mrf.mxu1 }
 0x9b4   :  { %v4187_v59 = vpop.f32.mrf.mxu1 }
 0x9b5   :  { %v3939_v60 = vpop.f32.mrf.mxu0 }
 0x9b6   :  { %v11267_v61 = vpop.f32.mrf.mxu1  ;;  %v4031_v39 = vadd.f32 %v4030_v10, %v3939_v60 }
 0x9b7   :  { %v11234_v28 = vpop.f32.mrf.mxu0 }
 0x9bd   :  { %v4110_v34 = vpop.f32.mrf.mxu0 }
 0x9be   :  { %v4345_v36 = vpop.f32.mrf.mxu1  ;;  %v4111_v52 = vadd.f32 %v4110_v34, %v4031_v39  ;;  %v4916_v34 = vld [vmem:[#allocation10 + $0x10] sm:$0xff]  ;;  %v13258_v39 = vand.u32 4294901760, %v4917_v17 }
 0x9bf   :  { %v11256_v43 = vpop.f32.mrf.mxu0 }
 0x9c0   :  { %v11289_v46 = vpop.f32.mrf.mxu1  ;;  %v4188_v55 = vadd.f32 %v4187_v59, %v4111_v52  ;;  %v4883_v59 = vrot.slane %v13119_v22, 2  ;;  %v13260_v43 = vand.u32 4294901760, %v4916_v34  ;;  %v13265_v52 = vsub.f32 %v4917_v17, %v13258_v39  ;;  %11357 = vmatpush3.msra.mxu0 %v13258_v39 }
 0x9c1   :  { %11358 = vmatprep.subr.mxu0 %v12319_v0 }
 0x9c2   :  { %v13268_v22 = vsub.f32 %v4916_v34, %v13260_v43  ;;  %11359 = vmatpush3.msra.mxu0 %v13260_v43 }
 0x9c3   :  { %11360 = vmatprep.subr.mxu0 %v12319_v0 }
 0x9c6   :  { %v4270_v56 = vpop.f32.mrf.mxu0 }
 0x9c7   :  { %v4271_v58 = vadd.f32 %v4270_v56, %v4188_v55  ;;  %v13276_v56 = vand.u32 4294901760, %v13265_v52 }
 0x9c8   :  { %v11278_v42 = vpop.f32.mrf.mxu0 }
 0x9c9   :  { %v4346_v45 = vadd.f32 %v4345_v36, %v4271_v58  ;;  %v4915_v36 = vld [vmem:[#allocation10 + $0x8] sm:$0xff]  ;;  %v13279_v58 = vand.u32 4294901760, %v13268_v22 }
 0x9ca   :  { %v13262_v46 = vand.u32 4294901760, %v4915_v36 }
 0x9cb   :  { %v4350_v48 = vrot.slane %v4346_v45, 2  ;;  %v5030_v45 = vsub.f32 %v13265_v52, %v13276_v56 }
 0x9cc   :  { %v13271_v55 = vsub.f32 %v4915_v36, %v13262_v46  ;;  %11361 = vmatpush3.msra.mxu0 %v13262_v46 }
 0x9cd   :  { %v4352_v29 = vadd.f32 %v4350_v48, %v3853_v50  ;;  %v5037_v48 = vsub.f32 %v13268_v22, %v13279_v58  ;;  %11362 = vmatprep.subr.mxu0 %v12319_v0 }
 0x9ce   :  { %v4528_v54 = vpop.f32.mrf.mxu1  ;;  %v13282_v42 = vand.u32 4294901760, %v13271_v55 }
 0x9cf   :  { %12079 = vtanh.f32 %v4352_v29  ;;  %v10265_v53 = vmul.f32 -1.442695, %v4352_v29  ;;  %v13294_v29 = vand.u32 4294901760, %v5030_v45 }
 0x9d0   :  { %v11311_v32 = vpop.f32.mrf.mxu1  ;;  %v5044_v50 = vsub.f32 %v13271_v55, %v13282_v42 }
 0x9d1   :  { %11368 = vmatpush3.msra.mxu1 %v13294_v29 }
 0x9d2   :  { %11369 = vmatprep.subr.mxu1 %v12319_v0 }
 0x9d6   :  { %v4685_v35 = vpop.f32.mrf.mxu1 }
 0x9d7   :  { %v4437_v37 = vpop.f32.mrf.mxu0 }
 0x9d8   :  { %v11333_v40 = vpop.f32.mrf.mxu1  ;;  %v4529_v12 = vadd.f32 %v4528_v54, %v4437_v37  ;;  %v13296_v54 = vand.u32 4294901760, %v5037_v48  ;;  %v4914_v37 = vld [vmem:[#allocation10] sm:$0xff] }
 0x9d9   :  { %v11300_v44 = vpop.f32.mrf.mxu0  ;;  %v13307_v40 = vand.u32 4294901760, %v4914_v37 }
 0x9da   :  { %11370 = vmatpush3.msra.mxu1 %v13296_v54 }
 0x9db   :  { %11371 = vmatprep.subr.mxu1 %v12319_v0  ;;  %v13310_v44 = vsub.f32 %v4914_v37, %v13307_v40  ;;  %11363 = vmatpush3.msra.mxu0 %v13307_v40 }
 0x9dc   :  { %v12080_v49 = vpop.eup %12079  ;;  %11378 = vmatprep.subr.mxu0 %v12319_v0 }
 0x9dd   :  { %4860 = vrot.lane.b32.xlu0 %v12080_v49, %s12321_s2  ;;  %v13315_v49 = vand.u32 4294901760, %v13310_v44 }
 0x9df   :  { %v4608_v51 = vpop.f32.mrf.mxu0 }
 0x9e0   :  { %v4843_v57 = vpop.f32.mrf.mxu1  ;;  %v4609_v15 = vadd.f32 %v4608_v51, %v4529_v12  ;;  %v5051_v51 = vsub.f32 %v13310_v44, %v13315_v49 }
 0x9e1   :  { %v11322_v41 = vpop.f32.mrf.mxu0 }
 0x9e2   :  { %v11355_v13 = vpop.f32.mrf.mxu1  ;;  %v4686_v23 = vadd.f32 %v4685_v35, %v4609_v15  ;;  %v13300_v35 = vand.u32 4294901760, %v5044_v50 }
 0x9e4   :  { %11372 = vmatpush3.msra.mxu1 %v13300_v35 }
 0x9e5   :  { %11373 = vmatprep.subr.mxu1 %v12319_v0 }
 0x9e8   :  { %v4768_v62 = vpop.f32.mrf.mxu0 }
 0x9e9   :  { %v4769_v18 = vadd.f32 %v4768_v62, %v4686_v23 }
 0x9ea   :  { %v11344_v20 = vpop.f32.mrf.mxu0 }
 0x9eb   :  { %v4844_v63 = vadd.f32 %v4843_v57, %v4769_v18  ;;  %v13319_v57 = vand.u32 4294901760, %v5051_v51  ;;  %v5412_v20 = vld [vmem:[#allocation11 + $0x18] sm:$0xff] }
 0x9ed   :  { %v4847_v7 = vadd.f32 %v4844_v63, %v3854_v47  ;;  %11374 = vmatpush3.msra.mxu1 %v13319_v57  ;;  %v5411_v47 = vld [vmem:[#allocation11 + $0x10] sm:$0xff] }
 0x9ee   :  { %11389 = vmatprep.subr.mxu1 %v12319_v0 }
 0x9ef   :  { %12081 = vtanh.f32 %v4847_v7  ;;  %v10266_v25 = vmul.f32 -1.442695, %v4847_v7 }
 0x9f0   :  { %12083 = vpow2.f32 %v10265_v53  ;;  %v5410_v53 = vld [vmem:[#allocation11 + $0x8] sm:$0xff] }
 0x9fc   :  { %v12082_v14 = vpop.eup %12081 }
 0x9fd   :  { %4887 = vrot.lane.b32.xlu1 %v12082_v14, %s12321_s2  ;;  %v12084_v21 = vpop.eup %12083  ;;  %v13335_v14 = vand.u32 4294901760, %v5412_v20 }
 0x9fe   :  { %v4851_v24 = vadd.f32 1.0, %v12084_v21 }
 0xa00   :  { %12085 = vrcp.f32 %v4851_v24  ;;  %v13341_v24 = vand.u32 4294901760, %v5411_v47 }
 0xa01   :  { %12087 = vpow2.f32 %v10266_v25  ;;  %v5409_v25 = vld [vmem:[#allocation11] sm:$0xff] }
 0xa0d   :  { %v13239_v26 = vpop.eup %12085 }
 0xa0e   :  { %v12088_v31 = vpop.eup %12087  ;;  %v4858_v8 = vmul.f32 %v13239_v26, %v4856_v33 }
 0xa0f   :  { %v4878_v2 = vadd.f32 1.0, %v12088_v31 }
 0xa11   :  { %12089 = vrcp.f32 %v4878_v2  ;;  %v13353_v2 = vsub.f32 %v5411_v47, %v13341_v24 }
 0xa13   :  { %v13369_v33 = vand.u32 4294901760, %v13353_v2 }
 0xa1e   :  { %v13243_v4 = vpop.eup %12089 }
 0xa1f   :  { %v4885_v60 = vmul.f32 %v13243_v4, %v4883_v59  ;;  %v5529_v59 = vsub.f32 %v13353_v2, %v13369_v33 }
 0xa21   :  { %v13405_v34 = vand.u32 4294901760, %v5529_v59 }
 0xa4f   :  { %v4861_v27 = vpop.permute.xlu0 %4860 }
 0xa50   :  { %v4863_v30 = vmul.f32 %v13239_v26, %v4861_v27  ;;  %v13346_v27 = vsub.f32 %v5412_v20, %v13335_v14 }
 0xa52   :  { %4865 = vrot.lane.b32.xlu0 %v4863_v30, %s12322_s13  ;;  %v13348_v30 = vand.u32 4294901760, %v5410_v53 }
 0xa6f   :  { %v4888_v5 = vpop.permute.xlu1 %4887 }
 0xa70   :  { %v4890_v6 = vmul.f32 %v13243_v4, %v4888_v5  ;;  %v13360_v5 = vand.u32 4294901760, %v13346_v27 }
 0xa72   :  { %4892 = vrot.lane.b32.xlu1 %v4890_v6, %s12322_s13  ;;  %v13363_v6 = vsub.f32 %v5410_v53, %v13348_v30 }
 0xac4   :  { %v4866_v9 = vpop.permute.xlu0 %4865 }
 0xac5   :  { %v13249_v10 = vadd.f32 %v4866_v9, %v4858_v8  ;;  %v5522_v9 = vsub.f32 %v13346_v27, %v13360_v5 }
 0xac7   :  { %12091 = vtanh.f32 %v13249_v10 }
 0xad4   :  { %v12092_v11 = vpop.eup %12091 }
 0xad5   :  { %4871 = vrot.lane.b32.xlu0 %v12092_v11, %s12321_s2  ;;  %v13381_v11 = vand.u32 4294901760, %v13363_v6 }
 0xad7   :  { %v5536_v17 = vsub.f32 %v13363_v6, %v13381_v11 }
 0xad9   :  { %v13413_v45 = vand.u32 4294901760, %v5536_v17  ;;  %v4912_v17 = vld [vmem:[#allocation2 + $0x18] sm:$0x3] }
 0xae4   :  { %v4893_v61 = vpop.permute.xlu1 %4892 }
 0xae5   :  { %v13255_v28 = vadd.f32 %v4893_v61, %v4885_v60  ;;  %v13397_v61 = vand.u32 4294901760, %v5522_v9 }
 0xae7   :  { %12093 = vtanh.f32 %v13255_v28 }
 0xaf4   :  { %v12094_v32 = vpop.eup %12093 }
 0xaf5   :  { %4898 = vrot.lane.b32.xlu1 %v12094_v32, %s12321_s2 }
 0xb47   :  { %v4872_v12 = vpop.permute.xlu0 %4871 }
 0xb48   :  { %v13324_v41 = vmul.f32 %v13239_v26, %v4872_v12 }
 0xb4a   :  { %v4918_v13 = vrot.slane %v13324_v41, 6 }
 0xb4c   :  { %4919 = vrot.lane.b32.xlu0 %v4918_v13, %s12322_s13 }
 0xb67   :  { %v4899_v15 = vpop.permute.xlu1 %4898 }
 0xb68   :  { %v4901_v23 = vmul.f32 %v13243_v4, %v4899_v15  ;;  %v13355_v4 = vand.u32 4294901760, %v5409_v25 }
 0xb6a   :  { %4908 = vrot.lane.b32.xlu1 %v4901_v23, %s12322_s13  ;;  %v13372_v8 = vsub.f32 %v5409_v25, %v13355_v4 }
 0xb6c   :  { %v13390_v60 = vand.u32 4294901760, %v13372_v8 }
 0xb6e   :  { %v5543_v36 = vsub.f32 %v13372_v8, %v13390_v60 }
 0xb70   :  { %v13419_v48 = vand.u32 4294901760, %v5543_v36 }
 0xbbe   :  { %v4920_v62 = vpop.permute.xlu0 %4919 }
 0xbbf   :  { %v4921_v18 = vsel %vm687_vm2, %v4920_v62, 0 }
 0xbc0   :  { %v13331_v63 = vand.u32 4294901760, %v4921_v18 }
 0xbc2   :  { %v4993_v7 = vsub.f32 %v4921_v18, %v13331_v63  ;;  %11376 = vmatmul.mubr.f32.vlgmr.msra.gmra.mxu1 %v13331_v63 }
 0xbc3   :  { %11390 = vmatpush3.msra.mxu1 %v13258_v39  ;;  %11397 = vmatprep.mubr.msk.f32.mxu1 %vm12320_vm1, %v12319_v0 }
 0xbc4   :  { %v4994_v21 = vand.u32 4294901760, %v4993_v7  ;;  %11391 = vmatprep.subr.mxu1 %v12319_v0 }
 0xbc5   :  { %11392 = vmatpush3.msra.mxu1 %v13260_v43 }
 0xbc6   :  { %v4995_v26 = vsub.f32 %v4993_v7, %v4994_v21  ;;  %11393 = vmatprep.subr.mxu1 %v12319_v0 }
 0xbc7   :  { %11394 = vmatpush3.msra.mxu1 %v13262_v46 }
 0xbc8   :  { %v4996_v31 = vand.u32 4294901760, %v4995_v26  ;;  %11395 = vmatprep.subr.mxu1 %v12319_v0 }
 0xbc9   :  { %11396 = vmatpush3.msra.mxu1 %v13307_v40 }
 0xbca   :  { %11398 = vmatmul.mubr.f32.vlgmr.msra.gmra.mxu1 %v4994_v21  ;;  %11411 = vmatprep.subr.mxu1 %v12319_v0 }
 0xbcb   :  { %11365 = vmatmul.mubr.f32.vlgmr.msra.gmra.mxu0 %v4996_v31  ;;  %11412 = vmatpush3.msra.mxu1 %v13258_v39 }
 0xbcc   :  { %11379 = vmatpush3.msra.mxu0 %v13265_v52  ;;  %11413 = vmatprep.subr.mxu1 %v12319_v0 }
 0xbcd   :  { %11380 = vmatprep.subr.mxu0 %v12319_v0  ;;  %11414 = vmatpush3.msra.mxu1 %v13260_v43 }
 0xbce   :  { %11381 = vmatpush3.msra.mxu0 %v13268_v22  ;;  %11415 = vmatprep.subr.mxu1 %v12319_v0 }
 0xbcf   :  { %11382 = vmatprep.subr.mxu0 %v12319_v0  ;;  %11416 = vmatpush3.msra.mxu1 %v13262_v46 }
 0xbd0   :  { %11383 = vmatpush3.msra.mxu0 %v13271_v55  ;;  %11417 = vmatprep.subr.mxu1 %v12319_v0 }
 0xbd1   :  { %11384 = vmatprep.subr.mxu0 %v12319_v0  ;;  %11386 = vmatprep.mubr.msk.f32.mxu0 %vm12320_vm1, %v12319_v0 }
 0xbd2   :  { %11385 = vmatpush3.msra.mxu0 %v13310_v44  ;;  %11418 = vmatpush3.msra.mxu1 %v13307_v40 }
 0xbd3   :  { %11419 = vmatprep.mubr.msk.f32.mxu1 %vm12320_vm1, %v12319_v0  ;;  %11387 = vmatmul.mubr.f32.vlgmr.msra.gmra.mxu0 %v4993_v7 }
 0xbd4   :  { %11400 = vmatprep.subr.mxu0 %v12319_v0  ;;  %11420 = vmatmul.mubr.f32.vlgmr.msra.gmra.mxu1 %v13331_v63 }
 0xbd5   :  { %11433 = vmatprep.subr.mxu1 %v12319_v0  ;;  %11401 = vmatpush3.msra.mxu0 %v13276_v56 }
 0xbd6   :  { %11434 = vmatpush3.msra.mxu1 %v13397_v61  ;;  %11402 = vmatprep.subr.mxu0 %v12319_v0 }
 0xbd7   :  { %11435 = vmatprep.subr.mxu1 %v12319_v0  ;;  %11403 = vmatpush3.msra.mxu0 %v13279_v58 }
 0xbd8   :  { %11436 = vmatpush3.msra.mxu1 %v13405_v34  ;;  %11404 = vmatprep.subr.mxu0 %v12319_v0 }
 0xbd9   :  { %11437 = vmatprep.subr.mxu1 %v12319_v0  ;;  %11405 = vmatpush3.msra.mxu0 %v13282_v42 }
 0xbda   :  { %11438 = vmatpush3.msra.mxu1 %v13413_v45  ;;  %11406 = vmatprep.subr.mxu0 %v12319_v0 }
 0xbdb   :  { %11439 = vmatprep.subr.mxu1 %v12319_v0  ;;  %11407 = vmatpush3.msra.mxu0 %v13315_v49 }
 0xbdc   :  { %v4909_v50 = vpop.permute.xlu1 %4908  ;;  %11408 = vmatprep.mubr.msk.f32.mxu0 %vm12320_vm1, %v12319_v0  ;;  %11440 = vmatpush3.msra.mxu1 %v13419_v48 }
 0xbdd   :  { %4911 = vst.msk [vmem:[#allocation4 + $0x8] sm:$0x3] %vm1722_vm3, %v4909_v50  ;;  %v5413_v32 = vsel %vm687_vm2, %v4909_v50, 0  ;;  %11409 = vmatmul.mubr.f32.vlgmr.msra.gmra.mxu0 %v13331_v63  ;;  %11422 = vmatprep.subr.mxu0 %v12319_v0 }
 0xbde   :  { %v5484_v37 = vand.u32 4294901760, %v5413_v32  ;;  %11441 = vmatprep.mubr.msk.f32.mxu1 %vm12320_vm1, %v12319_v0  ;;  %11455 = vmatprep.subr.mxu1 %v12319_v0 }
 0xbdf   :  { %11423 = vmatpush3.msra.mxu0 %v13335_v14  ;;  %11430 = vmatprep.mubr.msk.f32.mxu0 %vm12320_vm1, %v12319_v0 }
 0xbe0   :  { %v5485_v51 = vsub.f32 %v5413_v32, %v5484_v37  ;;  %11442 = vmatmul.mubr.f32.vlgmr.msra.gmra.mxu1 %v5484_v37  ;;  %11424 = vmatprep.subr.mxu0 %v12319_v0 }
 0xbe1   :  { %11456 = vmatpush3.msra.mxu1 %v13335_v14  ;;  %11425 = vmatpush3.msra.mxu0 %v13341_v24 }
 0xbe2   :  { %v5486_v12 = vand.u32 4294901760, %v5485_v51  ;;  %11457 = vmatprep.subr.mxu1 %v12319_v0  ;;  %11426 = vmatprep.subr.mxu0 %v12319_v0 }
 0xbe3   :  { %11458 = vmatpush3.msra.mxu1 %v13341_v24  ;;  %11427 = vmatpush3.msra.mxu0 %v13348_v30 }
 0xbe4   :  { %v5487_v13 = vsub.f32 %v5485_v51, %v5486_v12  ;;  %11459 = vmatprep.subr.mxu1 %v12319_v0  ;;  %11428 = vmatprep.subr.mxu0 %v12319_v0 }
 0xbe5   :  { %11460 = vmatpush3.msra.mxu1 %v13348_v30  ;;  %11429 = vmatpush3.msra.mxu0 %v13355_v4 }
 0xbe6   :  { %11461 = vmatprep.subr.mxu1 %v12319_v0  ;;  %11463 = vmatprep.mubr.msk.f32.mxu1 %vm12320_vm1, %v12319_v0  ;;  %v5488_v15 = vand.u32 4294901760, %v5487_v13 }
 0xbe7   :  { %11462 = vmatpush3.msra.mxu1 %v13355_v4  ;;  %11444 = vmatprep.subr.mxu0 %v12319_v0 }
 0xbe8   :  { %11464 = vmatmul.mubr.f32.vlgmr.msra.gmra.mxu1 %v5486_v12  ;;  %11477 = vmatprep.subr.mxu1 %v12319_v0 }
 0xbe9   :  { %11431 = vmatmul.mubr.f32.vlgmr.msra.gmra.mxu0 %v5488_v15  ;;  %11478 = vmatpush3.msra.mxu1 %v13335_v14 }
 0xbea   :  { %11445 = vmatpush3.msra.mxu0 %v13346_v27  ;;  %11479 = vmatprep.subr.mxu1 %v12319_v0 }
 0xbeb   :  { %11446 = vmatprep.subr.mxu0 %v12319_v0  ;;  %11480 = vmatpush3.msra.mxu1 %v13341_v24 }
 0xbec   :  { %11447 = vmatpush3.msra.mxu0 %v13353_v2  ;;  %11481 = vmatprep.subr.mxu1 %v12319_v0 }
 0xbed   :  { %11448 = vmatprep.subr.mxu0 %v12319_v0  ;;  %11482 = vmatpush3.msra.mxu1 %v13348_v30 }
 0xbee   :  { %11449 = vmatpush3.msra.mxu0 %v13363_v6  ;;  %11483 = vmatprep.subr.mxu1 %v12319_v0 }
 0xbef   :  { %11450 = vmatprep.subr.mxu0 %v12319_v0  ;;  %11452 = vmatprep.mubr.msk.f32.mxu0 %vm12320_vm1, %v12319_v0 }
 0xbf0   :  { %11451 = vmatpush3.msra.mxu0 %v13372_v8  ;;  %11484 = vmatpush3.msra.mxu1 %v13355_v4 }
 0xbf1   :  { %11485 = vmatprep.mubr.msk.f32.mxu1 %vm12320_vm1, %v12319_v0  ;;  %11453 = vmatmul.mubr.f32.vlgmr.msra.gmra.mxu0 %v5485_v51 }
 0xbf2   :  { %11466 = vmatprep.subr.mxu0 %v12319_v0  ;;  %11486 = vmatmul.mubr.f32.vlgmr.msra.gmra.mxu1 %v5484_v37 }
 0xbf3   :  { %11467 = vmatpush3.msra.mxu0 %v13360_v5  ;;  %11474 = vmatprep.mubr.msk.f32.mxu0 %vm12320_vm1, %v12319_v0 }
 0xbf4   :  { %11468 = vmatprep.subr.mxu0 %v12319_v0  ;;  %11499 = vmatprep.subr.mxu1 %v12319_v0 }
 0xbf5   :  { %11469 = vmatpush3.msra.mxu0 %v13369_v33  ;;  %11500 = vmatpush3.msra.mxu1 %v13294_v29 }
 0xbf6   :  { %11470 = vmatprep.subr.mxu0 %v12319_v0  ;;  %11501 = vmatprep.subr.mxu1 %v12319_v0 }
 0xbf7   :  { %11471 = vmatpush3.msra.mxu0 %v13381_v11  ;;  %11502 = vmatpush3.msra.mxu1 %v13296_v54 }
 0xbf8   :  { %11472 = vmatprep.subr.mxu0 %v12319_v0  ;;  %11503 = vmatprep.subr.mxu1 %v12319_v0 }
 0xbf9   :  { %11473 = vmatpush3.msra.mxu0 %v13390_v60  ;;  %11504 = vmatpush3.msra.mxu1 %v13300_v35 }
 0xbfa   :  { %11475 = vmatmul.mubr.f32.vlgmr.msra.gmra.mxu0 %v5484_v37  ;;  %11505 = vmatprep.subr.mxu1 %v12319_v0 }
 0xbfb   :  { %11506 = vmatpush3.msra.mxu1 %v13319_v57  ;;  %11488 = vmatprep.subr.mxu0 %v12319_v0 }
 0xbfc   :  { %11507 = vmatprep.mubr.msk.f32.mxu1 %vm12320_vm1, %v12319_v0  ;;  %11521 = vmatprep.subr.mxu1 %v12319_v0 }
 0xbfd   :  { %11489 = vmatpush3.msra.mxu0 %v13258_v39  ;;  %11496 = vmatprep.mubr.msk.f32.mxu0 %vm12320_vm1, %v12319_v0 }
 0xbfe   :  { %11490 = vmatprep.subr.mxu0 %v12319_v0 }
 0xbff   :  { %11491 = vmatpush3.msra.mxu0 %v13260_v43 }
 0xc00   :  { %11492 = vmatprep.subr.mxu0 %v12319_v0 }
 0xc01   :  { %11493 = vmatpush3.msra.mxu0 %v13262_v46 }
 0xc02   :  { %11494 = vmatprep.subr.mxu0 %v12319_v0 }
 0xc03   :  { %11495 = vmatpush3.msra.mxu0 %v13307_v40 }
 0xc04   :  { %11510 = vmatprep.subr.mxu0 %v12319_v0 }
 0xc82   :  { %v5089_v29 = vpop.f32.mrf.mxu1 }
 0xc84   :  { %v11377_v54 = vpop.f32.mrf.mxu1 }
 0xc8a   :  { %v5246_v35 = vpop.f32.mrf.mxu1 }
 0xc8b   :  { %v4998_v57 = vpop.f32.mrf.mxu0 }
 0xc8c   :  { %v11399_v23 = vpop.f32.mrf.mxu1  ;;  %v5090_v47 = vadd.f32 %v5089_v29, %v4998_v57 }
 0xc8d   :  { %v11366_v62 = vpop.f32.mrf.mxu0 }
 0xc93   :  { %v5169_v18 = vpop.f32.mrf.mxu0 }
 0xc94   :  { %v5404_v20 = vpop.f32.mrf.mxu1  ;;  %v5170_v53 = vadd.f32 %v5169_v18, %v5090_v47 }
 0xc95   :  { %v11388_v63 = vpop.f32.mrf.mxu0 }
 0xc96   :  { %v11421_v7 = vpop.f32.mrf.mxu1  ;;  %v5247_v21 = vadd.f32 %v5246_v35, %v5170_v53  ;;  %v4913_v53 = vld [vmem:[#allocation2] sm:$0xc0] }
 0xc9d   :  { %v5329_v25 = vpop.f32.mrf.mxu0 }
 0xc9e   :  { %v5330_v26 = vadd.f32 %v5329_v25, %v5247_v21 }
 0xc9f   :  { %v11410_v31 = vpop.f32.mrf.mxu0 }
 0xca0   :  { %v5405_v9 = vadd.f32 %v5404_v20, %v5330_v26  ;;  %v5581_v59 = vpop.f32.mrf.mxu1 }
 0xca2   :  { %v5408_v36 = vadd.f32 %v5405_v9, %v4912_v17  ;;  %v11443_v50 = vpop.f32.mrf.mxu1 }
 0xca4   :  { %12095 = vtanh.f32 %v5408_v36  ;;  %v10267_v26 = vmul.f32 -1.442695, %v5408_v36  ;;  %v5912_v36 = vrot.slane %v13249_v10, 6 }
 0xca8   :  { %v5738_v32 = vpop.f32.mrf.mxu1 }
 0xca9   :  { %v5490_v37 = vpop.f32.mrf.mxu0 }
 0xcaa   :  { %v11465_v51 = vpop.f32.mrf.mxu1  ;;  %v5582_v29 = vadd.f32 %v5581_v59, %v5490_v37 }
 0xcab   :  { %v11432_v12 = vpop.f32.mrf.mxu0 }
 0xcb1   :  { %v12096_v13 = vpop.eup %12095  ;;  %v5661_v15 = vpop.f32.mrf.mxu0 }
 0xcb2   :  { %v5896_v54 = vpop.f32.mrf.mxu1  ;;  %5916 = vrot.lane.b32.xlu0 %v12096_v13, %s12321_s2  ;;  %v5662_v23 = vadd.f32 %v5661_v15, %v5582_v29 }
 0xcb3   :  { %v11454_v35 = vpop.f32.mrf.mxu0 }
 0xcb4   :  { %v11487_v57 = vpop.f32.mrf.mxu1  ;;  %v5739_v62 = vadd.f32 %v5738_v32, %v5662_v23  ;;  %v5939_v23 = vrot.slane %v13255_v28, 2 }
 0xcba   :  { %v5821_v18 = vpop.f32.mrf.mxu0 }
 0xcbb   :  { %v5822_v20 = vadd.f32 %v5821_v18, %v5739_v62 }
 0xcbc   :  { %v11476_v63 = vpop.f32.mrf.mxu0 }
 0xcbd   :  { %v5897_v47 = vadd.f32 %v5896_v54, %v5822_v20 }
 0xcbf   :  { %v5901_v7 = vrot.slane %v5897_v47, 2 }
 0xcc1   :  { %v5903_v21 = vadd.f32 %v5901_v7, %v4913_v53 }
 0xcc3   :  { %12097 = vtanh.f32 %v5903_v21  ;;  %v10268_v59 = vmul.f32 -1.442695, %v5903_v21 }
 0xcc4   :  { %12099 = vpow2.f32 %v10267_v26 }
 0xcd0   :  { %v12098_v25 = vpop.eup %12097 }
 0xcd1   :  { %5943 = vrot.lane.b32.xlu1 %v12098_v25, %s12321_s2  ;;  %v12100_v31 = vpop.eup %12099 }
 0xcd2   :  { %v5907_v9 = vadd.f32 1.0, %v12100_v31 }
 0xcd4   :  { %12101 = vrcp.f32 %v5907_v9 }
 0xcd5   :  { %12103 = vpow2.f32 %v10268_v59 }
 0xce1   :  { %v12102_v17 = vpop.eup %12101 }
 0xce2   :  { %v12104_v37 = vpop.eup %12103  ;;  %v5914_v54 = vmul.f32 %v12102_v17, %v5912_v36 }
 0xce3   :  { %v5934_v51 = vadd.f32 1.0, %v12104_v37 }
 0xce5   :  { %12105 = vrcp.f32 %v5934_v51 }
 0xcf2   :  { %v12106_v12 = vpop.eup %12105 }
 0xcf3   :  { %v5941_v62 = vmul.f32 %v12106_v12, %v5939_v23 }
 0xd24   :  { %v5917_v50 = vpop.permute.xlu0 %5916 }
 0xd25   :  { %v5919_v32 = vmul.f32 %v12102_v17, %v5917_v50 }
 0xd27   :  { %5921 = vrot.lane.b32.xlu0 %v5919_v32, %s12322_s13 }
 0xd43   :  { %v5944_v13 = vpop.permute.xlu1 %5943 }
 0xd44   :  { %v5946_v15 = vmul.f32 %v12106_v12, %v5944_v13 }
 0xd46   :  { %5948 = vrot.lane.b32.xlu1 %v5946_v15, %s12322_s13 }
 0xd99   :  { %v5922_v29 = vpop.permute.xlu0 %5921 }
 0xd9a   :  { %v13512_v35 = vadd.f32 %v5922_v29, %v5914_v54 }
 0xd9c   :  { %12107 = vtanh.f32 %v13512_v35 }
 0xda9   :  { %v12108_v57 = vpop.eup %12107 }
 0xdaa   :  { %5927 = vrot.lane.b32.xlu0 %v12108_v57, %s12321_s2 }
 0xdb8   :  { %v5949_v18 = vpop.permute.xlu1 %5948 }
 0xdb9   :  { %v13517_v20 = vadd.f32 %v5949_v18, %v5941_v62 }
 0xdbb   :  { %12109 = vtanh.f32 %v13517_v20 }
 0xdc8   :  { %v12110_v63 = vpop.eup %12109 }
 0xdc9   :  { %5954 = vrot.lane.b32.xlu1 %v12110_v63, %s12321_s2 }
 0xe1c   :  { %v5928_v10 = vpop.permute.xlu0 %5927 }
 0xe1d   :  { %v5930_v47 = vmul.f32 %v12102_v17, %v5928_v10 }
 0xe1f   :  { %5959 = vrot.lane.b32.xlu0 %v5930_v47, %s12322_s13 }
 0xe3b   :  { %v5955_v7 = vpop.permute.xlu1 %5954 }
 0xe3c   :  { %v13522_v53 = vmul.f32 %v12106_v12, %v5955_v7 }
 0xe3e   :  { %v6469_v21 = vrot.slane %v13522_v53, 6 }
 0xe40   :  { %6470 = vrot.lane.b32.xlu1 %v6469_v21, %s12322_s13  ;;  %v5969_v21 = vld [vmem:[#allocation2] sm:$0x30] }
 0xe91   :  { %v5960_v28 = vpop.permute.xlu0 %5959 }
 0xe92   :  { %5962 = vst.msk [vmem:[#allocation3 + $0x8] sm:$0x3] %vm1722_vm3, %v5960_v28  ;;  %v5974_v25 = vsel %vm687_vm2, %v5960_v28, 0 }
 0xe93   :  { %v6045_v26 = vand.u32 4294901760, %v5974_v25 }
 0xe95   :  { %v6046_v31 = vsub.f32 %v5974_v25, %v6045_v26  ;;  %11508 = vmatmul.mubr.f32.vlgmr.msra.gmra.mxu1 %v6045_v26 }
 0xe96   :  { %11522 = vmatpush3.msra.mxu1 %v13258_v39  ;;  %11529 = vmatprep.mubr.msk.f32.mxu1 %vm12320_vm1, %v12319_v0 }
 0xe97   :  { %v6047_v9 = vand.u32 4294901760, %v6046_v31  ;;  %11523 = vmatprep.subr.mxu1 %v12319_v0 }
 0xe98   :  { %11524 = vmatpush3.msra.mxu1 %v13260_v43 }
 0xe99   :  { %v6048_v59 = vsub.f32 %v6046_v31, %v6047_v9  ;;  %11525 = vmatprep.subr.mxu1 %v12319_v0 }
 0xe9a   :  { %11526 = vmatpush3.msra.mxu1 %v13262_v46 }
 0xe9b   :  { %11527 = vmatprep.subr.mxu1 %v12319_v0  ;;  %v6049_v17 = vand.u32 4294901760, %v6048_v59 }
 0xe9c   :  { %11528 = vmatpush3.msra.mxu1 %v13307_v40 }
 0xe9d   :  { %11530 = vmatmul.mubr.f32.vlgmr.msra.gmra.mxu1 %v6047_v9  ;;  %11543 = vmatprep.subr.mxu1 %v12319_v0 }
 0xe9e   :  { %11497 = vmatmul.mubr.f32.vlgmr.msra.gmra.mxu0 %v6049_v17  ;;  %11544 = vmatpush3.msra.mxu1 %v13258_v39 }
 0xe9f   :  { %11511 = vmatpush3.msra.mxu0 %v13265_v52  ;;  %11545 = vmatprep.subr.mxu1 %v12319_v0 }
 0xea0   :  { %11512 = vmatprep.subr.mxu0 %v12319_v0  ;;  %11546 = vmatpush3.msra.mxu1 %v13260_v43 }
 0xea1   :  { %11513 = vmatpush3.msra.mxu0 %v13268_v22  ;;  %11547 = vmatprep.subr.mxu1 %v12319_v0 }
 0xea2   :  { %11514 = vmatprep.subr.mxu0 %v12319_v0  ;;  %11548 = vmatpush3.msra.mxu1 %v13262_v46 }
 0xea3   :  { %11515 = vmatpush3.msra.mxu0 %v13271_v55  ;;  %11549 = vmatprep.subr.mxu1 %v12319_v0 }
 0xea4   :  { %11516 = vmatprep.subr.mxu0 %v12319_v0  ;;  %11518 = vmatprep.mubr.msk.f32.mxu0 %vm12320_vm1, %v12319_v0 }
 0xea5   :  { %11517 = vmatpush3.msra.mxu0 %v13310_v44  ;;  %11550 = vmatpush3.msra.mxu1 %v13307_v40 }
 0xea6   :  { %11551 = vmatprep.mubr.msk.f32.mxu1 %vm12320_vm1, %v12319_v0  ;;  %11519 = vmatmul.mubr.f32.vlgmr.msra.gmra.mxu0 %v6046_v31 }
 0xea7   :  { %11532 = vmatprep.subr.mxu0 %v12319_v0  ;;  %11552 = vmatmul.mubr.f32.vlgmr.msra.gmra.mxu1 %v6045_v26 }
 0xea8   :  { %11533 = vmatpush3.msra.mxu0 %v13276_v56  ;;  %11565 = vmatprep.subr.mxu1 %v12319_v0 }
 0xea9   :  { %11534 = vmatprep.subr.mxu0 %v12319_v0  ;;  %11566 = vmatpush3.msra.mxu1 %v13397_v61 }
 0xeaa   :  { %11535 = vmatpush3.msra.mxu0 %v13279_v58  ;;  %11567 = vmatprep.subr.mxu1 %v12319_v0 }
 0xeab   :  { %11536 = vmatprep.subr.mxu0 %v12319_v0  ;;  %11540 = vmatprep.mubr.msk.f32.mxu0 %vm12320_vm1, %v12319_v0 }
 0xeac   :  { %11537 = vmatpush3.msra.mxu0 %v13282_v42  ;;  %11568 = vmatpush3.msra.mxu1 %v13405_v34  ;;  %v5968_v34 = vld [vmem:[#allocation2 + $0x18] sm:$0xc] }
 0xead   :  { %11538 = vmatprep.subr.mxu0 %v12319_v0  ;;  %11569 = vmatprep.subr.mxu1 %v12319_v0 }
 0xeae   :  { %11539 = vmatpush3.msra.mxu0 %v13315_v49  ;;  %11570 = vmatpush3.msra.mxu1 %v13413_v45 }
 0xeaf   :  { %11541 = vmatmul.mubr.f32.vlgmr.msra.gmra.mxu0 %v6045_v26  ;;  %11571 = vmatprep.subr.mxu1 %v12319_v0 }
 0xeb0   :  { %11572 = vmatpush3.msra.mxu1 %v13419_v48  ;;  %11554 = vmatprep.subr.mxu0 %v12319_v0 }
 0xeb1   :  { %11573 = vmatprep.mubr.msk.f32.mxu1 %vm12320_vm1, %v12319_v0  ;;  %11587 = vmatprep.subr.mxu1 %v12319_v0 }
 0xeb2   :  { %v6471_v39 = vpop.permute.xlu1 %6470  ;;  %11555 = vmatpush3.msra.mxu0 %v13335_v14  ;;  %11562 = vmatprep.mubr.msk.f32.mxu0 %vm12320_vm1, %v12319_v0 }
 0xeb3   :  { %v6472_v43 = vsel %vm687_vm2, %v6471_v39, 0  ;;  %11556 = vmatprep.subr.mxu0 %v12319_v0 }
 0xeb4   :  { %v6543_v46 = vand.u32 4294901760, %v6472_v43  ;;  %11557 = vmatpush3.msra.mxu0 %v13341_v24 }
 0xeb5   :  { %11558 = vmatprep.subr.mxu0 %v12319_v0 }
 0xeb6   :  { %v6544_v52 = vsub.f32 %v6472_v43, %v6543_v46  ;;  %11574 = vmatmul.mubr.f32.vlgmr.msra.gmra.mxu1 %v6543_v46  ;;  %11559 = vmatpush3.msra.mxu0 %v13348_v30 }
 0xeb7   :  { %11588 = vmatpush3.msra.mxu1 %v13335_v14  ;;  %11560 = vmatprep.subr.mxu0 %v12319_v0 }
 0xeb8   :  { %v6545_v22 = vand.u32 4294901760, %v6544_v52  ;;  %11589 = vmatprep.subr.mxu1 %v12319_v0  ;;  %11561 = vmatpush3.msra.mxu0 %v13355_v4 }
 0xeb9   :  { %11590 = vmatpush3.msra.mxu1 %v13341_v24  ;;  %11595 = vmatprep.mubr.msk.f32.mxu1 %vm12320_vm1, %v12319_v0 }
 0xeba   :  { %v6546_v55 = vsub.f32 %v6544_v52, %v6545_v22  ;;  %11591 = vmatprep.subr.mxu1 %v12319_v0  ;;  %11576 = vmatprep.subr.mxu0 %v12319_v0 }
 0xebb   :  { %11592 = vmatpush3.msra.mxu1 %v13348_v30 }
 0xebc   :  { %v6547_v56 = vand.u32 4294901760, %v6546_v55  ;;  %11593 = vmatprep.subr.mxu1 %v12319_v0 }
 0xebd   :  { %11594 = vmatpush3.msra.mxu1 %v13355_v4 }
 0xebe   :  { %11596 = vmatmul.mubr.f32.vlgmr.msra.gmra.mxu1 %v6545_v22  ;;  %11609 = vmatprep.subr.mxu1 %v12319_v0 }
 0xebf   :  { %11563 = vmatmul.mubr.f32.vlgmr.msra.gmra.mxu0 %v6547_v56  ;;  %11610 = vmatpush3.msra.mxu1 %v13335_v14 }
 0xec0   :  { %11577 = vmatpush3.msra.mxu0 %v13346_v27  ;;  %11611 = vmatprep.subr.mxu1 %v12319_v0 }
 0xec1   :  { %11578 = vmatprep.subr.mxu0 %v12319_v0  ;;  %11612 = vmatpush3.msra.mxu1 %v13341_v24 }
 0xec2   :  { %11579 = vmatpush3.msra.mxu0 %v13353_v2  ;;  %11613 = vmatprep.subr.mxu1 %v12319_v0 }
 0xec3   :  { %11580 = vmatprep.subr.mxu0 %v12319_v0  ;;  %11614 = vmatpush3.msra.mxu1 %v13348_v30 }
 0xec4   :  { %11581 = vmatpush3.msra.mxu0 %v13363_v6  ;;  %11615 = vmatprep.subr.mxu1 %v12319_v0 }
 0xec5   :  { %11582 = vmatprep.subr.mxu0 %v12319_v0  ;;  %11584 = vmatprep.mubr.msk.f32.mxu0 %vm12320_vm1, %v12319_v0 }
 0xec6   :  { %11583 = vmatpush3.msra.mxu0 %v13372_v8  ;;  %11616 = vmatpush3.msra.mxu1 %v13355_v4 }
 0xec7   :  { %11617 = vmatprep.mubr.msk.f32.mxu1 %vm12320_vm1, %v12319_v0  ;;  %11585 = vmatmul.mubr.f32.vlgmr.msra.gmra.mxu0 %v6544_v52 }
 0xec8   :  { %11598 = vmatprep.subr.mxu0 %v12319_v0  ;;  %11618 = vmatmul.mubr.f32.vlgmr.msra.gmra.mxu1 %v6543_v46 }
 0xec9   :  { %11599 = vmatpush3.msra.mxu0 %v13360_v5  ;;  %11606 = vmatprep.mubr.msk.f32.mxu0 %vm12320_vm1, %v12319_v0 }
 0xeca   :  { %11600 = vmatprep.subr.mxu0 %v12319_v0  ;;  %11631 = vmatprep.subr.mxu1 %v12319_v0 }
 0xecb   :  { %11601 = vmatpush3.msra.mxu0 %v13369_v33  ;;  %11639 = vmatprep.mubr.msk.f32.mxu1 %vm12320_vm1, %v12319_v0 }
 0xecc   :  { %11602 = vmatprep.subr.mxu0 %v12319_v0 }
 0xecd   :  { %11603 = vmatpush3.msra.mxu0 %v13381_v11 }
 0xece   :  { %11604 = vmatprep.subr.mxu0 %v12319_v0 }
 0xecf   :  { %11605 = vmatpush3.msra.mxu0 %v13390_v60 }
 0xed0   :  { %11607 = vmatmul.mubr.f32.vlgmr.msra.gmra.mxu0 %v6543_v46  ;;  %11620 = vmatprep.subr.mxu0 %v12319_v0 }
 0xed1   :  { %11628 = vmatprep.mubr.msk.f32.mxu0 %vm12320_vm1, %v12319_v0 }
 0xf55   :  { %v6142_v58 = vpop.f32.mrf.mxu1 }
 0xf57   :  { %v11509_v42 = vpop.f32.mrf.mxu1 }
 0xf5d   :  { %v6299_v40 = vpop.f32.mrf.mxu1 }
 0xf5e   :  { %v6051_v44 = vpop.f32.mrf.mxu0 }
 0xf5f   :  { %v11531_v49 = vpop.f32.mrf.mxu1  ;;  %v6143_v30 = vadd.f32 %v6142_v58, %v6051_v44  ;;  %v6971_v58 = vrot.slane %v13512_v35, 6  ;;  %v7032_v35 = vld [vmem:[#allocation10 + $0x18] sm:$0xff] }
 0xf60   :  { %v11498_v14 = vpop.f32.mrf.mxu0 }
 0xf61   :  { %v6998_v14 = vrot.slane %v13517_v20, 2 }
 0xf66   :  { %v6222_v24 = vpop.f32.mrf.mxu0 }
 0xf67   :  { %v6457_v27 = vpop.f32.mrf.mxu1  ;;  %v6223_v5 = vadd.f32 %v6222_v24, %v6143_v30 }
 0xf68   :  { %v11520_v2 = vpop.f32.mrf.mxu0 }
 0xf69   :  { %v11553_v4 = vpop.f32.mrf.mxu1  ;;  %v6300_v6 = vadd.f32 %v6299_v40, %v6223_v5  ;;  %v7031_v2 = vld [vmem:[#allocation10 + $0x10] sm:$0xff]  ;;  %v13654_v5 = vand.u32 4294901760, %v7032_v35 }
 0xf6a   :  { %v7030_v4 = vld [vmem:[#allocation10 + $0x8] sm:$0xff] }
 0xf6b   :  { %11621 = vmatpush3.msra.mxu0 %v13654_v5 }
 0xf6c   :  { %11622 = vmatprep.subr.mxu0 %v12319_v0 }
 0xf6f   :  { %v6382_v33 = vpop.f32.mrf.mxu0 }
 0xf70   :  { %v6383_v8 = vadd.f32 %v6382_v33, %v6300_v6  ;;  %v13656_v6 = vand.u32 4294901760, %v7031_v2  ;;  %v13658_v33 = vand.u32 4294901760, %v7030_v4 }
 0xf71   :  { %v11542_v11 = vpop.f32.mrf.mxu0 }
 0xf72   :  { %v6458_v60 = vadd.f32 %v6457_v27, %v6383_v8  ;;  %v13661_v8 = vsub.f32 %v7032_v35, %v13654_v5  ;;  %v13664_v20 = vsub.f32 %v7031_v2, %v13656_v6  ;;  %v13667_v11 = vsub.f32 %v7030_v4, %v13658_v33  ;;  %11623 = vmatpush3.msra.mxu0 %v13656_v6 }
 0xf73   :  { %11624 = vmatprep.subr.mxu0 %v12319_v0 }
 0xf74   :  { %v6462_v61 = vrot.slane %v6458_v60, 6  ;;  %v13672_v60 = vand.u32 4294901760, %v13661_v8  ;;  %11625 = vmatpush3.msra.mxu0 %v13658_v33 }
 0xf75   :  { %11626 = vmatprep.subr.mxu0 %v12319_v0 }
 0xf76   :  { %v6464_v45 = vadd.f32 %v6462_v61, %v5968_v34  ;;  %v6640_v48 = vpop.f32.mrf.mxu1  ;;  %v13675_v61 = vand.u32 4294901760, %v13664_v20  ;;  %v13678_v34 = vand.u32 4294901760, %v13667_v11 }
 0xf78   :  { %12111 = vtanh.f32 %v6464_v45  ;;  %v11575_v50 = vpop.f32.mrf.mxu1  ;;  %v10269_v26 = vmul.f32 -1.442695, %v6464_v45  ;;  %v7145_v45 = vsub.f32 %v13661_v8, %v13672_v60 }
 0xf79   :  { %v7159_v50 = vsub.f32 %v13667_v11, %v13678_v34 }
 0xf7e   :  { %v6797_v32 = vpop.f32.mrf.mxu1 }
 0xf7f   :  { %v6549_v37 = vpop.f32.mrf.mxu0 }
 0xf80   :  { %v11597_v51 = vpop.f32.mrf.mxu1  ;;  %v6641_v54 = vadd.f32 %v6640_v48, %v6549_v37  ;;  %v7152_v48 = vsub.f32 %v13664_v20, %v13675_v61  ;;  %v13691_v37 = vand.u32 4294901760, %v7145_v45 }
 0xf81   :  { %v11564_v12 = vpop.f32.mrf.mxu0 }
 0xf82   :  { %v13693_v51 = vand.u32 4294901760, %v7152_v48  ;;  %11632 = vmatpush3.msra.mxu1 %v13691_v37  ;;  %v13696_v12 = vand.u32 4294901760, %v7159_v50 }
 0xf83   :  { %11633 = vmatprep.subr.mxu1 %v12319_v0 }
 0xf84   :  { %11634 = vmatpush3.msra.mxu1 %v13693_v51 }
 0xf85   :  { %v12112_v13 = vpop.eup %12111  ;;  %11635 = vmatprep.subr.mxu1 %v12319_v0 }
 0xf86   :  { %6975 = vrot.lane.b32.xlu0 %v12112_v13, %s12321_s2  ;;  %11636 = vmatpush3.msra.mxu1 %v13696_v12  ;;  %v7029_v13 = vld [vmem:[#allocation10] sm:$0xff] }
 0xf87   :  { %v6720_v15 = vpop.f32.mrf.mxu0  ;;  %11637 = vmatprep.subr.mxu1 %v12319_v0 }
 0xf88   :  { %v6955_v36 = vpop.f32.mrf.mxu1  ;;  %v6721_v23 = vadd.f32 %v6720_v15, %v6641_v54  ;;  %v13703_v15 = vand.u32 4294901760, %v7029_v13 }
 0xf89   :  { %v11586_v29 = vpop.f32.mrf.mxu0 }
 0xf8a   :  { %v11619_v57 = vpop.f32.mrf.mxu1  ;;  %v6798_v62 = vadd.f32 %v6797_v32, %v6721_v23  ;;  %11627 = vmatpush3.msra.mxu0 %v13703_v15 }
 0xf8b   :  { %11642 = vmatprep.subr.mxu0 %v12319_v0 }
 0xf90   :  { %v6880_v18 = vpop.f32.mrf.mxu0 }
 0xf91   :  { %v6881_v63 = vadd.f32 %v6880_v18, %v6798_v62 }
 0xf92   :  { %v11608_v10 = vpop.f32.mrf.mxu0 }
 0xf93   :  { %v6956_v47 = vadd.f32 %v6955_v36, %v6881_v63  ;;  %v13706_v36 = vsub.f32 %v7029_v13, %v13703_v15 }
 0xf95   :  { %v6960_v7 = vrot.slane %v6956_v47, 4  ;;  %v13711_v54 = vand.u32 4294901760, %v13706_v36 }
 0xf97   :  { %v6962_v28 = vadd.f32 %v6960_v7, %v5969_v21  ;;  %v7166_v29 = vsub.f32 %v13706_v36, %v13711_v54 }
 0xf99   :  { %12113 = vtanh.f32 %v6962_v28  ;;  %v10270_v59 = vmul.f32 -1.442695, %v6962_v28  ;;  %v13715_v57 = vand.u32 4294901760, %v7166_v29  ;;  %v7530_v28 = vld [vmem:[#allocation11 + $0x18] sm:$0xff] }
 0xf9a   :  { %12115 = vpow2.f32 %v10269_v26 }
 0xf9b   :  { %11638 = vmatpush3.msra.mxu1 %v13715_v57 }
 0xf9c   :  { %11653 = vmatprep.subr.mxu1 %v12319_v0 }
 0xfa6   :  { %v12114_v25 = vpop.eup %12113 }
 0xfa7   :  { %7002 = vrot.lane.b32.xlu1 %v12114_v25, %s12321_s2  ;;  %v12116_v31 = vpop.eup %12115 }
 0xfa8   :  { %v6966_v9 = vadd.f32 1.0, %v12116_v31  ;;  %v13734_v31 = vand.u32 4294901760, %v7530_v28 }
 0xfaa   :  { %12117 = vrcp.f32 %v6966_v9  ;;  %v7529_v9 = vld [vmem:[#allocation11 + $0x10] sm:$0xff] }
 0xfab   :  { %12119 = vpow2.f32 %v10270_v59 }
 0xfb7   :  { %v13635_v17 = vpop.eup %12117 }
 0xfb8   :  { %v12120_v46 = vpop.eup %12119  ;;  %v6973_v42 = vmul.f32 %v13635_v17, %v6971_v58 }
 0xfb9   :  { %v6993_v52 = vadd.f32 1.0, %v12120_v46  ;;  %v13745_v46 = vsub.f32 %v7530_v28, %v13734_v31 }
 0xfbb   :  { %12121 = vrcp.f32 %v6993_v52  ;;  %v7527_v52 = vld [vmem:[#allocation11] sm:$0xff] }
 0xfbc   :  { %v13755_v58 = vand.u32 4294901760, %v7527_v52 }
 0xfc8   :  { %v13639_v22 = vpop.eup %12121 }
 0xfc9   :  { %v7000_v24 = vmul.f32 %v13639_v22, %v6998_v14  ;;  %v13773_v14 = vsub.f32 %v7527_v52, %v13755_v58 }
 0xfcb   :  { %v13792_v2 = vand.u32 4294901760, %v13773_v14 }
 0xfcd   :  { %v7664_v50 = vsub.f32 %v13773_v14, %v13792_v2 }
 0xfcf   :  { %v13821_v13 = vand.u32 4294901760, %v7664_v50 }
 0xff8   :  { %v6976_v39 = vpop.permute.xlu0 %6975 }
 0xff9   :  { %v6978_v43 = vmul.f32 %v13635_v17, %v6976_v39  ;;  %v13741_v39 = vand.u32 4294901760, %v7529_v9 }
 0xffb   :  { %6980 = vrot.lane.b32.xlu0 %v6978_v43, %s12322_s13 }
0x1019   :  { %v7003_v55 = vpop.permute.xlu1 %7002 }
0x101a   :  { %v7005_v56 = vmul.f32 %v13639_v22, %v7003_v55 }
0x101c   :  { %7007 = vrot.lane.b32.xlu1 %v7005_v56, %s12322_s13  ;;  %v13753_v56 = vsub.f32 %v7529_v9, %v13741_v39 }
0x106d   :  { %v6981_v40 = vpop.permute.xlu0 %6980 }
0x106e   :  { %v13645_v44 = vadd.f32 %v6981_v40, %v6973_v42  ;;  %v13759_v42 = vand.u32 4294901760, %v13745_v46 }
0x1070   :  { %12123 = vtanh.f32 %v13645_v44 }
0x107d   :  { %v12124_v49 = vpop.eup %12123 }
0x107e   :  { %6986 = vrot.lane.b32.xlu0 %v12124_v49, %s12321_s2  ;;  %v13770_v49 = vand.u32 4294901760, %v13753_v56 }
0x1080   :  { %v7650_v35 = vsub.f32 %v13753_v56, %v13770_v49 }
0x1082   :  { %v13806_v48 = vand.u32 4294901760, %v7650_v35 }
0x108e   :  { %v7008_v27 = vpop.permute.xlu1 %7007 }
0x108f   :  { %v13651_v30 = vadd.f32 %v7008_v27, %v7000_v24  ;;  %v7643_v24 = vsub.f32 %v13745_v46, %v13759_v42 }
0x1091   :  { %12125 = vtanh.f32 %v13651_v30  ;;  %v13796_v4 = vand.u32 4294901760, %v7643_v24 }
0x109e   :  { %v12126_v32 = vpop.eup %12125 }
0x109f   :  { %7013 = vrot.lane.b32.xlu1 %v12126_v32, %s12321_s2 }
0x10f0   :  { %v6987_v23 = vpop.permute.xlu0 %6986 }
0x10f1   :  { %v13720_v62 = vmul.f32 %v13635_v17, %v6987_v23  ;;  %v7528_v17 = vld [vmem:[#allocation11 + $0x8] sm:$0xff] }
0x10f3   :  { %v7033_v18 = vrot.slane %v13720_v62, 2 }
0x10f5   :  { %7034 = vrot.lane.b32.xlu0 %v7033_v18, %s12322_s13 }
0x1111   :  { %v7014_v63 = vpop.permute.xlu1 %7013 }
0x1112   :  { %v13725_v10 = vmul.f32 %v13639_v22, %v7014_v63  ;;  %v13748_v22 = vand.u32 4294901760, %v7528_v17 }
0x1114   :  { %v7531_v47 = vrot.slane %v13725_v10, 4  ;;  %v13763_v40 = vsub.f32 %v7528_v17, %v13748_v22 }
0x1116   :  { %7532 = vrot.lane.b32.xlu1 %v7531_v47, %s12322_s13  ;;  %v13782_v27 = vand.u32 4294901760, %v13763_v40 }
0x1118   :  { %v7657_v45 = vsub.f32 %v13763_v40, %v13782_v27 }
0x111a   :  { %v13814_v32 = vand.u32 4294901760, %v7657_v45 }
0x1167   :  { %v7035_v7 = vpop.permute.xlu0 %7034 }
0x1168   :  { %v7036_v21 = vsel %vm687_vm2, %v7035_v7, 0 }
0x1169   :  { %v13730_v25 = vand.u32 4294901760, %v7036_v21 }
0x116b   :  { %v7108_v26 = vsub.f32 %v7036_v21, %v13730_v25  ;;  %11640 = vmatmul.mubr.f32.vlgmr.msra.gmra.mxu1 %v13730_v25 }
0x116c   :  { %11654 = vmatpush3.msra.mxu1 %v13654_v5  ;;  %11661 = vmatprep.mubr.msk.f32.mxu1 %vm12320_vm1, %v12319_v0 }
0x116d   :  { %v7109_v59 = vand.u32 4294901760, %v7108_v26  ;;  %11655 = vmatprep.subr.mxu1 %v12319_v0 }
0x116e   :  { %11656 = vmatpush3.msra.mxu1 %v13656_v6 }
0x116f   :  { %v7110_v43 = vsub.f32 %v7108_v26, %v7109_v59  ;;  %11657 = vmatprep.subr.mxu1 %v12319_v0 }
0x1170   :  { %11658 = vmatpush3.msra.mxu1 %v13658_v33 }
0x1171   :  { %v7111_v55 = vand.u32 4294901760, %v7110_v43  ;;  %11659 = vmatprep.subr.mxu1 %v12319_v0 }
0x1172   :  { %11660 = vmatpush3.msra.mxu1 %v13703_v15 }
0x1173   :  { %11662 = vmatmul.mubr.f32.vlgmr.msra.gmra.mxu1 %v7109_v59  ;;  %11675 = vmatprep.subr.mxu1 %v12319_v0 }
0x1174   :  { %11629 = vmatmul.mubr.f32.vlgmr.msra.gmra.mxu0 %v7111_v55  ;;  %11676 = vmatpush3.msra.mxu1 %v13654_v5 }
0x1175   :  { %11643 = vmatpush3.msra.mxu0 %v13661_v8  ;;  %11677 = vmatprep.subr.mxu1 %v12319_v0 }
0x1176   :  { %11644 = vmatprep.subr.mxu0 %v12319_v0  ;;  %11678 = vmatpush3.msra.mxu1 %v13656_v6 }
0x1177   :  { %11645 = vmatpush3.msra.mxu0 %v13664_v20  ;;  %11679 = vmatprep.subr.mxu1 %v12319_v0 }
0x1178   :  { %11646 = vmatprep.subr.mxu0 %v12319_v0  ;;  %11680 = vmatpush3.msra.mxu1 %v13658_v33 }
0x1179   :  { %11647 = vmatpush3.msra.mxu0 %v13667_v11  ;;  %11681 = vmatprep.subr.mxu1 %v12319_v0 }
0x117a   :  { %11648 = vmatprep.subr.mxu0 %v12319_v0  ;;  %11650 = vmatprep.mubr.msk.f32.mxu0 %vm12320_vm1, %v12319_v0 }
0x117b   :  { %11649 = vmatpush3.msra.mxu0 %v13706_v36  ;;  %11682 = vmatpush3.msra.mxu1 %v13703_v15 }
0x117c   :  { %11683 = vmatprep.mubr.msk.f32.mxu1 %vm12320_vm1, %v12319_v0  ;;  %11651 = vmatmul.mubr.f32.vlgmr.msra.gmra.mxu0 %v7108_v26 }
0x117d   :  { %11664 = vmatprep.subr.mxu0 %v12319_v0  ;;  %11684 = vmatmul.mubr.f32.vlgmr.msra.gmra.mxu1 %v13730_v25 }
0x117e   :  { %11665 = vmatpush3.msra.mxu0 %v13672_v60  ;;  %11697 = vmatprep.subr.mxu1 %v12319_v0 }
0x117f   :  { %11666 = vmatprep.subr.mxu0 %v12319_v0  ;;  %11698 = vmatpush3.msra.mxu1 %v13796_v4 }
0x1180   :  { %11667 = vmatpush3.msra.mxu0 %v13675_v61  ;;  %11699 = vmatprep.subr.mxu1 %v12319_v0 }
0x1181   :  { %11668 = vmatprep.subr.mxu0 %v12319_v0  ;;  %11672 = vmatprep.mubr.msk.f32.mxu0 %vm12320_vm1, %v12319_v0 }
0x1182   :  { %11669 = vmatpush3.msra.mxu0 %v13678_v34  ;;  %11700 = vmatpush3.msra.mxu1 %v13806_v48 }
0x1183   :  { %11670 = vmatprep.subr.mxu0 %v12319_v0  ;;  %11701 = vmatprep.subr.mxu1 %v12319_v0 }
0x1184   :  { %11671 = vmatpush3.msra.mxu0 %v13711_v54  ;;  %11702 = vmatpush3.msra.mxu1 %v13814_v32 }
0x1185   :  { %11673 = vmatmul.mubr.f32.vlgmr.msra.gmra.mxu0 %v13730_v25  ;;  %11703 = vmatprep.subr.mxu1 %v12319_v0 }
0x1186   :  { %11704 = vmatpush3.msra.mxu1 %v13821_v13  ;;  %11686 = vmatprep.subr.mxu0 %v12319_v0 }
0x1187   :  { %11705 = vmatprep.mubr.msk.f32.mxu1 %vm12320_vm1, %v12319_v0  ;;  %11719 = vmatprep.subr.mxu1 %v12319_v0 }
0x1188   :  { %v7533_v29 = vpop.permute.xlu1 %7532  ;;  %11687 = vmatpush3.msra.mxu0 %v13734_v31  ;;  %11694 = vmatprep.mubr.msk.f32.mxu0 %vm12320_vm1, %v12319_v0 }
0x1189   :  { %v7534_v23 = vsel %vm687_vm2, %v7533_v29, 0  ;;  %11688 = vmatprep.subr.mxu0 %v12319_v0 }
0x118a   :  { %v7605_v18 = vand.u32 4294901760, %v7534_v23  ;;  %11689 = vmatpush3.msra.mxu0 %v13741_v39 }
0x118b   :  { %11690 = vmatprep.subr.mxu0 %v12319_v0 }
0x118c   :  { %v7606_v63 = vsub.f32 %v7534_v23, %v7605_v18  ;;  %11706 = vmatmul.mubr.f32.vlgmr.msra.gmra.mxu1 %v7605_v18  ;;  %11691 = vmatpush3.msra.mxu0 %v13748_v22  ;;  %v7027_v23 = vld [vmem:[#allocation2 + $0x18] sm:$0x30] }
0x118d   :  { %11720 = vmatpush3.msra.mxu1 %v13734_v31  ;;  %11692 = vmatprep.subr.mxu0 %v12319_v0 }
0x118e   :  { %v7607_v47 = vand.u32 4294901760, %v7606_v63  ;;  %11721 = vmatprep.subr.mxu1 %v12319_v0  ;;  %11693 = vmatpush3.msra.mxu0 %v13755_v58 }
0x118f   :  { %11722 = vmatpush3.msra.mxu1 %v13741_v39  ;;  %11727 = vmatprep.mubr.msk.f32.mxu1 %vm12320_vm1, %v12319_v0 }
0x1190   :  { %v7608_v7 = vsub.f32 %v7606_v63, %v7607_v47  ;;  %11723 = vmatprep.subr.mxu1 %v12319_v0  ;;  %11708 = vmatprep.subr.mxu0 %v12319_v0 }
0x1191   :  { %11724 = vmatpush3.msra.mxu1 %v13748_v22 }
0x1192   :  { %v7609_v21 = vand.u32 4294901760, %v7608_v7  ;;  %11725 = vmatprep.subr.mxu1 %v12319_v0 }
0x1193   :  { %11726 = vmatpush3.msra.mxu1 %v13755_v58 }
0x1194   :  { %11728 = vmatmul.mubr.f32.vlgmr.msra.gmra.mxu1 %v7607_v47  ;;  %11741 = vmatprep.subr.mxu1 %v12319_v0 }
0x1195   :  { %11695 = vmatmul.mubr.f32.vlgmr.msra.gmra.mxu0 %v7609_v21  ;;  %11742 = vmatpush3.msra.mxu1 %v13734_v31 }
0x1196   :  { %11709 = vmatpush3.msra.mxu0 %v13745_v46  ;;  %11743 = vmatprep.subr.mxu1 %v12319_v0 }
0x1197   :  { %11710 = vmatprep.subr.mxu0 %v12319_v0  ;;  %11744 = vmatpush3.msra.mxu1 %v13741_v39 }
0x1198   :  { %11711 = vmatpush3.msra.mxu0 %v13753_v56  ;;  %11745 = vmatprep.subr.mxu1 %v12319_v0 }
0x1199   :  { %11712 = vmatprep.subr.mxu0 %v12319_v0  ;;  %11746 = vmatpush3.msra.mxu1 %v13748_v22 }
0x119a   :  { %11713 = vmatpush3.msra.mxu0 %v13763_v40  ;;  %11747 = vmatprep.subr.mxu1 %v12319_v0 }
0x119b   :  { %11714 = vmatprep.subr.mxu0 %v12319_v0  ;;  %11716 = vmatprep.mubr.msk.f32.mxu0 %vm12320_vm1, %v12319_v0 }
0x119c   :  { %11715 = vmatpush3.msra.mxu0 %v13773_v14  ;;  %11748 = vmatpush3.msra.mxu1 %v13755_v58 }
0x119d   :  { %11749 = vmatprep.mubr.msk.f32.mxu1 %vm12320_vm1, %v12319_v0  ;;  %11717 = vmatmul.mubr.f32.vlgmr.msra.gmra.mxu0 %v7606_v63 }
0x119e   :  { %11730 = vmatprep.subr.mxu0 %v12319_v0  ;;  %11750 = vmatmul.mubr.f32.vlgmr.msra.gmra.mxu1 %v7605_v18 }
0x119f   :  { %11731 = vmatpush3.msra.mxu0 %v13759_v42  ;;  %11738 = vmatprep.mubr.msk.f32.mxu0 %vm12320_vm1, %v12319_v0 }
0x11a0   :  { %11732 = vmatprep.subr.mxu0 %v12319_v0  ;;  %11763 = vmatprep.subr.mxu1 %v12319_v0 }
0x11a1   :  { %11733 = vmatpush3.msra.mxu0 %v13770_v49  ;;  %11764 = vmatpush3.msra.mxu1 %v13691_v37 }
0x11a2   :  { %11734 = vmatprep.subr.mxu0 %v12319_v0  ;;  %11765 = vmatprep.subr.mxu1 %v12319_v0 }
0x11a3   :  { %11735 = vmatpush3.msra.mxu0 %v13782_v27  ;;  %11766 = vmatpush3.msra.mxu1 %v13693_v51 }
0x11a4   :  { %11736 = vmatprep.subr.mxu0 %v12319_v0  ;;  %11767 = vmatprep.subr.mxu1 %v12319_v0 }
0x11a5   :  { %11737 = vmatpush3.msra.mxu0 %v13792_v2  ;;  %11768 = vmatpush3.msra.mxu1 %v13696_v12 }
0x11a6   :  { %11739 = vmatmul.mubr.f32.vlgmr.msra.gmra.mxu0 %v7605_v18  ;;  %11769 = vmatprep.subr.mxu1 %v12319_v0 }
0x11a7   :  { %11770 = vmatpush3.msra.mxu1 %v13715_v57  ;;  %11752 = vmatprep.subr.mxu0 %v12319_v0 }
0x11a8   :  { %11771 = vmatprep.mubr.msk.f32.mxu1 %vm12320_vm1, %v12319_v0  ;;  %11785 = vmatprep.subr.mxu1 %v12319_v0 }
0x11a9   :  { %11753 = vmatpush3.msra.mxu0 %v13654_v5  ;;  %11760 = vmatprep.mubr.msk.f32.mxu0 %vm12320_vm1, %v12319_v0 }
0x11aa   :  { %11754 = vmatprep.subr.mxu0 %v12319_v0 }
0x11ab   :  { %11755 = vmatpush3.msra.mxu0 %v13656_v6 }
0x11ac   :  { %11756 = vmatprep.subr.mxu0 %v12319_v0 }
0x11ad   :  { %11757 = vmatpush3.msra.mxu0 %v13658_v33 }
0x11ae   :  { %11758 = vmatprep.subr.mxu0 %v12319_v0 }
0x11af   :  { %11759 = vmatpush3.msra.mxu0 %v13703_v15 }
0x11b0   :  { %11774 = vmatprep.subr.mxu0 %v12319_v0 }
0x122b   :  { %v7204_v37 = vpop.f32.mrf.mxu1 }
0x122d   :  { %v11641_v51 = vpop.f32.mrf.mxu1 }
0x1233   :  { %v7361_v12 = vpop.f32.mrf.mxu1 }
0x1234   :  { %v7113_v57 = vpop.f32.mrf.mxu0 }
0x1235   :  { %v11663_v28 = vpop.f32.mrf.mxu1  ;;  %v7205_v59 = vadd.f32 %v7204_v37, %v7113_v57 }
0x1236   :  { %v11630_v25 = vpop.f32.mrf.mxu0 }
0x123c   :  { %v7284_v26 = vpop.f32.mrf.mxu0 }
0x123d   :  { %v7519_v9 = vpop.f32.mrf.mxu1  ;;  %v7285_v52 = vadd.f32 %v7284_v26, %v7205_v59 }
0x123e   :  { %v11652_v17 = vpop.f32.mrf.mxu0 }
0x123f   :  { %v11685_v43 = vpop.f32.mrf.mxu1  ;;  %v7362_v55 = vadd.f32 %v7361_v12, %v7285_v52 }
0x1245   :  { %v7444_v24 = vpop.f32.mrf.mxu0 }
0x1246   :  { %v7445_v35 = vadd.f32 %v7444_v24, %v7362_v55 }
0x1247   :  { %v11674_v45 = vpop.f32.mrf.mxu0 }
0x1248   :  { %v7520_v50 = vadd.f32 %v7519_v9, %v7445_v35  ;;  %v7028_v45 = vld [vmem:[#allocation2] sm:$0xc] }
0x124a   :  { %v7524_v29 = vrot.slane %v7520_v50, 4 }
0x124c   :  { %v7526_v18 = vadd.f32 %v7524_v29, %v7027_v23  ;;  %v7702_v63 = vpop.f32.mrf.mxu1 }
0x124e   :  { %12127 = vtanh.f32 %v7526_v18  ;;  %v11707_v47 = vpop.f32.mrf.mxu1  ;;  %v10271_v23 = vmul.f32 -1.442695, %v7526_v18  ;;  %v8033_v18 = vrot.slane %v13645_v44, 6 }
0x1254   :  { %v7859_v7 = vpop.f32.mrf.mxu1 }
0x1255   :  { %v7611_v21 = vpop.f32.mrf.mxu0 }
0x1256   :  { %v11729_v51 = vpop.f32.mrf.mxu1  ;;  %v7703_v12 = vadd.f32 %v7702_v63, %v7611_v21 }
0x1257   :  { %v11696_v28 = vpop.f32.mrf.mxu0 }
0x125b   :  { %v12128_v25 = vpop.eup %12127 }
0x125c   :  { %8037 = vrot.lane.b32.xlu0 %v12128_v25, %s12321_s2 }
0x125d   :  { %v7782_v37 = vpop.f32.mrf.mxu0 }
0x125e   :  { %v8017_v57 = vpop.f32.mrf.mxu1  ;;  %v7783_v17 = vadd.f32 %v7782_v37, %v7703_v12 }
0x125f   :  { %v11718_v26 = vpop.f32.mrf.mxu0 }
0x1260   :  { %v11751_v59 = vpop.f32.mrf.mxu1  ;;  %v7860_v9 = vadd.f32 %v7859_v7, %v7783_v17 }
0x1266   :  { %v7942_v43 = vpop.f32.mrf.mxu0 }
0x1267   :  { %v7943_v52 = vadd.f32 %v7942_v43, %v7860_v9 }
0x1268   :  { %v11740_v55 = vpop.f32.mrf.mxu0 }
0x1269   :  { %v8018_v24 = vadd.f32 %v8017_v57, %v7943_v52  ;;  %v8060_v52 = vrot.slane %v13651_v30, 2 }
0x126b   :  { %v8022_v35 = vrot.slane %v8018_v24, 6 }
0x126d   :  { %v8024_v50 = vadd.f32 %v8022_v35, %v7028_v45 }
0x126f   :  { %12129 = vtanh.f32 %v8024_v50  ;;  %v10272_v63 = vmul.f32 -1.442695, %v8024_v50 }
0x1270   :  { %12131 = vpow2.f32 %v10271_v23 }
0x127c   :  { %v12130_v29 = vpop.eup %12129 }
0x127d   :  { %8064 = vrot.lane.b32.xlu1 %v12130_v29, %s12321_s2  ;;  %v12132_v47 = vpop.eup %12131 }
0x127e   :  { %v8028_v51 = vadd.f32 1.0, %v12132_v47 }
0x1280   :  { %12133 = vrcp.f32 %v8028_v51 }
0x1281   :  { %12135 = vpow2.f32 %v10272_v63 }
0x128d   :  { %v12134_v21 = vpop.eup %12133 }
0x128e   :  { %v12136_v25 = vpop.eup %12135  ;;  %v8035_v59 = vmul.f32 %v12134_v21, %v8033_v18 }
0x128f   :  { %v8055_v37 = vadd.f32 1.0, %v12136_v25 }
0x1291   :  { %12137 = vrcp.f32 %v8055_v37 }
0x129e   :  { %v12138_v57 = vpop.eup %12137 }
0x129f   :  { %v8062_v55 = vmul.f32 %v12138_v57, %v8060_v52 }
0x12ce   :  { %v8038_v7 = vpop.permute.xlu0 %8037 }
0x12cf   :  { %v8040_v28 = vmul.f32 %v12134_v21, %v8038_v7 }
0x12d1   :  { %8042 = vrot.lane.b32.xlu0 %v8040_v28, %s12322_s13 }
0x12ef   :  { %v8065_v12 = vpop.permute.xlu1 %8064 }
0x12f0   :  { %v8067_v26 = vmul.f32 %v12138_v57, %v8065_v12 }
0x12f2   :  { %8069 = vrot.lane.b32.xlu1 %v8067_v26, %s12322_s13 }
0x1343   :  { %v8043_v17 = vpop.permute.xlu0 %8042 }
0x1344   :  { %v13910_v9 = vadd.f32 %v8043_v17, %v8035_v59 }
0x1346   :  { %12139 = vtanh.f32 %v13910_v9 }
0x1353   :  { %v12140_v43 = vpop.eup %12139 }
0x1354   :  { %8048 = vrot.lane.b32.xlu0 %v12140_v43, %s12321_s2 }
0x1364   :  { %v8070_v24 = vpop.permute.xlu1 %8069 }
0x1365   :  { %v13915_v35 = vadd.f32 %v8070_v24, %v8062_v55 }
0x1367   :  { %12141 = vtanh.f32 %v13915_v35 }
0x1374   :  { %v12142_v45 = vpop.eup %12141 }
0x1375   :  { %8075 = vrot.lane.b32.xlu1 %v12142_v45, %s12321_s2 }
0x13c6   :  { %v8049_v44 = vpop.permute.xlu0 %8048 }
0x13c7   :  { %v13919_v50 = vmul.f32 %v12134_v21, %v8049_v44 }
0x13c9   :  { %v8095_v29 = vrot.slane %v13919_v50, 4 }
0x13cb   :  { %8096 = vrot.lane.b32.xlu0 %v8095_v29, %s12322_s13 }
0x13e7   :  { %v8076_v23 = vpop.permute.xlu1 %8075 }
0x13e8   :  { %v13923_v47 = vmul.f32 %v12138_v57, %v8076_v23 }
0x13ea   :  { %v8593_v30 = vrot.slane %v13923_v47, 2 }
0x13ec   :  { %8594 = vrot.lane.b32.xlu1 %v8593_v30, %s12322_s13 }
0x143d   :  { %v8097_v51 = vpop.permute.xlu0 %8096 }
0x143e   :  { %v8098_v63 = vsel %vm687_vm2, %v8097_v51, 0 }
0x143f   :  { %v8169_v7 = vand.u32 4294901760, %v8098_v63 }
0x1441   :  { %v8170_v28 = vsub.f32 %v8098_v63, %v8169_v7  ;;  %11772 = vmatmul.mubr.f32.vlgmr.msra.gmra.mxu1 %v8169_v7  ;;  %v8090_v63 = vld [vmem:[#allocation2] sm:$0x3] }
0x1442   :  { %11786 = vmatpush3.msra.mxu1 %v13654_v5  ;;  %11793 = vmatprep.mubr.msk.f32.mxu1 %vm12320_vm1, %v12319_v0 }
0x1443   :  { %v8171_v21 = vand.u32 4294901760, %v8170_v28  ;;  %11787 = vmatprep.subr.mxu1 %v12319_v0 }
0x1444   :  { %11788 = vmatpush3.msra.mxu1 %v13656_v6 }
0x1445   :  { %v8172_v25 = vsub.f32 %v8170_v28, %v8171_v21  ;;  %11789 = vmatprep.subr.mxu1 %v12319_v0 }
0x1446   :  { %11790 = vmatpush3.msra.mxu1 %v13658_v33 }
0x1447   :  { %v8173_v37 = vand.u32 4294901760, %v8172_v25  ;;  %11791 = vmatprep.subr.mxu1 %v12319_v0 }
0x1448   :  { %11792 = vmatpush3.msra.mxu1 %v13703_v15 }
0x1449   :  { %11794 = vmatmul.mubr.f32.vlgmr.msra.gmra.mxu1 %v8171_v21  ;;  %11807 = vmatprep.subr.mxu1 %v12319_v0 }
0x144a   :  { %11761 = vmatmul.mubr.f32.vlgmr.msra.gmra.mxu0 %v8173_v37  ;;  %11808 = vmatpush3.msra.mxu1 %v13654_v5 }
0x144b   :  { %11775 = vmatpush3.msra.mxu0 %v13661_v8  ;;  %11809 = vmatprep.subr.mxu1 %v12319_v0 }
0x144c   :  { %11776 = vmatprep.subr.mxu0 %v12319_v0  ;;  %11810 = vmatpush3.msra.mxu1 %v13656_v6 }
0x144d   :  { %11777 = vmatpush3.msra.mxu0 %v13664_v20  ;;  %11811 = vmatprep.subr.mxu1 %v12319_v0 }
0x144e   :  { %11778 = vmatprep.subr.mxu0 %v12319_v0  ;;  %11812 = vmatpush3.msra.mxu1 %v13658_v33 }
0x144f   :  { %11779 = vmatpush3.msra.mxu0 %v13667_v11  ;;  %11813 = vmatprep.subr.mxu1 %v12319_v0 }
0x1450   :  { %11780 = vmatprep.subr.mxu0 %v12319_v0  ;;  %11782 = vmatprep.mubr.msk.f32.mxu0 %vm12320_vm1, %v12319_v0 }
0x1451   :  { %11781 = vmatpush3.msra.mxu0 %v13706_v36  ;;  %11814 = vmatpush3.msra.mxu1 %v13703_v15 }
0x1452   :  { %11815 = vmatprep.mubr.msk.f32.mxu1 %vm12320_vm1, %v12319_v0  ;;  %11783 = vmatmul.mubr.f32.vlgmr.msra.gmra.mxu0 %v8170_v28 }
0x1453   :  { %11796 = vmatprep.subr.mxu0 %v12319_v0  ;;  %11816 = vmatmul.mubr.f32.vlgmr.msra.gmra.mxu1 %v8169_v7 }
0x1454   :  { %11797 = vmatpush3.msra.mxu0 %v13672_v60  ;;  %11829 = vmatprep.subr.mxu1 %v12319_v0 }
0x1455   :  { %11798 = vmatprep.subr.mxu0 %v12319_v0  ;;  %11830 = vmatpush3.msra.mxu1 %v13796_v4 }
0x1456   :  { %11799 = vmatpush3.msra.mxu0 %v13675_v61  ;;  %11831 = vmatprep.subr.mxu1 %v12319_v0 }
0x1457   :  { %11800 = vmatprep.subr.mxu0 %v12319_v0  ;;  %11804 = vmatprep.mubr.msk.f32.mxu0 %vm12320_vm1, %v12319_v0 }
0x1458   :  { %11801 = vmatpush3.msra.mxu0 %v13678_v34  ;;  %11832 = vmatpush3.msra.mxu1 %v13806_v48 }
0x1459   :  { %11802 = vmatprep.subr.mxu0 %v12319_v0  ;;  %11833 = vmatprep.subr.mxu1 %v12319_v0 }
0x145a   :  { %11803 = vmatpush3.msra.mxu0 %v13711_v54  ;;  %11834 = vmatpush3.msra.mxu1 %v13814_v32 }
0x145b   :  { %11805 = vmatmul.mubr.f32.vlgmr.msra.gmra.mxu0 %v8169_v7  ;;  %11835 = vmatprep.subr.mxu1 %v12319_v0 }
0x145c   :  { %11836 = vmatpush3.msra.mxu1 %v13821_v13  ;;  %11818 = vmatprep.subr.mxu0 %v12319_v0 }
0x145d   :  { %11837 = vmatprep.mubr.msk.f32.mxu1 %vm12320_vm1, %v12319_v0  ;;  %11851 = vmatprep.subr.mxu1 %v12319_v0 }
0x145e   :  { %v8595_v5 = vpop.permute.xlu1 %8594  ;;  %11819 = vmatpush3.msra.mxu0 %v13734_v31  ;;  %11826 = vmatprep.mubr.msk.f32.mxu0 %vm12320_vm1, %v12319_v0 }
0x145f   :  { %v8596_v6 = vsel %vm687_vm2, %v8595_v5, 0  ;;  %11820 = vmatprep.subr.mxu0 %v12319_v0 }
0x1460   :  { %v8667_v33 = vand.u32 4294901760, %v8596_v6  ;;  %11821 = vmatpush3.msra.mxu0 %v13741_v39 }
0x1461   :  { %11822 = vmatprep.subr.mxu0 %v12319_v0 }
0x1462   :  { %v8668_v8 = vsub.f32 %v8596_v6, %v8667_v33  ;;  %11838 = vmatmul.mubr.f32.vlgmr.msra.gmra.mxu1 %v8667_v33  ;;  %11823 = vmatpush3.msra.mxu0 %v13748_v22 }
0x1463   :  { %11852 = vmatpush3.msra.mxu1 %v13734_v31  ;;  %11824 = vmatprep.subr.mxu0 %v12319_v0 }
0x1464   :  { %v8669_v20 = vand.u32 4294901760, %v8668_v8  ;;  %11853 = vmatprep.subr.mxu1 %v12319_v0  ;;  %11825 = vmatpush3.msra.mxu0 %v13755_v58 }
0x1465   :  { %11854 = vmatpush3.msra.mxu1 %v13741_v39  ;;  %11859 = vmatprep.mubr.msk.f32.mxu1 %vm12320_vm1, %v12319_v0 }
0x1466   :  { %v8670_v11 = vsub.f32 %v8668_v8, %v8669_v20  ;;  %11855 = vmatprep.subr.mxu1 %v12319_v0  ;;  %11840 = vmatprep.subr.mxu0 %v12319_v0 }
0x1467   :  { %11856 = vmatpush3.msra.mxu1 %v13748_v22 }
0x1468   :  { %v8671_v60 = vand.u32 4294901760, %v8670_v11  ;;  %11857 = vmatprep.subr.mxu1 %v12319_v0 }
0x1469   :  { %11858 = vmatpush3.msra.mxu1 %v13755_v58 }
0x146a   :  { %11860 = vmatmul.mubr.f32.vlgmr.msra.gmra.mxu1 %v8669_v20  ;;  %11873 = vmatprep.subr.mxu1 %v12319_v0 }
0x146b   :  { %11827 = vmatmul.mubr.f32.vlgmr.msra.gmra.mxu0 %v8671_v60  ;;  %11874 = vmatpush3.msra.mxu1 %v13734_v31 }
0x146c   :  { %11841 = vmatpush3.msra.mxu0 %v13745_v46  ;;  %11875 = vmatprep.subr.mxu1 %v12319_v0 }
0x146d   :  { %11842 = vmatprep.subr.mxu0 %v12319_v0  ;;  %11876 = vmatpush3.msra.mxu1 %v13741_v39 }
0x146e   :  { %11843 = vmatpush3.msra.mxu0 %v13753_v56  ;;  %11877 = vmatprep.subr.mxu1 %v12319_v0 }
0x146f   :  { %11844 = vmatprep.subr.mxu0 %v12319_v0  ;;  %11878 = vmatpush3.msra.mxu1 %v13748_v22 }
0x1470   :  { %11845 = vmatpush3.msra.mxu0 %v13763_v40  ;;  %11879 = vmatprep.subr.mxu1 %v12319_v0 }
0x1471   :  { %11846 = vmatprep.subr.mxu0 %v12319_v0  ;;  %11848 = vmatprep.mubr.msk.f32.mxu0 %vm12320_vm1, %v12319_v0 }
0x1472   :  { %11847 = vmatpush3.msra.mxu0 %v13773_v14  ;;  %11880 = vmatpush3.msra.mxu1 %v13755_v58 }
0x1473   :  { %11881 = vmatprep.mubr.msk.f32.mxu1 %vm12320_vm1, %v12319_v0  ;;  %11849 = vmatmul.mubr.f32.vlgmr.msra.gmra.mxu0 %v8668_v8 }
0x1474   :  { %11862 = vmatprep.subr.mxu0 %v12319_v0  ;;  %11882 = vmatmul.mubr.f32.vlgmr.msra.gmra.mxu1 %v8667_v33 }
0x1475   :  { %11863 = vmatpush3.msra.mxu0 %v13759_v42  ;;  %11870 = vmatprep.mubr.msk.f32.mxu0 %vm12320_vm1, %v12319_v0 }
0x1476   :  { %11864 = vmatprep.subr.mxu0 %v12319_v0 }
0x1477   :  { %11865 = vmatpush3.msra.mxu0 %v13770_v49 }
0x1478   :  { %11866 = vmatprep.subr.mxu0 %v12319_v0 }
0x1479   :  { %11867 = vmatpush3.msra.mxu0 %v13782_v27 }
0x147a   :  { %11868 = vmatprep.subr.mxu0 %v12319_v0 }
0x147b   :  { %11869 = vmatpush3.msra.mxu0 %v13792_v2  ;;  %v8089_v2 = vld [vmem:[#allocation2 + $0x18] sm:$0xc0] }
0x147c   :  { %11871 = vmatmul.mubr.f32.vlgmr.msra.gmra.mxu0 %v8667_v33 }
0x1501   :  { %v8266_v61 = vpop.f32.mrf.mxu1 }
0x1503   :  { %v11773_v34 = vpop.f32.mrf.mxu1 }
0x1509   :  { %v8423_v15 = vpop.f32.mrf.mxu1 }
0x150a   :  { %v8175_v36 = vpop.f32.mrf.mxu0 }
0x150b   :  { %v11795_v54 = vpop.f32.mrf.mxu1  ;;  %v8267_v22 = vadd.f32 %v8266_v61, %v8175_v36 }
0x150c   :  { %v11762_v31 = vpop.f32.mrf.mxu0 }
0x1512   :  { %v8346_v39 = vpop.f32.mrf.mxu0 }
0x1513   :  { %v8581_v46 = vpop.f32.mrf.mxu1  ;;  %v8347_v42 = vadd.f32 %v8346_v39, %v8267_v22 }
0x1514   :  { %v11784_v56 = vpop.f32.mrf.mxu0 }
0x1515   :  { %v11817_v58 = vpop.f32.mrf.mxu1  ;;  %v8424_v40 = vadd.f32 %v8423_v15, %v8347_v42  ;;  %v9092_v15 = vrot.slane %v13910_v9, 6 }
0x151b   :  { %v8506_v49 = vpop.f32.mrf.mxu0 }
0x151c   :  { %v8507_v14 = vadd.f32 %v8506_v49, %v8424_v40 }
0x151d   :  { %v11806_v27 = vpop.f32.mrf.mxu0 }
0x151e   :  { %v8582_v0 = vadd.f32 %v8581_v46, %v8507_v14  ;;  %v9119_v46 = vrot.slane %v13915_v35, 2  ;;  %v9159_v35 = vld [vmem:[#allocation14 + $0x18] sm:$0xff]  ;;  %v9156_v27 = vld [vmem:[#allocation14] sm:$0xff] }
0x1520   :  { %v8586_v4 = vrot.slane %v8582_v0, 2 }
0x1522   :  { %v8588_v48 = vadd.f32 %v8586_v4, %v8089_v2  ;;  %v8764_v32 = vpop.f32.mrf.mxu1 }
0x1524   :  { %12143 = vtanh.f32 %v8588_v48  ;;  %v11839_v13 = vpop.f32.mrf.mxu1  ;;  %v10273_v21 = vmul.f32 -1.442695, %v8588_v48  ;;  %v14082_v48 = vand.u32 4294901760, %v9156_v27 }
0x152a   :  { %v8921_v57 = vpop.f32.mrf.mxu1 }
0x152b   :  { %v8673_v12 = vpop.f32.mrf.mxu0 }
0x152c   :  { %v11861_v26 = vpop.f32.mrf.mxu1  ;;  %v8765_v52 = vadd.f32 %v8764_v32, %v8673_v12  ;;  %v14092_v12 = vsub.f32 %v9156_v27, %v14082_v48 }
0x152d   :  { %v11828_v18 = vpop.f32.mrf.mxu0 }
0x1531   :  { %v12144_v59 = vpop.eup %12143 }
0x1532   :  { %9096 = vrot.lane.b32.xlu1 %v12144_v59, %s12321_s2  ;;  %v14099_v59 = vand.u32 4294901760, %v14092_v12 }
0x1533   :  { %v8844_v17 = vpop.f32.mrf.mxu0 }
0x1534   :  { %v9079_v43 = vpop.f32.mrf.mxu1  ;;  %v8845_v45 = vadd.f32 %v8844_v17, %v8765_v52 }
0x1535   :  { %v11850_v55 = vpop.f32.mrf.mxu0 }
0x1536   :  { %v11883_v24 = vpop.f32.mrf.mxu1  ;;  %v8922_v44 = vadd.f32 %v8921_v57, %v8845_v45 }
0x153c   :  { %v9004_v29 = vpop.f32.mrf.mxu0 }
0x153d   :  { %v9005_v23 = vadd.f32 %v9004_v29, %v8922_v44 }
0x153e   :  { %v11872_v30 = vpop.f32.mrf.mxu0 }
0x153f   :  { %v9080_v51 = vadd.f32 %v9079_v43, %v9005_v23  ;;  %v9304_v43 = vsub.f32 %v14092_v12, %v14099_v59 }
0x1541   :  { %v9083_v7 = vadd.f32 %v9080_v51, %v8090_v63  ;;  %v9305_v55 = vand.u32 4294901760, %v9304_v43 }
0x1543   :  { %12145 = vtanh.f32 %v9083_v7  ;;  %v10274_v5 = vmul.f32 -1.442695, %v9083_v7 }
0x1544   :  { %12147 = vpow2.f32 %v10273_v21 }
0x1550   :  { %v12146_v28 = vpop.eup %12145 }
0x1551   :  { %9123 = vrot.lane.b32.xlu0 %v12146_v28, %s12321_s2  ;;  %v12148_v25 = vpop.eup %12147 }
0x1552   :  { %v9087_v37 = vadd.f32 1.0, %v12148_v25 }
0x1554   :  { %12149 = vrcp.f32 %v9087_v37 }
0x1555   :  { %12151 = vpow2.f32 %v10274_v5  ;;  %v9153_v5 = vld [vmem:[#allocation13 + $0x18] sm:$0xff] }
0x1561   :  { %v12150_v6 = vpop.eup %12149 }
0x1562   :  { %v12152_v20 = vpop.eup %12151  ;;  %v9094_v36 = vmul.f32 %v12150_v6, %v9092_v15  ;;  %v9151_v15 = vld [vmem:[#allocation13 + $0x8] sm:$0xff] }
0x1563   :  { %v9114_v11 = vadd.f32 1.0, %v12152_v20  ;;  %v14134_v20 = vand.u32 4294901760, %v9153_v5 }
0x1565   :  { %12153 = vrcp.f32 %v9114_v11  ;;  %v9152_v11 = vld [vmem:[#allocation13 + $0x10] sm:$0xff] }
0x1572   :  { %v14030_v60 = vpop.eup %12153 }
0x1573   :  { %v9121_v22 = vmul.f32 %v14030_v60, %v9119_v46  ;;  %v9150_v46 = vld [vmem:[#allocation13] sm:$0xff] }
0x15a4   :  { %v9097_v33 = vpop.permute.xlu1 %9096 }
0x15a5   :  { %v9099_v8 = vmul.f32 %v12150_v6, %v9097_v33 }
0x15a7   :  { %9101 = vrot.lane.b32.xlu1 %v9099_v8, %s12322_s13 }
0x15c3   :  { %v9124_v61 = vpop.permute.xlu0 %9123 }
0x15c4   :  { %v9126_v34 = vmul.f32 %v14030_v60, %v9124_v61 }
0x15c6   :  { %9128 = vrot.lane.b32.xlu0 %v9126_v34, %s12322_s13 }
0x1619   :  { %v9102_v54 = vpop.permute.xlu1 %9101 }
0x161a   :  { %v9104_v31 = vadd.f32 %v9102_v54, %v9094_v36 }
0x161c   :  { %12155 = vtanh.f32 %v9104_v31  ;;  %v14141_v31 = vand.u32 4294901760, %v9152_v11 }
0x1629   :  { %v12156_v39 = vpop.eup %12155 }
0x162a   :  { %9107 = vrot.lane.b32.xlu1 %v12156_v39, %s12321_s2  ;;  %v14145_v39 = vsub.f32 %v9153_v5, %v14134_v20 }
0x162e   :  { %7023 = vrot.lane.b32.xlu1 %v13725_v10, %s12322_s13 }
0x1638   :  { %v9129_v56 = vpop.permute.xlu0 %9128 }
0x1639   :  { %v9131_v58 = vadd.f32 %v9129_v56, %v9121_v22  ;;  %v14148_v56 = vand.u32 4294901760, %v9151_v15 }
0x163b   :  { %12157 = vtanh.f32 %v9131_v58 }
0x1648   :  { %v12158_v42 = vpop.eup %12157 }
0x1649   :  { %9134 = vrot.lane.b32.xlu0 %v12158_v42, %s12321_s2 }
0x164d   :  { %5964 = vrot.lane.b32.xlu0 %v13522_v53, %s12322_s13 }
0x1651   :  { %8085 = vrot.lane.b32.xlu0 %v13923_v47, %s12322_s13  ;;  %v14055_v47 = vand.u32 4294901760, %v9159_v35 }
0x1653   :  { %11884 = vmatprep.subr.mxu0 %v14055_v47 }
0x1654   :  { %11885 = vmatpush3.msra.mxu0 %v14055_v47 }
0x1655   :  { %1725 = vrot.lane.b32.xlu0 %v12726_v38, %s12322_s13  ;;  %v9158_v38 = vld [vmem:[#allocation14 + $0x10] sm:$0xff] }
0x1656   :  { %v14060_v40 = vand.u32 4294901760, %v9158_v38 }
0x1658   :  { %v14068_v49 = vsub.f32 %v9158_v38, %v14060_v40  ;;  %11886 = vmatprep.subr.mxu0 %v14060_v40 }
0x1659   :  { %3849 = vrot.lane.b32.xlu0 %v13127_v19, %s12322_s13  ;;  %v14058_v19 = vsub.f32 %v9159_v35, %v14055_v47  ;;  %11887 = vmatpush3.msra.mxu0 %v14060_v40  ;;  %v14163_v35 = vsub.f32 %v9151_v15, %v14148_v56 }
0x165a   :  { %v14077_v4 = vand.u32 4294901760, %v14068_v49 }
0x165c   :  { %v9290_v13 = vsub.f32 %v14068_v49, %v14077_v4 }
0x165d   :  { %3844 = vrot.lane.b32.xlu0 %v13123_v1, %s12322_s13  ;;  %v9157_v1 = vld [vmem:[#allocation14 + $0x8] sm:$0xff] }
0x165e   :  { %v14070_v14 = vand.u32 4294901760, %v9157_v1  ;;  %v9291_v26 = vand.u32 4294901760, %v9290_v13 }
0x1660   :  { %v14080_v2 = vsub.f32 %v9157_v1, %v14070_v14  ;;  %11888 = vmatprep.subr.mxu0 %v14070_v14 }
0x1661   :  { %7018 = vrot.lane.b32.xlu0 %v13720_v62, %s12322_s13  ;;  %v14065_v62 = vand.u32 4294901760, %v14058_v19  ;;  %11889 = vmatpush3.msra.mxu0 %v14070_v14 }
0x1662   :  { %v14089_v57 = vand.u32 4294901760, %v14080_v2  ;;  %11890 = vmatprep.subr.mxu0 %v14082_v48 }
0x1663   :  { %v9283_v0 = vsub.f32 %v14058_v19, %v14065_v62  ;;  %11891 = vmatpush3.msra.mxu0 %v14082_v48 }
0x1664   :  { %v9297_v18 = vsub.f32 %v14080_v2, %v14089_v57  ;;  %11906 = vmatprep.subr.mxu0 %v14058_v19 }
0x1665   :  { %v9284_v32 = vand.u32 4294901760, %v9283_v0 }
0x1666   :  { %v9298_v17 = vand.u32 4294901760, %v9297_v18 }
0x1667   :  { %11895 = vmatprep.subr.mxu1 %v9284_v32 }
0x1668   :  { %11896 = vmatpush3.msra.mxu1 %v9284_v32 }
0x1669   :  { %11897 = vmatprep.subr.mxu1 %v9291_v26 }
0x166a   :  { %11898 = vmatpush3.msra.mxu1 %v9291_v26 }
0x166b   :  { %11899 = vmatprep.subr.mxu1 %v9298_v17 }
0x166c   :  { %11900 = vmatpush3.msra.mxu1 %v9298_v17 }
0x166d   :  { %11901 = vmatprep.subr.mxu1 %v9305_v55 }
0x166e   :  { %11902 = vmatpush3.msra.mxu1 %v9305_v55 }
0x166f   :  { %11917 = vmatprep.subr.mxu1 %v14055_v47 }
0x169c   :  { %v9108_v10 = vpop.permute.xlu1 %9107 }
0x169d   :  { %v9110_v9 = vmul.f32 %v12150_v6, %v9108_v10  ;;  %v14153_v10 = vsub.f32 %v9152_v11, %v14141_v31 }
0x169f   :  { %9139 = vrot.lane.b32.xlu0 %v9110_v9, %s12322_s13  ;;  %v14155_v9 = vand.u32 4294901760, %v9150_v46  ;;  %v14170_v1 = vand.u32 4294901760, %v14153_v10 }
0x16a0   :  { %v7024_v53 = vpop.permute.xlu1 %7023 }
0x16a1   :  { %7026 = vst.msk [vmem:[#allocation4] sm:$0x30] %vm2789_vm4, %v7024_v53  ;;  %v14159_v53 = vand.u32 4294901760, %v14145_v39  ;;  %v14173_v27 = vsub.f32 %v9150_v46, %v14155_v9  ;;  %v9824_v13 = vsub.f32 %v14153_v10, %v14170_v1 }
0x16a3   :  { %v9817_v0 = vsub.f32 %v14145_v39, %v14159_v53  ;;  %v14192_v26 = vand.u32 4294901760, %v14173_v27 }
0x16a5   :  { %v9838_v17 = vsub.f32 %v14173_v27, %v14192_v26 }
0x16bb   :  { %v9135_v52 = vpop.permute.xlu0 %9134 }
0x16bc   :  { %v9137_v24 = vmul.f32 %v14030_v60, %v9135_v52 }
0x16be   :  { %9144 = vrot.lane.b32.xlu1 %v9137_v24, %s12322_s13 }
0x16bf   :  { %v5965_v45 = vpop.permute.xlu0 %5964 }
0x16c0   :  { %5967 = vst.msk [vmem:[#allocation4] sm:$0xc0] %vm1728_vm5, %v5965_v45 }
0x16c2   :  { %2786 = vrot.lane.b32.xlu1 %v12929_v16, %s12322_s13 }
0x16c3   :  { %v8086_v44 = vpop.permute.xlu0 %8085 }
0x16c4   :  { %8088 = vst.msk [vmem:[#allocation4] sm:$0xc] %vm2783_vm6, %v8086_v44 }
0x16c6   :  { %2780 = vrot.lane.b32.xlu1 %v12924_v3, %s12322_s13 }
0x16c7   :  { %v1726_v29 = vpop.permute.xlu0 %1725 }
0x16c8   :  { %1729 = vst.msk [vmem:[#allocation4 + $0x8] sm:$0xc0] %vm1728_vm5, %v1726_v29 }
0x16ca   :  { %4903 = vrot.lane.b32.xlu1 %v13324_v41, %s12322_s13 }
0x16cb   :  { %v3850_v23 = vpop.permute.xlu0 %3849 }
0x16cc   :  { %3852 = vst.msk [vmem:[#allocation4 + $0x8] sm:$0xc] %vm2783_vm6, %v3850_v23 }
0x16ce   :  { %8080 = vrot.lane.b32.xlu1 %v13919_v50, %s12322_s13 }
0x16cf   :  { %v3845_v30 = vpop.permute.xlu0 %3844 }
0x16d0   :  { %3847 = vst.msk [vmem:[#allocation3] sm:$0x30] %vm2789_vm4, %v3845_v30 }
0x16d3   :  { %v7019_v16 = vpop.permute.xlu0 %7018 }
0x16d4   :  { %7021 = vst.msk [vmem:[#allocation3 + $0x8] sm:$0xc] %vm2783_vm6, %v7019_v16 }
0x1711   :  { %v9140_v51 = vpop.permute.xlu0 %9139 }
0x1712   :  { %9142 = vst.msk [vmem:[#allocation3 + $0x8] sm:$0xc0] %vm1728_vm5, %v9140_v51 }
0x1730   :  { %v9145_v3 = vpop.permute.xlu1 %9144 }
0x1731   :  { %9147 = vst.msk [vmem:[#allocation4] sm:$0x3] %vm1722_vm3, %v9145_v3 }
0x1734   :  { %v2787_v63 = vpop.permute.xlu1 %2786 }
0x1735   :  { %2790 = vst.msk [vmem:[#allocation4 + $0x8] sm:$0x30] %vm2789_vm4, %v2787_v63 }
0x1738   :  { %v2781_v41 = vpop.permute.xlu1 %2780  ;;  %v9154_v7 = vld [vmem:[#allocation4] sm:$0xff] }
0x1739   :  { %2784 = vst.msk [vmem:[#allocation3] sm:$0xc] %vm2783_vm6, %v2781_v41  ;;  %v9161_v50 = vsel %vm687_vm2, %v9154_v7, 0 }
0x173a   :  { %v14126_v28 = vand.u32 4294901760, %v9161_v50 }
0x173c   :  { %v4904_v21 = vpop.permute.xlu1 %4903  ;;  %11903 = vmatprep.mubr.f32.mxu1 %v14126_v28  ;;  %v9155_v25 = vld [vmem:[#allocation4 + $0x8] sm:$0xff]  ;;  %v9236_v37 = vsub.f32 %v9161_v50, %v14126_v28 }
0x173d   :  { %4906 = vst.msk [vmem:[#allocation3] sm:$0xc0] %vm1728_vm5, %v4904_v21  ;;  %v9164_v6 = vsel %vm687_vm2, %v9155_v25, 0 }
0x173e   :  { %v14132_v33 = vand.u32 4294901760, %v9164_v6  ;;  %v9237_v8 = vand.u32 4294901760, %v9236_v37 }
0x1740   :  { %v8081_v60 = vpop.permute.xlu1 %8080  ;;  %v9246_v61 = vsub.f32 %v9164_v6, %v14132_v33  ;;  %11904 = vmatmul.mubr.f32.vlgmr.msra.gmra.mxu1 %v14132_v33  ;;  %v9238_v34 = vsub.f32 %v9236_v37, %v9237_v8 }
0x1741   :  { %8083 = vst.msk [vmem:[#allocation3 + $0x8] sm:$0x30] %vm2789_vm4, %v8081_v60  ;;  %11918 = vmatpush3.msra.mxu1 %v14055_v47  ;;  %11925 = vmatprep.mubr.f32.mxu1 %v9237_v8 }
0x1742   :  { %11919 = vmatprep.subr.mxu1 %v14060_v40  ;;  %v9239_v36 = vand.u32 4294901760, %v9238_v34  ;;  %v9247_v54 = vand.u32 4294901760, %v9246_v61 }
0x1743   :  { %11920 = vmatpush3.msra.mxu1 %v14060_v40 }
0x1744   :  { %11921 = vmatprep.subr.mxu1 %v14070_v14  ;;  %11892 = vmatprep.mubr.f32.mxu0 %v9239_v36  ;;  %v9248_v22 = vsub.f32 %v9246_v61, %v9247_v54  ;;  %v9148_v42 = vld [vmem:[#allocation3] sm:$0xff] }
0x1745   :  { %11922 = vmatpush3.msra.mxu1 %v14070_v14  ;;  %v9695_v38 = vsel %vm687_vm2, %v9148_v42, 0 }
0x1746   :  { %11923 = vmatprep.subr.mxu1 %v14082_v48  ;;  %v9249_v58 = vand.u32 4294901760, %v9248_v22 }
0x1747   :  { %11924 = vmatpush3.msra.mxu1 %v14082_v48 }
0x1748   :  { %11926 = vmatmul.mubr.f32.vlgmr.msra.gmra.mxu1 %v9247_v54  ;;  %11939 = vmatprep.subr.mxu1 %v14055_v47  ;;  %v9149_v32 = vld [vmem:[#allocation3 + $0x8] sm:$0xff] }
0x1749   :  { %11893 = vmatmul.mubr.f32.vlgmr.msra.gmra.mxu0 %v9249_v58  ;;  %11940 = vmatpush3.msra.mxu1 %v14055_v47  ;;  %v14180_v47 = vand.u32 4294901760, %v9695_v38 }
0x174a   :  { %11907 = vmatpush3.msra.mxu0 %v14058_v19  ;;  %11947 = vmatprep.mubr.f32.mxu1 %v14126_v28  ;;  %v14183_v19 = vand.u32 4294901760, %v14163_v35 }
0x174b   :  { %11908 = vmatprep.subr.mxu0 %v14068_v49  ;;  %11914 = vmatprep.mubr.f32.mxu0 %v9236_v37  ;;  %v9770_v18 = vsub.f32 %v9695_v38, %v14180_v47 }
0x174c   :  { %11941 = vmatprep.subr.mxu1 %v14060_v40  ;;  %11909 = vmatpush3.msra.mxu0 %v14068_v49  ;;  %v9818_v49 = vand.u32 4294901760, %v9817_v0 }
0x174d   :  { %11942 = vmatpush3.msra.mxu1 %v14060_v40  ;;  %11910 = vmatprep.subr.mxu0 %v14080_v2  ;;  %v9831_v40 = vsub.f32 %v14163_v35, %v14183_v19  ;;  %v9771_v52 = vand.u32 4294901760, %v9770_v18 }
0x174e   :  { %11943 = vmatprep.subr.mxu1 %v14070_v14  ;;  %11911 = vmatpush3.msra.mxu0 %v14080_v2  ;;  %v9698_v2 = vsel %vm687_vm2, %v9149_v32, 0 }
0x174f   :  { %11944 = vmatpush3.msra.mxu1 %v14070_v14  ;;  %11912 = vmatprep.subr.mxu0 %v14092_v12  ;;  %v9825_v14 = vand.u32 4294901760, %v9824_v13  ;;  %v9832_v43 = vand.u32 4294901760, %v9831_v40  ;;  %v9772_v55 = vsub.f32 %v9770_v18, %v9771_v52 }
0x1750   :  { %11945 = vmatprep.subr.mxu1 %v14082_v48  ;;  %11913 = vmatpush3.msra.mxu0 %v14092_v12  ;;  %v14208_v12 = vand.u32 4294901760, %v9698_v2 }
0x1751   :  { %11946 = vmatpush3.msra.mxu1 %v14082_v48  ;;  %11915 = vmatmul.mubr.f32.vlgmr.msra.gmra.mxu0 %v9246_v61  ;;  %v9839_v48 = vand.u32 4294901760, %v9838_v17  ;;  %v9773_v24 = vand.u32 4294901760, %v9772_v55 }
0x1752   :  { %11928 = vmatprep.subr.mxu0 %v14065_v62  ;;  %11948 = vmatmul.mubr.f32.vlgmr.msra.gmra.mxu1 %v14132_v33 }
0x1753   :  { %11961 = vmatprep.subr.mxu1 %v9818_v49  ;;  %11929 = vmatpush3.msra.mxu0 %v14065_v62  ;;  %v9780_v62 = vsub.f32 %v9698_v2, %v14208_v12 }
0x1754   :  { %11936 = vmatprep.mubr.f32.mxu0 %v14126_v28  ;;  %11962 = vmatpush3.msra.mxu1 %v9818_v49 }
0x1755   :  { %11969 = vmatprep.mubr.f32.mxu1 %v14180_v47  ;;  %11930 = vmatprep.subr.mxu0 %v14077_v4 }
0x1756   :  { %11963 = vmatprep.subr.mxu1 %v9825_v14  ;;  %11931 = vmatpush3.msra.mxu0 %v14077_v4  ;;  %v9781_v4 = vand.u32 4294901760, %v9780_v62 }
0x1757   :  { %11964 = vmatpush3.msra.mxu1 %v9825_v14  ;;  %11932 = vmatprep.subr.mxu0 %v14089_v57 }
0x1758   :  { %11965 = vmatprep.subr.mxu1 %v9832_v43  ;;  %11933 = vmatpush3.msra.mxu0 %v14089_v57  ;;  %v9782_v57 = vsub.f32 %v9780_v62, %v9781_v4 }
0x1759   :  { %11966 = vmatpush3.msra.mxu1 %v9832_v43  ;;  %11934 = vmatprep.subr.mxu0 %v14099_v59 }
0x175a   :  { %11967 = vmatprep.subr.mxu1 %v9839_v48  ;;  %11935 = vmatpush3.msra.mxu0 %v14099_v59  ;;  %v9783_v59 = vand.u32 4294901760, %v9782_v57 }
0x175b   :  { %11968 = vmatpush3.msra.mxu1 %v9839_v48  ;;  %11937 = vmatmul.mubr.f32.vlgmr.msra.gmra.mxu0 %v14132_v33 }
0x175c   :  { %11950 = vmatprep.subr.mxu0 %v14134_v20  ;;  %11970 = vmatmul.mubr.f32.vlgmr.msra.gmra.mxu1 %v14208_v12 }
0x175d   :  { %11983 = vmatprep.subr.mxu1 %v14134_v20  ;;  %11951 = vmatpush3.msra.mxu0 %v14134_v20 }
0x175e   :  { %11958 = vmatprep.mubr.f32.mxu0 %v9773_v24  ;;  %11984 = vmatpush3.msra.mxu1 %v14134_v20 }
0x175f   :  { %11991 = vmatprep.mubr.f32.mxu1 %v9771_v52  ;;  %11952 = vmatprep.subr.mxu0 %v14141_v31 }
0x1760   :  { %11985 = vmatprep.subr.mxu1 %v14141_v31  ;;  %11953 = vmatpush3.msra.mxu0 %v14141_v31 }
0x1761   :  { %11986 = vmatpush3.msra.mxu1 %v14141_v31  ;;  %11954 = vmatprep.subr.mxu0 %v14148_v56 }
0x1762   :  { %11987 = vmatprep.subr.mxu1 %v14148_v56  ;;  %11955 = vmatpush3.msra.mxu0 %v14148_v56 }
0x1763   :  { %11988 = vmatpush3.msra.mxu1 %v14148_v56  ;;  %11956 = vmatprep.subr.mxu0 %v14155_v9 }
0x1764   :  { %11989 = vmatprep.subr.mxu1 %v14155_v9  ;;  %11957 = vmatpush3.msra.mxu0 %v14155_v9 }
0x1765   :  { %11990 = vmatpush3.msra.mxu1 %v14155_v9  ;;  %11959 = vmatmul.mubr.f32.vlgmr.msra.gmra.mxu0 %v9783_v59 }
0x1766   :  { %11972 = vmatprep.subr.mxu0 %v14145_v39  ;;  %11992 = vmatmul.mubr.f32.vlgmr.msra.gmra.mxu1 %v9781_v4 }
0x1767   :  { %12005 = vmatprep.subr.mxu1 %v14134_v20  ;;  %11973 = vmatpush3.msra.mxu0 %v14145_v39 }
0x1768   :  { %11980 = vmatprep.mubr.f32.mxu0 %v9770_v18  ;;  %12006 = vmatpush3.msra.mxu1 %v14134_v20 }
0x1769   :  { %12013 = vmatprep.mubr.f32.mxu1 %v14180_v47  ;;  %11974 = vmatprep.subr.mxu0 %v14153_v10 }
0x176a   :  { %12007 = vmatprep.subr.mxu1 %v14141_v31  ;;  %11975 = vmatpush3.msra.mxu0 %v14153_v10 }
0x176b   :  { %12008 = vmatpush3.msra.mxu1 %v14141_v31  ;;  %11976 = vmatprep.subr.mxu0 %v14163_v35 }
0x176c   :  { %12009 = vmatprep.subr.mxu1 %v14148_v56  ;;  %11977 = vmatpush3.msra.mxu0 %v14163_v35 }
0x176d   :  { %12010 = vmatpush3.msra.mxu1 %v14148_v56  ;;  %11978 = vmatprep.subr.mxu0 %v14173_v27 }
0x176e   :  { %12011 = vmatprep.subr.mxu1 %v14155_v9  ;;  %11979 = vmatpush3.msra.mxu0 %v14173_v27  ;;  %v10275_v27 = vld [vmem:[%s14283_s7] ss:$0 sm:$0xff] }
0x176f   :  { %12012 = vmatpush3.msra.mxu1 %v14155_v9  ;;  %11981 = vmatmul.mubr.f32.vlgmr.msra.gmra.mxu0 %v9780_v62 }
0x1770   :  { %11994 = vmatprep.subr.mxu0 %v14159_v53  ;;  %12014 = vmatmul.mubr.f32.vlgmr.msra.gmra.mxu1 %v14208_v12 }
0x1771   :  { %11995 = vmatpush3.msra.mxu0 %v14159_v53  ;;  %12002 = vmatprep.mubr.f32.mxu0 %v14180_v47 }
0x1772   :  { %11996 = vmatprep.subr.mxu0 %v14170_v1 }
0x1773   :  { %11997 = vmatpush3.msra.mxu0 %v14170_v1 }
0x1774   :  { %11998 = vmatprep.subr.mxu0 %v14183_v19 }
0x1775   :  { %11999 = vmatpush3.msra.mxu0 %v14183_v19 }
0x1776   :  { %12000 = vmatprep.subr.mxu0 %v14192_v26 }
0x1777   :  { %12001 = vmatpush3.msra.mxu0 %v14192_v26 }
0x1778   :  { %12003 = vmatmul.mubr.f32.vlgmr.msra.gmra.mxu0 %v14208_v12 }
0x1800   :  { %v11905_v44 = vpop.f32.mrf.mxu1 }
0x1802   :  { %v9342_v30 = vpop.f32.mrf.mxu1 }
0x1808   :  { %v11927_v51 = vpop.f32.mrf.mxu1 }
0x1809   :  { %v11894_v45 = vpop.f32.mrf.mxu0 }
0x180a   :  { %v9349_v16 = vadd.f32 %v11905_v44, %v11894_v45  ;;  %v9512_v28 = vpop.f32.mrf.mxu1 }
0x180b   :  { %v9241_v29 = vpop.f32.mrf.mxu0 }
0x180c   :  { %v9343_v63 = vadd.f32 %v9342_v30, %v9241_v29 }
0x1811   :  { %v11916_v23 = vpop.f32.mrf.mxu0 }
0x1812   :  { %v9436_v41 = vadd.f32 %v11916_v23, %v9349_v16  ;;  %v11949_v25 = vpop.f32.mrf.mxu1 }
0x1813   :  { %v9428_v3 = vpop.f32.mrf.mxu0 }
0x1814   :  { %v9429_v50 = vadd.f32 %v9428_v3, %v9343_v63  ;;  %v9521_v21 = vadd.f32 %v11927_v51, %v9436_v41  ;;  %v9684_v20 = vpop.f32.mrf.mxu1 }
0x1816   :  { %v9513_v6 = vadd.f32 %v9512_v28, %v9429_v50 }
0x181b   :  { %v11938_v7 = vpop.f32.mrf.mxu0 }
0x181c   :  { %v9610_v5 = vadd.f32 %v11938_v7, %v9521_v21  ;;  %v11971_v60 = vpop.f32.mrf.mxu1 }
0x181d   :  { %v9603_v37 = vpop.f32.mrf.mxu0 }
0x181e   :  { %v9604_v8 = vadd.f32 %v9603_v37, %v9513_v6  ;;  %v9691_v11 = vadd.f32 %v11949_v25, %v9610_v5  ;;  %v9876_v31 = vpop.f32.mrf.mxu1 }
0x1820   :  { %v9685_v15 = vadd.f32 %v9684_v20, %v9604_v8 }
0x1825   :  { %v11960_v33 = vpop.f32.mrf.mxu0 }
0x1826   :  { %v9786_v34 = vadd.f32 %v11960_v33, %v9691_v11  ;;  %v11993_v46 = vpop.f32.mrf.mxu1 }
0x1827   :  { %v9775_v61 = vpop.f32.mrf.mxu0 }
0x1828   :  { %v9776_v36 = vadd.f32 %v9775_v61, %v9685_v15  ;;  %v9883_v39 = vadd.f32 %v11971_v60, %v9786_v34  ;;  %v10046_v10 = vpop.f32.mrf.mxu1 }
0x182a   :  { %v9877_v58 = vadd.f32 %v9876_v31, %v9776_v36 }
0x182f   :  { %v11982_v54 = vpop.f32.mrf.mxu0 }
0x1830   :  { %v9970_v56 = vadd.f32 %v11982_v54, %v9883_v39  ;;  %v12015_v53 = vpop.f32.mrf.mxu1 }
0x1831   :  { %v9962_v22 = vpop.f32.mrf.mxu0 }
0x1832   :  { %v9963_v42 = vadd.f32 %v9962_v22, %v9877_v58  ;;  %v10055_v9 = vadd.f32 %v11993_v46, %v9970_v56  ;;  %v10218_v32 = vpop.f32.mrf.mxu1 }
0x1834   :  { %v10047_v1 = vadd.f32 %v10046_v10, %v9963_v42 }
0x1838   :  { %v12004_v35 = vpop.f32.mrf.mxu0 }
0x1839   :  { %v10144_v38 = vadd.f32 %v12004_v35, %v10055_v9 }
0x183a   :  { %v10137_v0 = vpop.f32.mrf.mxu0 }
0x183b   :  { %v10225_v47 = vadd.f32 %v12015_v53, %v10144_v38  ;;  %v10138_v19 = vadd.f32 %v10137_v0, %v10047_v1 }
0x183d   :  { %v10236_v13 = vadd.f32 %v10275_v27, %v10225_v47  ;;  %v10219_v26 = vadd.f32 %v10218_v32, %v10138_v19 }
0x183f   :  { %10238 = vst.msk [vmem:[#allocation16 + $0x8] sm:$0xff] %vm687_vm2, %v10236_v13  ;;  %v10235_v49 = vadd.f32 %v10275_v27, %v10219_v26 }
0x1841   :  { %10237 = vst.msk [vmem:[#allocation16] sm:$0xff] %vm687_vm2, %v10235_v49 }
0x1842   :  { %12290 = shalt.err (!%p12287_p6)
}
0x1843   :  { %10250 = dma.vmem_to_hbm [thread:$0]  %s10245_s19, 256, %s14284_s8, [#allocation7], %s12314_s17, %s12314_s17, %s12315_s18  }
0x1844   :  { %12307 = dma.done.wait [#allocation7], 256  }
0x1845   :  { %12308 = vsyncadd [#allocation7], 4294967040 }
0x1846   :  { %10254 = vsyncpa [#allocation6], 1 }
0x1847   :  { %10255 = vsyncpa [#allocation9], 1 }
0x1848   :  { %10256 = vsyncpa [#allocation12], 1 }
0x1849   :  { %10257 = vsyncpa [#allocation15], 1 }
0x184a   :  { %10258 = vsyncpa [#allocation7], 1 }

</bundles_post_ra>
